<compile_context>
chip_gen: v5e
topology: v5e:2x2
jax: 0.10.0
libtpu: 0.0.40
codegen_flags: <defaults>
</compile_context>

<pallas_src>
import jax
import jax.numpy as jnp
from jax import lax
from jax.experimental import pallas as pl
from jax.experimental.pallas import tpu as pltpu

BN_EPS = 1e-5


def projection_head_kernel(x_ref, w1_ref, w2_ref, bn_ref, o_ref):
    inv_b = 1.0 / x_ref.shape[0]          # static batch size
    out_dim = o_ref.shape[1]

    # BN params, packed as rows of a single (4, hidden) f32 tile:
    #   row 0: gamma1 (512)   row 1: beta1 (512)
    #   row 2: gamma2 (128, zero-padded)   row 3: beta2 (128, zero-padded)
    g1 = bn_ref[0:1, :]
    b1 = bn_ref[1:2, :]
    g2 = bn_ref[2:3, 0:out_dim]
    b2 = bn_ref[3:4, 0:out_dim]

    # ---- block 1: Linear(640 -> 512, bias=False) on MXU (bf16 in, f32 acc) ----
    h = jnp.dot(x_ref[...], w1_ref[...], preferred_element_type=jnp.float32)

    # BatchNorm1d (batch stats), two-pass centered variance (f32 throughout).
    mean1 = jnp.sum(h, axis=0, keepdims=True) * inv_b
    d1 = h - mean1
    var1 = jnp.sum(d1 * d1, axis=0, keepdims=True) * inv_b
    scale1 = g1 * lax.rsqrt(var1 + BN_EPS)
    h_act = jnp.maximum(d1 * scale1 + b1, 0.0)            # BN + ReLU

    # ---- block 2: Linear(512 -> 128, bias=False) + BatchNorm1d ----
    z = jnp.dot(h_act.astype(jnp.bfloat16), w2_ref[...],
                preferred_element_type=jnp.float32)
    mean2 = jnp.sum(z, axis=0, keepdims=True) * inv_b
    d2 = z - mean2
    var2 = jnp.sum(d2 * d2, axis=0, keepdims=True) * inv_b
    scale2 = g2 * lax.rsqrt(var2 + BN_EPS)
    o_ref[...] = (d2 * scale2 + b2).astype(o_ref.dtype)


def _vmem_bytes_estimate(B, in_dim, hidden_dim, out_dim):
    """Live-set estimate for the single-block kernel (bytes)."""
    weights = in_dim * hidden_dim * 2 + hidden_dim * out_dim * 2   # bf16 W1, W2
    bn = 8 * hidden_dim * 4                                        # (4,hid) -> (8,hid) f32 tile
    per_row = (in_dim * 2              # x (bf16)
               + hidden_dim * 4 * 2    # h + centered d1 (f32)
               + hidden_dim * 2        # ReLU(BN(h)) cast to bf16
               + out_dim * 4 * 2       # z + centered d2 (f32)
               + out_dim * 4)          # output (f32)
    return weights + bn + B * per_row


def supce_wideresnet_projection(x, params, out_dtype=jnp.float32):
    """x: [B, 640] float32 -> z: [B, 128] (f32 by default; bf16 is safe if the
    downstream contrastive loss re-normalizes z and halves the writeback DMA)."""
    w1, w2, bn = params
    B = x.shape[0]
    in_dim, hidden_dim = w1.shape
    out_dim = w2.shape[1]

    flops = 2 * B * in_dim * hidden_dim + 2 * B * hidden_dim * out_dim
    bytes_accessed = (B * in_dim * 2                       # x (bf16)
                      + in_dim * hidden_dim * 2            # W1 (bf16)
                      + hidden_dim * out_dim * 2           # W2 (bf16)
                      + 4 * hidden_dim * 4                 # packed BN gamma/beta (f32)
                      + B * out_dim * jnp.dtype(out_dtype).itemsize)

    # Scoped-VMEM request: 2x live-set for compiler temps + 1 MiB slack, floored
    # at 8 MiB and capped at v7x's 64 MiB physical VMEM.
    vmem_limit = min(64 << 20,
                     max(8 << 20,
                         2 * _vmem_bytes_estimate(B, in_dim, hidden_dim, out_dim)
                         + (1 << 20)))

    return pl.pallas_call(
        projection_head_kernel,
        out_shape=jax.ShapeDtypeStruct((B, out_dim), out_dtype),
        in_specs=[pl.BlockSpec(memory_space=pltpu.MemorySpace.VMEM)] * 4,
        out_specs=pl.BlockSpec(memory_space=pltpu.MemorySpace.VMEM),
        compiler_params=pltpu.CompilerParams(vmem_limit_bytes=int(vmem_limit)),
        cost_estimate=pl.CostEstimate(
            flops=flops,
            transcendentals=hidden_dim + out_dim,          # two rsqrt rows
            bytes_accessed=int(bytes_accessed)),
    )(x.astype(jnp.bfloat16), w1, w2, bn)


def init_params(key, input_dim=640, hidden_dim=512, output_dim=128):
    """Deterministic init mirroring the PyTorch module shapes.

    Linear layers use bias=False (each is followed by BatchNorm1d).  Weights
    are stored [in, out] in bf16 (native MXU path).  BN gamma=1, beta=0
    (PyTorch default init), packed into one (4, hidden_dim) f32 array:
    rows = [gamma1, beta1, gamma2(zero-padded), beta2(zero-padded)]."""
    k1, k2 = jax.random.split(key, 2)
    bound1 = 1.0 / jnp.sqrt(input_dim)
    bound2 = 1.0 / jnp.sqrt(hidden_dim)
    w1 = jax.random.uniform(k1, (input_dim, hidden_dim), jnp.float32,
                            minval=-bound1, maxval=bound1).astype(jnp.bfloat16)
    w2 = jax.random.uniform(k2, (hidden_dim, output_dim), jnp.float32,
                            minval=-bound2, maxval=bound2).astype(jnp.bfloat16)
    bn = jnp.zeros((4, hidden_dim), jnp.float32)
    bn = bn.at[0, :].set(1.0)                              # gamma1
    bn = bn.at[2, :output_dim].set(1.0)                    # gamma2
    # beta1 / beta2 rows stay zero.
    return (w1, w2, bn)


def reference_forward(x, params):
    """Pure-JAX reference (training-mode BatchNorm1d, same bf16 matmul inputs)."""
    w1, w2, bn = params
    out_dim = w2.shape[1]
    g1, b1 = bn[0:1, :], bn[1:2, :]
    g2, b2 = bn[2:3, :out_dim], bn[3:4, :out_dim]
    h = jnp.dot(x.astype(jnp.bfloat16), w1, preferred_element_type=jnp.float32)
    m = h.mean(0, keepdims=True)
    v = ((h - m) ** 2).mean(0, keepdims=True)
    h = (h - m) / jnp.sqrt(v + BN_EPS) * g1 + b1
    h = jnp.maximum(h, 0.0)
    z = jnp.dot(h.astype(jnp.bfloat16), w2, preferred_element_type=jnp.float32)
    m = z.mean(0, keepdims=True)
    v = ((z - m) ** 2).mean(0, keepdims=True)
    z = (z - m) / jnp.sqrt(v + BN_EPS) * g2 + b2
    return z


if __name__ == "__main__":
    key = jax.random.PRNGKey(0)
    kx, kp = jax.random.split(key)

    # wresnet28_10 encoder feature dim is 640; B=128 fills one sublane-aligned
    # M tile (a full MXU tile on v5e; on v6e/v7x run both SupCon views in one
    # call so M is a multiple of 256 if this ever becomes compute-bound).
    B, DIM_IN = 128, 640
    x = jax.random.normal(kx, (B, DIM_IN), jnp.float32)
    params = init_params(kp, input_dim=DIM_IN, hidden_dim=512, output_dim=128)

    z = supce_wideresnet_projection(x, params)
    z = jax.block_until_ready(z)

    z_ref = reference_forward(x, params)
    assert z.shape == (B, 128), z.shape
    # BN-normalized outputs are O(1); bf16 matmul inputs + reduction-order
    # differences bound the error well under 2e-2.
    assert jnp.allclose(z, z_ref, atol=2e-2, rtol=2e-2), "mismatch vs reference"

    print("KERNEL_OK")
</pallas_src>

<mosaic_0001>
module attributes {stable_mosaic.version = 11 : i64} {
  func.func @projection_head_kernel(%arg0: memref<128x640xbf16, #tpu.memory_space<vmem>>, %arg1: memref<640x512xbf16, #tpu.memory_space<vmem>>, %arg2: memref<512x128xbf16, #tpu.memory_space<vmem>>, %arg3: memref<4x512xf32, #tpu.memory_space<vmem>>, %arg4: memref<128x128xf32, #tpu.memory_space<vmem>>) attributes {dimension_semantics = [], scalar_prefetch = 0 : i64, scratch_operands = 0 : i64, tpu.core_type = #tpu.core_type<tc>} {
    %c0 = arith.constant 0 : index
    %c0_0 = arith.constant 0 : index
    %0 = vector.load %arg3[%c0, %c0_0] : memref<4x512xf32, #tpu.memory_space<vmem>>, vector<1x512xf32>
    %c1 = arith.constant 1 : index
    %c0_1 = arith.constant 0 : index
    %1 = vector.load %arg3[%c1, %c0_1] : memref<4x512xf32, #tpu.memory_space<vmem>>, vector<1x512xf32>
    %c2 = arith.constant 2 : index
    %c0_2 = arith.constant 0 : index
    %2 = vector.load %arg3[%c2, %c0_2] : memref<4x512xf32, #tpu.memory_space<vmem>>, vector<1x128xf32>
    %c3 = arith.constant 3 : index
    %c0_3 = arith.constant 0 : index
    %3 = vector.load %arg3[%c3, %c0_3] : memref<4x512xf32, #tpu.memory_space<vmem>>, vector<1x128xf32>
    %c0_4 = arith.constant 0 : index
    %c0_5 = arith.constant 0 : index
    %4 = vector.load %arg0[%c0_4, %c0_5] : memref<128x640xbf16, #tpu.memory_space<vmem>>, vector<128x640xbf16>
    %c0_6 = arith.constant 0 : index
    %c0_7 = arith.constant 0 : index
    %5 = vector.load %arg1[%c0_6, %c0_7] : memref<640x512xbf16, #tpu.memory_space<vmem>>, vector<640x512xbf16>
    %cst = arith.constant dense<0.000000e+00> : vector<128x512xf32>
    %6 = tpu.matmul %4, %5, %cst {dimension_numbers = #tpu.dot_dimension_numbers<[1], [0], [0], [1], [0, 0, 1, 1], [], []>} : vector<128x640xbf16>, vector<640x512xbf16>, vector<128x512xf32> -> vector<128x512xf32>
    %cst_8 = arith.constant dense<0.000000e+00> : vector<512xf32>
    %7 = vector.multi_reduction <add>, %6, %cst_8 [0] : vector<128x512xf32> to vector<512xf32>
    %8 = vector.shape_cast %7 : vector<512xf32> to vector<1x512xf32>
    %cst_9 = arith.constant 7.812500e-03 : f32
    %9 = vector.broadcast %cst_9 : f32 to vector<1x512xf32>
    %10 = arith.mulf %8, %9 : vector<1x512xf32>
    %11 = vector.broadcast %10 : vector<1x512xf32> to vector<128x512xf32>
    %12 = arith.subf %6, %11 : vector<128x512xf32>
    %13 = arith.mulf %12, %12 : vector<128x512xf32>
    %cst_10 = arith.constant dense<0.000000e+00> : vector<512xf32>
    %14 = vector.multi_reduction <add>, %13, %cst_10 [0] : vector<128x512xf32> to vector<512xf32>
    %15 = vector.shape_cast %14 : vector<512xf32> to vector<1x512xf32>
    %cst_11 = arith.constant 7.812500e-03 : f32
    %16 = vector.broadcast %cst_11 : f32 to vector<1x512xf32>
    %17 = arith.mulf %15, %16 : vector<1x512xf32>
    %cst_12 = arith.constant 9.99999974E-6 : f32
    %18 = vector.broadcast %cst_12 : f32 to vector<1x512xf32>
    %19 = arith.addf %17, %18 : vector<1x512xf32>
    %20 = math.rsqrt %19 : vector<1x512xf32>
    %21 = arith.mulf %0, %20 : vector<1x512xf32>
    %22 = vector.broadcast %21 : vector<1x512xf32> to vector<128x512xf32>
    %23 = arith.mulf %12, %22 : vector<128x512xf32>
    %24 = vector.broadcast %1 : vector<1x512xf32> to vector<128x512xf32>
    %25 = arith.addf %23, %24 : vector<128x512xf32>
    %cst_13 = arith.constant 0.000000e+00 : f32
    %26 = vector.broadcast %cst_13 : f32 to vector<128x512xf32>
    %27 = arith.maximumf %25, %26 : vector<128x512xf32>
    %28 = arith.truncf %27 : vector<128x512xf32> to vector<128x512xbf16>
    %c0_14 = arith.constant 0 : index
    %c0_15 = arith.constant 0 : index
    %29 = vector.load %arg2[%c0_14, %c0_15] : memref<512x128xbf16, #tpu.memory_space<vmem>>, vector<512x128xbf16>
    %cst_16 = arith.constant dense<0.000000e+00> : vector<128x128xf32>
    %30 = tpu.matmul %28, %29, %cst_16 {dimension_numbers = #tpu.dot_dimension_numbers<[1], [0], [0], [1], [0, 0, 1, 1], [], []>} : vector<128x512xbf16>, vector<512x128xbf16>, vector<128x128xf32> -> vector<128x128xf32>
    %cst_17 = arith.constant dense<0.000000e+00> : vector<128xf32>
    %31 = vector.multi_reduction <add>, %30, %cst_17 [0] : vector<128x128xf32> to vector<128xf32>
    %32 = vector.shape_cast %31 : vector<128xf32> to vector<1x128xf32>
    %cst_18 = arith.constant 7.812500e-03 : f32
    %33 = vector.broadcast %cst_18 : f32 to vector<1x128xf32>
    %34 = arith.mulf %32, %33 : vector<1x128xf32>
    %35 = vector.broadcast %34 : vector<1x128xf32> to vector<128x128xf32>
    %36 = arith.subf %30, %35 : vector<128x128xf32>
    %37 = arith.mulf %36, %36 : vector<128x128xf32>
    %cst_19 = arith.constant dense<0.000000e+00> : vector<128xf32>
    %38 = vector.multi_reduction <add>, %37, %cst_19 [0] : vector<128x128xf32> to vector<128xf32>
    %39 = vector.shape_cast %38 : vector<128xf32> to vector<1x128xf32>
    %cst_20 = arith.constant 7.812500e-03 : f32
    %40 = vector.broadcast %cst_20 : f32 to vector<1x128xf32>
    %41 = arith.mulf %39, %40 : vector<1x128xf32>
    %cst_21 = arith.constant 9.99999974E-6 : f32
    %42 = vector.broadcast %cst_21 : f32 to vector<1x128xf32>
    %43 = arith.addf %41, %42 : vector<1x128xf32>
    %44 = math.rsqrt %43 : vector<1x128xf32>
    %45 = arith.mulf %2, %44 : vector<1x128xf32>
    %46 = vector.broadcast %45 : vector<1x128xf32> to vector<128x128xf32>
    %47 = arith.mulf %36, %46 : vector<128x128xf32>
    %48 = vector.broadcast %3 : vector<1x128xf32> to vector<128x128xf32>
    %49 = arith.addf %47, %48 : vector<128x128xf32>
    %c0_22 = arith.constant 0 : index
    %c0_23 = arith.constant 0 : index
    %50 = vector.load %arg4[%c0_22, %c0_23] : memref<128x128xf32, #tpu.memory_space<vmem>>, vector<128x128xf32>
    tpu.vector_store %arg4[%c0_22, %c0_23], %49 {strides = array<i32>} : memref<128x128xf32, #tpu.memory_space<vmem>>, vector<128x128xf32>,
    return
  }
}

</mosaic_0001>

<bundles_post_ra>
// kernel: tpu_custom_call.1
= control target key start
LH: loop header
LB: loop body
LE: loop exit
PB: predicated region body
PF: predicated region fallthrough
CT: control target
= control target key end

     0   :  { %9 = vsyncpa [#allocation3], 0  ;;  %s6283_s0 = inlined_call_operand.hbm [shape: bf16[128,640], index: 0, kind: input, shape index: {}]   ;;  %s6284_s1 = inlined_call_operand.hbm [shape: bf16[640,512], index: 1, kind: input, shape index: {}]   ;;  %s6285_s2 = inlined_call_operand.hbm [shape: bf16[512,128], index: 2, kind: input, shape index: {}]   ;;  %s6286_s3 = inlined_call_operand.hbm [shape: f32[4,512], index: 3, kind: input, shape index: {}]   ;;  %s6287_s4 = inlined_call_operand.hbm [shape: f32[128,128], index: 4, kind: output, shape index: {}]  }
   0x1   :  { %10 = vsyncpa [#allocation6], 0 }
   0x2   :  { %11 = vsyncpa [#allocation9], 0  ;;  %s30_s17 = sshll.u32 %s6284_s1, 4  ;;  %s31_s17 = int_to_ptr.hbm [resolvable:$true] %s30_s17 }
   0x3   :  { %12 = vsyncpa [#allocation4], 0  ;;  %s4808_s18 = smov [#allocation5]   ;;  %s17_s22 = sshll.u32 %s6283_s0, 4  ;;  %s18_s22 = int_to_ptr.hbm [resolvable:$true] %s17_s22 }
   0x4   :  { %s32_s19 = sshll.u32 %s4808_s18, 4  ;;  %s4809_s23 = smov 256   ;;  %s33_s19 = int_to_ptr.vmem [resolvable:$true] %s32_s19 }
   0x5   :  { %s4810_s24 = smov 16   ;;  %s4811_s25 = smov [#allocation2]  }
   0x6   :  { %38 = dma.hbm_to_vmem [thread:$0]  %s31_s17, 20480, %s33_s19, [#allocation6], %s4809_s23, %s4809_s23, %s4810_s24  }
   0x7   :  { %s19_s26 = sshll.u32 %s4811_s25, 4  ;;  %s4812_s27 = smov 320   ;;  %s20_s26 = int_to_ptr.vmem [resolvable:$true] %s19_s26 }
   0x8   :  { %s4813_s28 = smov 20   ;;  %s43_s30 = sshll.u32 %s6285_s2, 4  ;;  %s44_s30 = int_to_ptr.hbm [resolvable:$true] %s43_s30 }
   0x9   :  { %25 = dma.hbm_to_vmem [thread:$0]  %s18_s22, 5120, %s20_s26, [#allocation3], %s4812_s27, %s4812_s27, %s4813_s28  }
   0xa   :  { %s4814_s5 = smov [#allocation7]   ;;  %s57_s8 = sshll.u32 %s6286_s3, 4  ;;  %s58_s8 = int_to_ptr.hbm [resolvable:$true] %s57_s8 }
   0xb   :  { %s45_s6 = sshll.u32 %s4814_s5, 4  ;;  %s4815_s9 = smov 64   ;;  %s46_s6 = int_to_ptr.vmem [resolvable:$true] %s45_s6 }
   0xc   :  { %s4816_s10 = smov 4   ;;  %s4817_s11 = smov [#allocation8]  }
   0xd   :  { %51 = dma.hbm_to_vmem [thread:$0]  %s44_s30, 4096, %s46_s6, [#allocation6], %s4815_s9, %s4815_s9, %s4816_s10  }
   0xe   :  { %s59_s12 = sshll.u32 %s4817_s11, 4  ;;  %s60_s12 = int_to_ptr.vmem [resolvable:$true] %s59_s12 }
   0xf   :  { %62 = dma.hbm_to_vmem [thread:$0]  %s58_s8, 256, %s60_s12, [#allocation9]  }
  0x10   :  { %4800 = dma.done.wait [#allocation3], 5120  }
  0x11   :  { %4801 = vsyncadd [#allocation3], 4294962176 }
  0x12   :  { %4802 = dma.done.wait [#allocation6], 24576  }
  0x13   :  { %4803 = vsyncadd [#allocation6], 4294942720 }
  0x14   :  { %4804 = dma.done.wait [#allocation9], 256  }
  0x15   :  { %4805 = vsyncadd [#allocation9], 4294967040  ;;  %v3770_v0 = vld [vmem:[#allocation5 + $0xe0] sm:$0xf]  ;;  %v4494_v1 = vld [vmem:[#allocation5 + $0xec] sm:$0xf0] }
  0x16   :  { %v3898_v2 = vld [vmem:[#allocation5 + $0x1e0] sm:$0xf]  ;;  %v3771_v3 = vor.u32 %v4494_v1, %v3770_v0  ;;  %v4526_v4 = vld [vmem:[#allocation5 + $0x1ec] sm:$0xf0]  ;;  %vm2635_vm11 = vcmask 1040384   ;;  %vm2637_vm12 = vcmask 1042434  }
  0x17   :  { %v4026_v5 = vld [vmem:[#allocation5 + $0x2e0] sm:$0xf]  ;;  %v4558_v6 = vld [vmem:[#allocation5 + $0x2ec] sm:$0xf0]  ;;  %v3899_v7 = vor.u32 %v4526_v4, %v3898_v2  ;;  %vm2639_vm14 = vcmask 1041408   ;;  %s4818_s2 = smov [#allocation10]  }
  0x18   :  { %v4027_v8 = vor.u32 %v4558_v6, %v4026_v5  ;;  %v4154_v9 = vld [vmem:[#allocation5 + $0x3e0] sm:$0xf]  ;;  %v4590_v10 = vld [vmem:[#allocation5 + $0x3ec] sm:$0xf0]  ;;  %1300 = vmatpush.bf16.msra.mxu0 %v3771_v3  ;;  %s3479_s3 = sshll.u32 %s4818_s2, 4  ;;  %s3481_s15 = sshll.u32 %s6287_s4, 4  ;;  %s3480_s3 = int_to_ptr.vmem [resolvable:$true] %s3479_s3  ;;  %s3482_s15 = int_to_ptr.hbm [resolvable:$true] %s3481_s15 }
  0x19   :  { %v3754_v11 = vld [vmem:[#allocation5 + $0xc0] sm:$0xf]  ;;  %v4155_v12 = vor.u32 %v4590_v10, %v4154_v9  ;;  %v4490_v13 = vld [vmem:[#allocation5 + $0xcc] sm:$0xf0]  ;;  %1349 = vmatpush.bf16.msra.mxu1 %v3899_v7  ;;  %s4819_s16 = smov 128   ;;  %s4820_s17 = smov 8  }
  0x1a   :  { %v3882_v14 = vld [vmem:[#allocation5 + $0x1c0] sm:$0xf]  ;;  %v4522_v15 = vld [vmem:[#allocation5 + $0x1cc] sm:$0xf0]  ;;  %1398 = vmatpush.bf16.msra.mxu2 %v4027_v8  ;;  %v3755_v16 = vor.u32 %v4490_v13, %v3754_v11 }
  0x1b   :  { %v3883_v17 = vor.u32 %v4522_v15, %v3882_v14  ;;  %v4010_v18 = vld [vmem:[#allocation5 + $0x2c0] sm:$0xf]  ;;  %v4554_v19 = vld [vmem:[#allocation5 + $0x2cc] sm:$0xf0]  ;;  %1447 = vmatpush.bf16.msra.mxu3 %v4155_v12 }
  0x1c   :  { %v4138_v20 = vld [vmem:[#allocation5 + $0x3c0] sm:$0xf]  ;;  %v4011_v21 = vor.u32 %v4554_v19, %v4010_v18  ;;  %v4586_v22 = vld [vmem:[#allocation5 + $0x3cc] sm:$0xf0]  ;;  %1301 = vmatpush.bf16.msra.mxu0 %v3755_v16 }
  0x1d   :  { %v3738_v23 = vld [vmem:[#allocation5 + $0xa0] sm:$0xf]  ;;  %v4486_v24 = vld [vmem:[#allocation5 + $0xac] sm:$0xf0]  ;;  %v4139_v25 = vor.u32 %v4586_v22, %v4138_v20  ;;  %1350 = vmatpush.bf16.msra.mxu1 %v3883_v17 }
  0x1e   :  { %v3866_v26 = vld [vmem:[#allocation5 + $0x1a0] sm:$0xf]  ;;  %v4518_v27 = vld [vmem:[#allocation5 + $0x1ac] sm:$0xf0]  ;;  %v3739_v29 = vor.u32 %v4486_v24, %v3738_v23  ;;  %1399 = vmatpush.bf16.msra.mxu2 %v4011_v21 }
  0x1f   :  { %v3994_v28 = vld [vmem:[#allocation5 + $0x2a0] sm:$0xf]  ;;  %v4550_v30 = vld [vmem:[#allocation5 + $0x2ac] sm:$0xf0]  ;;  %v3867_v33 = vor.u32 %v4518_v27, %v3866_v26  ;;  %1448 = vmatpush.bf16.msra.mxu3 %v4139_v25 }
  0x20   :  { %v4122_v31 = vld [vmem:[#allocation5 + $0x3a0] sm:$0xf]  ;;  %v4582_v32 = vld [vmem:[#allocation5 + $0x3ac] sm:$0xf0]  ;;  %v3995_v34 = vor.u32 %v4550_v30, %v3994_v28  ;;  %1302 = vmatpush.bf16.msra.mxu0 %v3739_v29  ;;  %v4426_v29 = vld [vmem:[#allocation2 + $0x10] sm:$0xf0] }
  0x21   :  { %v3722_v35 = vld [vmem:[#allocation5 + $0x80] sm:$0xf]  ;;  %v4482_v36 = vld [vmem:[#allocation5 + $0x8c] sm:$0xf0]  ;;  %v4123_v38 = vor.u32 %v4582_v32, %v4122_v31  ;;  %1351 = vmatpush.bf16.msra.mxu1 %v3867_v33  ;;  %v4424_v30 = vld [vmem:[#allocation2 + $0x4] sm:$0xf] }
  0x22   :  { %v3850_v37 = vld [vmem:[#allocation5 + $0x180] sm:$0xf]  ;;  %v4514_v39 = vld [vmem:[#allocation5 + $0x18c] sm:$0xf0]  ;;  %v3723_v44 = vor.u32 %v4482_v36, %v3722_v35  ;;  %1400 = vmatpush.bf16.msra.mxu2 %v3995_v34  ;;  %v3500_v31 = vld [vmem:[#allocation2 + $0x14] sm:$0xf0] }
  0x23   :  { %v3978_v40 = vld [vmem:[#allocation5 + $0x280] sm:$0xf]  ;;  %v4546_v41 = vld [vmem:[#allocation5 + $0x28c] sm:$0xf0]  ;;  %v3851_v45 = vor.u32 %v4514_v39, %v3850_v37  ;;  %1449 = vmatpush.bf16.msra.mxu3 %v4123_v38  ;;  %v4524_v32 = vld [vmem:[#allocation5 + $0x1e4] sm:$0xf] }
  0x24   :  { %v4106_v42 = vld [vmem:[#allocation5 + $0x380] sm:$0xf]  ;;  %v4578_v43 = vld [vmem:[#allocation5 + $0x38c] sm:$0xf0]  ;;  %v3979_v46 = vor.u32 %v4546_v41, %v3978_v40  ;;  %1303 = vmatpush.bf16.msra.mxu0 %v3723_v44  ;;  %v3900_v33 = vld [vmem:[#allocation5 + $0x1f0] sm:$0xf0] }
  0x25   :  { %v3706_v47 = vld [vmem:[#allocation5 + $0x60] sm:$0xf]  ;;  %v4478_v48 = vld [vmem:[#allocation5 + $0x6c] sm:$0xf0]  ;;  %v4107_v50 = vor.u32 %v4578_v43, %v4106_v42  ;;  %1352 = vmatpush.bf16.msra.mxu1 %v3851_v45  ;;  %v3506_v35 = vld [vmem:[#allocation2 + $0x8] sm:$0xf]  ;;  %v3903_v44 = vor.u32 %v4524_v32, %v3900_v33 }
  0x26   :  { %v3834_v49 = vld [vmem:[#allocation5 + $0x160] sm:$0xf]  ;;  %v4510_v51 = vld [vmem:[#allocation5 + $0x16c] sm:$0xf0]  ;;  %v3707_v56 = vor.u32 %v4478_v48, %v3706_v47  ;;  %1401 = vmatpush.bf16.msra.mxu2 %v3979_v46  ;;  %v4556_v36 = vld [vmem:[#allocation5 + $0x2e4] sm:$0xf] }
  0x27   :  { %v3962_v52 = vld [vmem:[#allocation5 + $0x260] sm:$0xf]  ;;  %v4542_v53 = vld [vmem:[#allocation5 + $0x26c] sm:$0xf0]  ;;  %v3835_v57 = vor.u32 %v4510_v51, %v3834_v49  ;;  %1450 = vmatpush.bf16.msra.mxu3 %v4107_v50  ;;  %v4028_v37 = vld [vmem:[#allocation5 + $0x2f0] sm:$0xf0] }
  0x28   :  { %v4090_v54 = vld [vmem:[#allocation5 + $0x360] sm:$0xf]  ;;  %v4574_v55 = vld [vmem:[#allocation5 + $0x36c] sm:$0xf0]  ;;  %v3963_v58 = vor.u32 %v4542_v53, %v3962_v52  ;;  %1304 = vmatpush.bf16.msra.mxu0 %v3707_v56  ;;  %v4427_v40 = vld [vmem:[#allocation2 + $0x18] sm:$0xf0]  ;;  %v4031_v49 = vor.u32 %v4556_v36, %v4028_v37  ;;  %v4860_v53 = vor.u32 %v4424_v30, %v3500_v31 }
  0x29   :  { %v3690_v59 = vld [vmem:[#allocation5 + $0x40] sm:$0xf]  ;;  %v4474_v60 = vld [vmem:[#allocation5 + $0x4c] sm:$0xf0]  ;;  %v4091_v62 = vor.u32 %v4574_v55, %v4090_v54  ;;  %1353 = vmatpush.bf16.msra.mxu1 %v3835_v57  ;;  %v4425_v41 = vld [vmem:[#allocation2 + $0xc] sm:$0xf]  ;;  %v4862_v54 = vor.u32 %v4427_v40, %v3506_v35 }
  0x2a   :  { %v3818_v61 = vld [vmem:[#allocation5 + $0x140] sm:$0xf]  ;;  %v4506_v63 = vld [vmem:[#allocation5 + $0x14c] sm:$0xf0]  ;;  %v3691_v4 = vor.u32 %v4474_v60, %v3690_v59  ;;  %1402 = vmatpush.bf16.msra.mxu2 %v3963_v58  ;;  %v4492_v47 = vld [vmem:[#allocation5 + $0xe4] sm:$0xf] }
  0x2b   :  { %v3946_v0 = vld [vmem:[#allocation5 + $0x240] sm:$0xf]  ;;  %v4538_v1 = vld [vmem:[#allocation5 + $0x24c] sm:$0xf0]  ;;  %v3819_v5 = vor.u32 %v4506_v63, %v3818_v61  ;;  %1451 = vmatpush.bf16.msra.mxu3 %v4091_v62  ;;  %v3772_v50 = vld [vmem:[#allocation5 + $0xf0] sm:$0xf0] }
  0x2c   :  { %v4074_v2 = vld [vmem:[#allocation5 + $0x340] sm:$0xf]  ;;  %v4570_v3 = vld [vmem:[#allocation5 + $0x34c] sm:$0xf0]  ;;  %v3947_v6 = vor.u32 %v4538_v1, %v3946_v0  ;;  %1305 = vmatpush.bf16.msra.mxu0 %v3691_v4  ;;  %v4520_v51 = vld [vmem:[#allocation5 + $0x1c4] sm:$0xf]  ;;  %v3775_v59 = vor.u32 %v4492_v47, %v3772_v50 }
  0x2d   :  { %v3674_v7 = vld [vmem:[#allocation5 + $0x20] sm:$0xf]  ;;  %v4470_v8 = vld [vmem:[#allocation5 + $0x2c] sm:$0xf0]  ;;  %v4075_v10 = vor.u32 %v4570_v3, %v4074_v2  ;;  %1354 = vmatpush.bf16.msra.mxu1 %v3819_v5  ;;  %v3884_v52 = vld [vmem:[#allocation5 + $0x1d0] sm:$0xf0] }
  0x2e   :  { %v3802_v9 = vld [vmem:[#allocation5 + $0x120] sm:$0xf]  ;;  %v4502_v11 = vld [vmem:[#allocation5 + $0x12c] sm:$0xf0]  ;;  %v3675_v17 = vor.u32 %v4470_v8, %v3674_v7  ;;  %1403 = vmatpush.bf16.msra.mxu2 %v3947_v6  ;;  %6380 = vst [vmem:[#allocation15_spill] sm:$0xff] %v4860_v53  ;;  %v3887_v60 = vor.u32 %v4520_v51, %v3884_v52 }
  0x2f   :  { %v3930_v12 = vld [vmem:[#allocation5 + $0x220] sm:$0xf]  ;;  %v4534_v13 = vld [vmem:[#allocation5 + $0x22c] sm:$0xf0]  ;;  %v3803_v21 = vor.u32 %v4502_v11, %v3802_v9  ;;  %1452 = vmatpush.bf16.msra.mxu3 %v4075_v10  ;;  %6381 = vst [vmem:[#allocation16_spill] sm:$0xff] %v4862_v54 }
  0x30   :  { %v4058_v14 = vld [vmem:[#allocation5 + $0x320] sm:$0xf]  ;;  %v4566_v15 = vld [vmem:[#allocation5 + $0x32c] sm:$0xf0]  ;;  %v3931_v22 = vor.u32 %v4534_v13, %v3930_v12  ;;  %1306 = vmatpush.bf16.msra.mxu0 %v3675_v17  ;;  %v4552_v55 = vld [vmem:[#allocation5 + $0x2c4] sm:$0xf] }
  0x31   :  { %v3658_v16 = vld [vmem:[#allocation5] sm:$0xf]  ;;  %v4466_v18 = vld [vmem:[#allocation5 + $0xc] sm:$0xf0]  ;;  %v4059_v26 = vor.u32 %v4566_v15, %v4058_v14  ;;  %1355 = vmatpush.bf16.msra.mxu1 %v3803_v21  ;;  %v4012_v56 = vld [vmem:[#allocation5 + $0x2d0] sm:$0xf0] }
  0x32   :  { %v3786_v19 = vld [vmem:[#allocation5 + $0x100] sm:$0xf]  ;;  %v4498_v20 = vld [vmem:[#allocation5 + $0x10c] sm:$0xf0]  ;;  %v3659_v34 = vor.u32 %v4466_v18, %v3658_v16  ;;  %1404 = vmatpush.bf16.msra.mxu2 %v3931_v22  ;;  %v4015_v63 = vor.u32 %v4552_v55, %v4012_v56  ;;  %v4488_v0 = vld [vmem:[#allocation5 + $0xc4] sm:$0xf] }
  0x33   :  { %v3914_v23 = vld [vmem:[#allocation5 + $0x200] sm:$0xf]  ;;  %v4530_v24 = vld [vmem:[#allocation5 + $0x20c] sm:$0xf0]  ;;  %v3787_v38 = vor.u32 %v4498_v20, %v3786_v19  ;;  %1453 = vmatpush.bf16.msra.mxu3 %v4059_v26  ;;  %v3756_v1 = vld [vmem:[#allocation5 + $0xd0] sm:$0xf0] }
  0x34   :  { %v4042_v25 = vld [vmem:[#allocation5 + $0x300] sm:$0xf]  ;;  %v4562_v27 = vld [vmem:[#allocation5 + $0x30c] sm:$0xf0]  ;;  %v3915_v39 = vor.u32 %v4530_v24, %v3914_v23  ;;  %1307 = vmatpush.bf16.msra.mxu0 %v3659_v34  ;;  %v4516_v3 = vld [vmem:[#allocation5 + $0x1a4] sm:$0xf]  ;;  %v3759_v6 = vor.u32 %v4488_v0, %v3756_v1 }
  0x35   :  { %v3498_v28 = vld [vmem:[#allocation2] sm:$0xf]  ;;  %v4043_v43 = vor.u32 %v4562_v27, %v4042_v25  ;;  %v4622_v46 = vld [vmem:[#allocation5 + $0x4ec] sm:$0xf0]  ;;  %1356 = vmatpush.bf16.msra.mxu1 %v3787_v38  ;;  %v3868_v4 = vld [vmem:[#allocation5 + $0x1b0] sm:$0xf0] }
  0x36   :  { %v3508_v42 = vld [vmem:[#allocation2 + $0x1c] sm:$0xf0]  ;;  %v4858_v48 = vor.u32 %v4426_v29, %v3498_v28  ;;  %1405 = vmatpush.bf16.msra.mxu2 %v3915_v39  ;;  %v4618_v62 = vld [vmem:[#allocation5 + $0x4cc] sm:$0xf0]  ;;  %v3871_v7 = vor.u32 %v4516_v3, %v3868_v4  ;;  %v4548_v9 = vld [vmem:[#allocation5 + $0x2a4] sm:$0xf] }
  0x37   :  { %v4282_v45 = vld [vmem:[#allocation5 + $0x4e0] sm:$0xf]  ;;  %v4864_v57 = vor.u32 %v4425_v41, %v3508_v42  ;;  %1454 = vmatpush.bf16.msra.mxu3 %v4043_v43  ;;  %v4614_v8 = vld [vmem:[#allocation5 + $0x4ac] sm:$0xf0]  ;;  %v3996_v10 = vld [vmem:[#allocation5 + $0x2b0] sm:$0xf0] }
  0x38   :  { %v4283_v58 = vor.u32 %v4622_v46, %v4282_v45  ;;  %v4266_v61 = vld [vmem:[#allocation5 + $0x4c0] sm:$0xf]  ;;  %1308 = vmatmul.bf16.vlgmr.msra.gmra.mxu0 %v4858_v48  ;;  %1357 = vmatmul.bf16.vlgmr.msra.gmra.mxu1 %v4860_v53  ;;  %v3999_v11 = vor.u32 %v4548_v9, %v3996_v10  ;;  %v4484_v12 = vld [vmem:[#allocation5 + $0xa4] sm:$0xf]  ;;  %v3740_v13 = vld [vmem:[#allocation5 + $0xb0] sm:$0xf0] }
  0x39   :  { %1406 = vmatmul.bf16.vlgmr.msra.gmra.mxu2 %v4862_v54  ;;  %v4267_v2 = vor.u32 %v4618_v62, %v4266_v61  ;;  %v4250_v5 = vld [vmem:[#allocation5 + $0x4a0] sm:$0xf]  ;;  %1545 = vmatpush.bf16.msrb.mxu1 %v3775_v59  ;;  %v3743_v15 = vor.u32 %v4484_v12, %v3740_v13  ;;  %v3518_v16 = vld [vmem:[#allocation2 + $0x28] sm:$0xf]  ;;  %v4431_v17 = vld [vmem:[#allocation2 + $0x38] sm:$0xf0] }
  0x3a   :  { %1594 = vmatpush.bf16.msrb.mxu2 %v3903_v44  ;;  %1455 = vmatmul.bf16.vlgmr.msra.gmra.mxu3 %v4864_v57  ;;  %v4251_v14 = vor.u32 %v4614_v8, %v4250_v5  ;;  %v4429_v18 = vld [vmem:[#allocation2 + $0x2c] sm:$0xf]  ;;  %v3520_v19 = vld [vmem:[#allocation2 + $0x3c] sm:$0xf0]  ;;  %v3526_v20 = vld [vmem:[#allocation2 + $0x30] sm:$0xf]  ;;  %v4870_v24 = vor.u32 %v4431_v17, %v3518_v16 }
  0x3b   :  { %1643 = vmatpush.bf16.msrb.mxu3 %v4031_v49  ;;  %1496 = vmatpush.bf16.msrb.mxu0 %v4283_v58  ;;  %v4432_v21 = vld [vmem:[#allocation2 + $0x40] sm:$0xf0]  ;;  %v4430_v22 = vld [vmem:[#allocation2 + $0x34] sm:$0xf]  ;;  %v3528_v23 = vld [vmem:[#allocation2 + $0x44] sm:$0xf0]  ;;  %v4872_v25 = vor.u32 %v4429_v18, %v3520_v19 }
  0x3c   :  { %v4874_v26 = vor.u32 %v4432_v21, %v3526_v20  ;;  %v4876_v27 = vor.u32 %v4430_v22, %v3528_v23  ;;  %v4512_v28 = vld [vmem:[#allocation5 + $0x184] sm:$0xf]  ;;  %v3852_v29 = vld [vmem:[#allocation5 + $0x190] sm:$0xf0]  ;;  %v4234_v30 = vld [vmem:[#allocation5 + $0x480] sm:$0xf] }
  0x3d   :  { %1546 = vmatpush.bf16.msrb.mxu1 %v3759_v6  ;;  %6382 = vst [vmem:[#allocation17_spill] sm:$0xff] %v4872_v25  ;;  %v3855_v31 = vor.u32 %v4512_v28, %v3852_v29  ;;  %v4610_v32 = vld [vmem:[#allocation5 + $0x48c] sm:$0xf0]  ;;  %v4544_v33 = vld [vmem:[#allocation5 + $0x284] sm:$0xf] }
  0x3e   :  { %1595 = vmatpush.bf16.msrb.mxu2 %v3887_v60  ;;  %6383 = vst [vmem:[#allocation18_spill] sm:$0xff] %v4874_v26  ;;  %v3980_v34 = vld [vmem:[#allocation5 + $0x290] sm:$0xf0]  ;;  %v4235_v35 = vor.u32 %v4610_v32, %v4234_v30  ;;  %v4480_v37 = vld [vmem:[#allocation5 + $0x84] sm:$0xf] }
  0x3f   :  { %1644 = vmatpush.bf16.msrb.mxu3 %v4015_v63  ;;  %1497 = vmatpush.bf16.msrb.mxu0 %v4267_v2  ;;  %v3983_v36 = vor.u32 %v4544_v33, %v3980_v34  ;;  %v3724_v38 = vld [vmem:[#allocation5 + $0x90] sm:$0xf0]  ;;  %v3538_v40 = vld [vmem:[#allocation2 + $0x50] sm:$0xf]  ;;  %v4436_v41 = vld [vmem:[#allocation2 + $0x60] sm:$0xf0] }
  0x40   :  { %v3727_v39 = vor.u32 %v4480_v37, %v3724_v38  ;;  %v4434_v42 = vld [vmem:[#allocation2 + $0x54] sm:$0xf]  ;;  %v3540_v43 = vld [vmem:[#allocation2 + $0x64] sm:$0xf0]  ;;  %v3546_v44 = vld [vmem:[#allocation2 + $0x58] sm:$0xf]  ;;  %v4882_v49 = vor.u32 %v4436_v41, %v3538_v40 }
  0x41   :  { %1547 = vmatpush.bf16.msrb.mxu1 %v3743_v15  ;;  %v4437_v45 = vld [vmem:[#allocation2 + $0x68] sm:$0xf0]  ;;  %v4435_v46 = vld [vmem:[#allocation2 + $0x5c] sm:$0xf]  ;;  %v3548_v47 = vld [vmem:[#allocation2 + $0x6c] sm:$0xf0]  ;;  %v4884_v50 = vor.u32 %v4434_v42, %v3540_v43 }
  0x42   :  { %1596 = vmatpush.bf16.msrb.mxu2 %v3871_v7  ;;  %6384 = vst [vmem:[#allocation19_spill] sm:$0xff] %v4882_v49  ;;  %v4886_v51 = vor.u32 %v4437_v45, %v3546_v44  ;;  %v4888_v52 = vor.u32 %v4435_v46, %v3548_v47  ;;  %v4508_v55 = vld [vmem:[#allocation5 + $0x164] sm:$0xf]  ;;  %v3836_v56 = vld [vmem:[#allocation5 + $0x170] sm:$0xf0] }
  0x43   :  { %1645 = vmatpush.bf16.msrb.mxu3 %v3999_v11  ;;  %1498 = vmatpush.bf16.msrb.mxu0 %v4251_v14  ;;  %6385 = vst [vmem:[#allocation20_spill] sm:$0xff] %v4884_v50  ;;  %v4218_v58 = vld [vmem:[#allocation5 + $0x460] sm:$0xf]  ;;  %v3839_v59 = vor.u32 %v4508_v55, %v3836_v56  ;;  %v4606_v60 = vld [vmem:[#allocation5 + $0x46c] sm:$0xf0] }
  0x44   :  { %6386 = vst [vmem:[#allocation21_spill] sm:$0xff] %v4886_v51  ;;  %v4540_v61 = vld [vmem:[#allocation5 + $0x264] sm:$0xf]  ;;  %v3964_v62 = vld [vmem:[#allocation5 + $0x270] sm:$0xf0]  ;;  %v4219_v63 = vor.u32 %v4606_v60, %v4218_v58 }
  0x45   :  { %1548 = vmatpush.bf16.msrb.mxu1 %v3727_v39  ;;  %v3967_v0 = vor.u32 %v4540_v61, %v3964_v62  ;;  %v4476_v1 = vld [vmem:[#allocation5 + $0x64] sm:$0xf]  ;;  %v3708_v2 = vld [vmem:[#allocation5 + $0x70] sm:$0xf0]  ;;  %v3558_v4 = vld [vmem:[#allocation2 + $0x78] sm:$0xf] }
  0x46   :  { %1597 = vmatpush.bf16.msrb.mxu2 %v3855_v31  ;;  %v3711_v3 = vor.u32 %v4476_v1, %v3708_v2  ;;  %v4441_v5 = vld [vmem:[#allocation2 + $0x88] sm:$0xf0]  ;;  %v4439_v6 = vld [vmem:[#allocation2 + $0x7c] sm:$0xf]  ;;  %v3560_v7 = vld [vmem:[#allocation2 + $0x8c] sm:$0xf0] }
  0x47   :  { %1499 = vmatpush.bf16.msrb.mxu0 %v4235_v35  ;;  %1646 = vmatpush.bf16.msrb.mxu3 %v3983_v36  ;;  %v3566_v8 = vld [vmem:[#allocation2 + $0x80] sm:$0xf]  ;;  %v4442_v9 = vld [vmem:[#allocation2 + $0x90] sm:$0xf0]  ;;  %v4440_v10 = vld [vmem:[#allocation2 + $0x84] sm:$0xf]  ;;  %v4894_v12 = vor.u32 %v4441_v5, %v3558_v4  ;;  %v4896_v13 = vor.u32 %v4439_v6, %v3560_v7 }
  0x48   :  { %1313 = vmatmul.bf16.gmra.mxu0 %v4870_v24  ;;  %1362 = vmatmul.bf16.gmra.mxu1 %v4872_v25  ;;  %v3568_v11 = vld [vmem:[#allocation2 + $0x94] sm:$0xf0]  ;;  %v4898_v14 = vor.u32 %v4442_v9, %v3566_v8  ;;  %v4504_v16 = vld [vmem:[#allocation5 + $0x144] sm:$0xf]  ;;  %v3820_v17 = vld [vmem:[#allocation5 + $0x150] sm:$0xf0] }
  0x49   :  { %1411 = vmatmul.bf16.gmra.mxu2 %v4874_v26  ;;  %1549 = vmatpush.bf16.msrb.mxu1 %v3711_v3  ;;  %6387 = vst [vmem:[#allocation22_spill] sm:$0xff] %v4894_v12  ;;  %v4900_v15 = vor.u32 %v4440_v10, %v3568_v11  ;;  %v4202_v18 = vld [vmem:[#allocation5 + $0x440] sm:$0xf]  ;;  %v3823_v19 = vor.u32 %v4504_v16, %v3820_v17  ;;  %v4602_v20 = vld [vmem:[#allocation5 + $0x44c] sm:$0xf0] }
  0x4a   :  { %1460 = vmatmul.bf16.gmra.mxu3 %v4876_v27  ;;  %1598 = vmatpush.bf16.msrb.mxu2 %v3839_v59  ;;  %6388 = vst [vmem:[#allocation23_spill] sm:$0xff] %v4896_v13  ;;  %v4536_v21 = vld [vmem:[#allocation5 + $0x244] sm:$0xf]  ;;  %v3948_v22 = vld [vmem:[#allocation5 + $0x250] sm:$0xf0]  ;;  %v4203_v23 = vor.u32 %v4602_v20, %v4202_v18 }
  0x4b   :  { %1500 = vmatpush.bf16.msrb.mxu0 %v4219_v63  ;;  %1647 = vmatpush.bf16.msrb.mxu3 %v3967_v0  ;;  %6389 = vst [vmem:[#allocation24_spill] sm:$0xff] %v4898_v14  ;;  %v3951_v28 = vor.u32 %v4536_v21, %v3948_v22  ;;  %v4472_v29 = vld [vmem:[#allocation5 + $0x44] sm:$0xf]  ;;  %v3692_v30 = vld [vmem:[#allocation5 + $0x50] sm:$0xf0] }
  0x4c   :  { %6390 = vst [vmem:[#allocation25_spill] sm:$0xff] %v4900_v15  ;;  %v3695_v31 = vor.u32 %v4472_v29, %v3692_v30  ;;  %v3578_v32 = vld [vmem:[#allocation2 + $0xa0] sm:$0xf]  ;;  %v4446_v33 = vld [vmem:[#allocation2 + $0xb0] sm:$0xf0] }
  0x4d   :  { %v4444_v34 = vld [vmem:[#allocation2 + $0xa4] sm:$0xf]  ;;  %v3580_v35 = vld [vmem:[#allocation2 + $0xb4] sm:$0xf0]  ;;  %v3586_v36 = vld [vmem:[#allocation2 + $0xa8] sm:$0xf]  ;;  %v4906_v40 = vor.u32 %v4446_v33, %v3578_v32 }
  0x4e   :  { %1599 = vmatpush.bf16.msrb.mxu2 %v3823_v19  ;;  %1550 = vmatpush.bf16.msrb.mxu1 %v3695_v31  ;;  %v4447_v37 = vld [vmem:[#allocation2 + $0xb8] sm:$0xf0]  ;;  %v4445_v38 = vld [vmem:[#allocation2 + $0xac] sm:$0xf]  ;;  %v3588_v39 = vld [vmem:[#allocation2 + $0xbc] sm:$0xf0]  ;;  %v4908_v41 = vor.u32 %v4444_v34, %v3580_v35 }
  0x4f   :  { %1501 = vmatpush.bf16.msrb.mxu0 %v4203_v23  ;;  %1648 = vmatpush.bf16.msrb.mxu3 %v3951_v28  ;;  %6391 = vst [vmem:[#allocation26_spill] sm:$0xff] %v4906_v40  ;;  %v4910_v42 = vor.u32 %v4447_v37, %v3586_v36  ;;  %v4912_v43 = vor.u32 %v4445_v38, %v3588_v39  ;;  %v4500_v44 = vld [vmem:[#allocation5 + $0x124] sm:$0xf]  ;;  %v3804_v45 = vld [vmem:[#allocation5 + $0x130] sm:$0xf0] }
  0x50   :  { %6392 = vst [vmem:[#allocation27_spill] sm:$0xff] %v4908_v41  ;;  %v4186_v46 = vld [vmem:[#allocation5 + $0x420] sm:$0xf]  ;;  %v3807_v47 = vor.u32 %v4500_v44, %v3804_v45  ;;  %v4598_v55 = vld [vmem:[#allocation5 + $0x42c] sm:$0xf0] }
  0x51   :  { %6393 = vst [vmem:[#allocation28_spill] sm:$0xff] %v4910_v42  ;;  %v4532_v56 = vld [vmem:[#allocation5 + $0x224] sm:$0xf]  ;;  %v3932_v58 = vld [vmem:[#allocation5 + $0x230] sm:$0xf0]  ;;  %v4187_v59 = vor.u32 %v4598_v55, %v4186_v46 }
  0x52   :  { %6394 = vst [vmem:[#allocation29_spill] sm:$0xff] %v4912_v43  ;;  %v3935_v60 = vor.u32 %v4532_v56, %v3932_v58  ;;  %v4468_v61 = vld [vmem:[#allocation5 + $0x24] sm:$0xf]  ;;  %v3676_v62 = vld [vmem:[#allocation5 + $0x30] sm:$0xf0]  ;;  %1600 = vmatpush.bf16.msrb.mxu2 %v3807_v47 }
  0x53   :  { %v3679_v63 = vor.u32 %v4468_v61, %v3676_v62  ;;  %1502 = vmatpush.bf16.msrb.mxu0 %v4187_v59  ;;  %v3598_v0 = vld [vmem:[#allocation2 + $0xc8] sm:$0xf]  ;;  %v4451_v1 = vld [vmem:[#allocation2 + $0xd8] sm:$0xf0]  ;;  %v4449_v2 = vld [vmem:[#allocation2 + $0xcc] sm:$0xf] }
  0x54   :  { %1649 = vmatpush.bf16.msrb.mxu3 %v3935_v60  ;;  %v3600_v3 = vld [vmem:[#allocation2 + $0xdc] sm:$0xf0]  ;;  %v3606_v4 = vld [vmem:[#allocation2 + $0xd0] sm:$0xf]  ;;  %v4452_v5 = vld [vmem:[#allocation2 + $0xe0] sm:$0xf0]  ;;  %v4918_v8 = vor.u32 %v4451_v1, %v3598_v0 }
  0x55   :  { %1551 = vmatpush.bf16.msrb.mxu1 %v3679_v63  ;;  %v4450_v6 = vld [vmem:[#allocation2 + $0xd4] sm:$0xf]  ;;  %v3608_v7 = vld [vmem:[#allocation2 + $0xe4] sm:$0xf0]  ;;  %v4920_v9 = vor.u32 %v4449_v2, %v3600_v3  ;;  %v4922_v10 = vor.u32 %v4452_v5, %v3606_v4  ;;  %v4496_v16 = vld [vmem:[#allocation5 + $0x104] sm:$0xf] }
  0x56   :  { %6395 = vst [vmem:[#allocation30_spill] sm:$0xff] %v4918_v8  ;;  %v4924_v11 = vor.u32 %v4450_v6, %v3608_v7  ;;  %v3788_v17 = vld [vmem:[#allocation5 + $0x110] sm:$0xf0]  ;;  %v4170_v18 = vld [vmem:[#allocation5 + $0x400] sm:$0xf] }
  0x57   :  { %6396 = vst [vmem:[#allocation31_spill] sm:$0xff] %v4920_v9  ;;  %v3791_v19 = vor.u32 %v4496_v16, %v3788_v17  ;;  %v4594_v20 = vld [vmem:[#allocation5 + $0x40c] sm:$0xf0]  ;;  %v4528_v21 = vld [vmem:[#allocation5 + $0x204] sm:$0xf] }
  0x58   :  { %1318 = vmatmul.bf16.gmra.mxu0 %v4882_v49  ;;  %1367 = vmatmul.bf16.gmra.mxu1 %v4884_v50  ;;  %6397 = vst [vmem:[#allocation32_spill] sm:$0xff] %v4922_v10  ;;  %v3916_v22 = vld [vmem:[#allocation5 + $0x210] sm:$0xf0]  ;;  %v4171_v23 = vor.u32 %v4594_v20, %v4170_v18  ;;  %v4464_v29 = vld [vmem:[#allocation5 + $0x4] sm:$0xf] }
  0x59   :  { %1416 = vmatmul.bf16.gmra.mxu2 %v4886_v51  ;;  %v3919_v28 = vor.u32 %v4528_v21, %v3916_v22  ;;  %v3660_v30 = vld [vmem:[#allocation5 + $0x10] sm:$0xf0]  ;;  %v3618_v32 = vld [vmem:[#allocation2 + $0xf0] sm:$0xf]  ;;  %v4456_v33 = vld [vmem:[#allocation2 + $0x100] sm:$0xf0] }
  0x5a   :  { %1465 = vmatmul.bf16.gmra.mxu3 %v4888_v52  ;;  %1601 = vmatpush.bf16.msrb.mxu2 %v3791_v19  ;;  %v3663_v31 = vor.u32 %v4464_v29, %v3660_v30  ;;  %v4454_v34 = vld [vmem:[#allocation2 + $0xf4] sm:$0xf]  ;;  %v3620_v35 = vld [vmem:[#allocation2 + $0x104] sm:$0xf0]  ;;  %v3626_v36 = vld [vmem:[#allocation2 + $0xf8] sm:$0xf]  ;;  %v4930_v44 = vor.u32 %v4456_v33, %v3618_v32 }
  0x5b   :  { %1503 = vmatpush.bf16.msrb.mxu0 %v4171_v23  ;;  %1650 = vmatpush.bf16.msrb.mxu3 %v3919_v28  ;;  %v4457_v37 = vld [vmem:[#allocation2 + $0x108] sm:$0xf0]  ;;  %v4455_v38 = vld [vmem:[#allocation2 + $0xfc] sm:$0xf]  ;;  %v3628_v39 = vld [vmem:[#allocation2 + $0x10c] sm:$0xf0]  ;;  %v4932_v45 = vor.u32 %v4454_v34, %v3620_v35 }
  0x5c   :  { %1552 = vmatpush.bf16.msrb.mxu1 %v3663_v31  ;;  %6398 = vst [vmem:[#allocation33_spill] sm:$0xff] %v4930_v44  ;;  %v4934_v46 = vor.u32 %v4457_v37, %v3626_v36  ;;  %v4936_v47 = vor.u32 %v4455_v38, %v3628_v39  ;;  %v3778_v55 = vld [vmem:[#allocation5 + $0xe8] sm:$0xf]  ;;  %v4495_v56 = vld [vmem:[#allocation5 + $0xf4] sm:$0xf0] }
  0x5d   :  { %6399 = vst [vmem:[#allocation34_spill] sm:$0xff] %v4932_v45  ;;  %v4588_v58 = vld [vmem:[#allocation5 + $0x3e4] sm:$0xf]  ;;  %v3779_v59 = vor.u32 %v4495_v56, %v3778_v55  ;;  %v4156_v60 = vld [vmem:[#allocation5 + $0x3f0] sm:$0xf0] }
  0x5e   :  { %6400 = vst [vmem:[#allocation35_spill] sm:$0xff] %v4934_v46  ;;  %v3906_v61 = vld [vmem:[#allocation5 + $0x1e8] sm:$0xf]  ;;  %v4527_v62 = vld [vmem:[#allocation5 + $0x1f4] sm:$0xf0]  ;;  %v4159_v63 = vor.u32 %v4588_v58, %v4156_v60 }
  0x5f   :  { %v3907_v0 = vor.u32 %v4527_v62, %v3906_v61  ;;  %1790 = vmatpush.bf16.msra.mxu2 %v3779_v59  ;;  %v4620_v1 = vld [vmem:[#allocation5 + $0x4e4] sm:$0xf]  ;;  %v4284_v2 = vld [vmem:[#allocation5 + $0x4f0] sm:$0xf0]  ;;  %v3638_v4 = vld [vmem:[#allocation2 + $0x118] sm:$0xf] }
  0x60   :  { %1692 = vmatpush.bf16.msra.mxu0 %v4159_v63  ;;  %v4287_v3 = vor.u32 %v4620_v1, %v4284_v2  ;;  %v4461_v5 = vld [vmem:[#allocation2 + $0x128] sm:$0xf0]  ;;  %v4459_v6 = vld [vmem:[#allocation2 + $0x11c] sm:$0xf]  ;;  %v3640_v7 = vld [vmem:[#allocation2 + $0x12c] sm:$0xf0] }
  0x61   :  { %1839 = vmatpush.bf16.msra.mxu3 %v3907_v0  ;;  %v3646_v16 = vld [vmem:[#allocation2 + $0x120] sm:$0xf]  ;;  %v4462_v17 = vld [vmem:[#allocation2 + $0x130] sm:$0xf0]  ;;  %v4460_v18 = vld [vmem:[#allocation2 + $0x124] sm:$0xf]  ;;  %v4942_v20 = vor.u32 %v4461_v5, %v3638_v4  ;;  %v4944_v21 = vor.u32 %v4459_v6, %v3640_v7 }
  0x62   :  { %1741 = vmatpush.bf16.msra.mxu1 %v4287_v3  ;;  %v3648_v19 = vld [vmem:[#allocation2 + $0x134] sm:$0xf0]  ;;  %v4946_v22 = vor.u32 %v4462_v17, %v3646_v16  ;;  %v3762_v28 = vld [vmem:[#allocation5 + $0xc8] sm:$0xf]  ;;  %v4584_v30 = vld [vmem:[#allocation5 + $0x3c4] sm:$0xf] }
  0x63   :  { %6401 = vst [vmem:[#allocation36_spill] sm:$0xff] %v4942_v20  ;;  %v4948_v23 = vor.u32 %v4460_v18, %v3648_v19  ;;  %v4491_v29 = vld [vmem:[#allocation5 + $0xd4] sm:$0xf0]  ;;  %v4140_v32 = vld [vmem:[#allocation5 + $0x3d0] sm:$0xf0] }
  0x64   :  { %6402 = vst [vmem:[#allocation37_spill] sm:$0xff] %v4944_v21  ;;  %v3763_v31 = vor.u32 %v4491_v29, %v3762_v28  ;;  %v3890_v33 = vld [vmem:[#allocation5 + $0x1c8] sm:$0xf]  ;;  %v4523_v34 = vld [vmem:[#allocation5 + $0x1d4] sm:$0xf0]  ;;  %v4143_v35 = vor.u32 %v4584_v30, %v4140_v32 }
  0x65   :  { %6403 = vst [vmem:[#allocation38_spill] sm:$0xff] %v4946_v22  ;;  %v3891_v36 = vor.u32 %v4523_v34, %v3890_v33  ;;  %v4616_v37 = vld [vmem:[#allocation5 + $0x4c4] sm:$0xf]  ;;  %v4268_v38 = vld [vmem:[#allocation5 + $0x4d0] sm:$0xf0] }
  0x66   :  { %6404 = vst [vmem:[#allocation39_spill] sm:$0xff] %v4948_v23  ;;  %1791 = vmatpush.bf16.msra.mxu2 %v3763_v31  ;;  %1693 = vmatpush.bf16.msra.mxu0 %v4143_v35  ;;  %v4271_v39 = vor.u32 %v4616_v37, %v4268_v38  ;;  %v3514_v55 = vld [vmem:[#allocation2 + $0x10] sm:$0xf]  ;;  %v4428_v56 = vld [vmem:[#allocation2 + $0x20] sm:$0xf0] }
  0x67   :  { %1840 = vmatpush.bf16.msra.mxu3 %v3891_v36  ;;  %v4954_v58 = vor.u32 %v4428_v56, %v3514_v55  ;;  %v3746_v62 = vld [vmem:[#allocation5 + $0xa8] sm:$0xf]  ;;  %v4487_v63 = vld [vmem:[#allocation5 + $0xb4] sm:$0xf0]  ;;  %v4580_v0 = vld [vmem:[#allocation5 + $0x3a4] sm:$0xf] }
  0x68   :  { %1323 = vmatmul.bf16.gmra.mxu0 %v4894_v12  ;;  %1372 = vmatmul.bf16.gmra.mxu1 %v4896_v13  ;;  %v3747_v1 = vor.u32 %v4487_v63, %v3746_v62  ;;  %v4124_v2 = vld [vmem:[#allocation5 + $0x3b0] sm:$0xf0]  ;;  %v3874_v3 = vld [vmem:[#allocation5 + $0x1a8] sm:$0xf]  ;;  %v4519_v4 = vld [vmem:[#allocation5 + $0x1b4] sm:$0xf0] }
  0x69   :  { %1421 = vmatmul.bf16.gmra.mxu2 %v4898_v14  ;;  %1742 = vmatpush.bf16.msra.mxu1 %v4271_v39  ;;  %v4127_v6 = vor.u32 %v4580_v0, %v4124_v2  ;;  %v3875_v7 = vor.u32 %v4519_v4, %v3874_v3  ;;  %v4612_v30 = vld [vmem:[#allocation5 + $0x4a4] sm:$0xf]  ;;  %v4252_v31 = vld [vmem:[#allocation5 + $0x4b0] sm:$0xf0]  ;;  %v3534_v33 = vld [vmem:[#allocation2 + $0x38] sm:$0xf] }
  0x6a   :  { %1470 = vmatmul.bf16.gmra.mxu3 %v4900_v15  ;;  %1792 = vmatpush.bf16.msra.mxu2 %v3747_v1  ;;  %v4255_v32 = vor.u32 %v4612_v30, %v4252_v31  ;;  %v4433_v34 = vld [vmem:[#allocation2 + $0x48] sm:$0xf0]  ;;  %v4576_v62 = vld [vmem:[#allocation5 + $0x384] sm:$0xf]  ;;  %v4108_v0 = vld [vmem:[#allocation5 + $0x390] sm:$0xf0] }
  0x6b   :  { %1694 = vmatpush.bf16.msra.mxu0 %v4127_v6  ;;  %1841 = vmatpush.bf16.msra.mxu3 %v3875_v7  ;;  %v4962_v36 = vor.u32 %v4433_v34, %v3534_v33  ;;  %v3858_v1 = vld [vmem:[#allocation5 + $0x188] sm:$0xf]  ;;  %v4515_v2 = vld [vmem:[#allocation5 + $0x194] sm:$0xf0]  ;;  %v4111_v4 = vor.u32 %v4576_v62, %v4108_v0  ;;  %v4236_v30 = vld [vmem:[#allocation5 + $0x490] sm:$0xf0] }
  0x6c   :  { %v4438_v33 = vld [vmem:[#allocation2 + $0x70] sm:$0xf0]  ;;  %v4479_v62 = vld [vmem:[#allocation5 + $0x74] sm:$0xf0] }
  0x6d   :  { %1743 = vmatpush.bf16.msra.mxu1 %v4255_v32  ;;  %v3554_v32 = vld [vmem:[#allocation2 + $0x60] sm:$0xf] }
  0x6f   :  { %1695 = vmatpush.bf16.msra.mxu0 %v4111_v4 }
  0x78   :  { %1328 = vmatmul.bf16.gmra.mxu0 %v4906_v40  ;;  %1377 = vmatmul.bf16.gmra.mxu1 %v4908_v41 }
  0x79   :  { %1426 = vmatmul.bf16.gmra.mxu2 %v4910_v42 }
  0x7a   :  { %1475 = vmatmul.bf16.gmra.mxu3 %v4912_v43 }
  0x88   :  { %1333 = vmatmul.bf16.gmra.mxu0 %v4918_v8  ;;  %1382 = vmatmul.bf16.gmra.mxu1 %v4920_v9 }
  0x89   :  { %1431 = vmatmul.bf16.gmra.mxu2 %v4922_v10 }
  0x8a   :  { %1480 = vmatmul.bf16.gmra.mxu3 %v4924_v11 }
  0x98   :  { %1338 = vmatmul.bf16.gmra.mxu0 %v4930_v44  ;;  %1387 = vmatmul.bf16.gmra.mxu1 %v4932_v45 }
  0x99   :  { %1436 = vmatmul.bf16.gmra.mxu2 %v4934_v46 }
  0x9a   :  { %1485 = vmatmul.bf16.gmra.mxu3 %v4936_v47 }
  0xa8   :  { %1343 = vmatmul.bf16.gmra.mxu0 %v4942_v20  ;;  %1392 = vmatmul.bf16.gmra.mxu1 %v4944_v21 }
  0xa9   :  { %1441 = vmatmul.bf16.gmra.mxu2 %v4946_v22 }
  0xaa   :  { %1490 = vmatmul.bf16.gmra.mxu3 %v4948_v23 }
  0xb5   :  { %v1309_v59 = vpop.f32.mrf.mxu0  ;;  %v1358_v60 = vpop.f32.mrf.mxu1 }
  0xb6   :  { %v1359_v61 = vadd.f32 %v1358_v60, %v1309_v59  ;;  %v3730_v60 = vld [vmem:[#allocation5 + $0x88] sm:$0xf] }
  0xb8   :  { %1504 = vmatmul.bf16.vlgmr.msrb.gmra.mxu0 %v4954_v58  ;;  %1553 = vmatmul.bf16.vlgmr.msrb.gmra.mxu1 %v4858_v48 }
  0xb9   :  { %1602 = vmatmul.bf16.vlgmr.msrb.gmra.mxu2 %v4860_v53 }
  0xba   :  { %1651 = vmatmul.bf16.vlgmr.msrb.gmra.mxu3 %v4862_v54 }
  0xbc   :  { %v1407_v5 = vpop.f32.mrf.mxu2 }
  0xbd   :  { %v1408_v16 = vadd.f32 %v1407_v5, %v1359_v61  ;;  %v1456_v17 = vpop.f32.mrf.mxu3  ;;  %v1311_v18 = vpop.f32.mrf.mxu0  ;;  %v4483_v61 = vld [vmem:[#allocation5 + $0x94] sm:$0xf0]  ;;  %v3859_v5 = vor.u32 %v4515_v2, %v3858_v1  ;;  %v4092_v1 = vld [vmem:[#allocation5 + $0x370] sm:$0xf0]  ;;  %v3842_v2 = vld [vmem:[#allocation5 + $0x168] sm:$0xf] }
  0xbe   :  { %v1360_v19 = vpop.f32.mrf.mxu1  ;;  %v3731_v63 = vor.u32 %v4483_v61, %v3730_v60  ;;  %v3714_v61 = vld [vmem:[#allocation5 + $0x68] sm:$0xf] }
  0xbf   :  { %v4960_v28 = vadd.f32 %v1456_v17, %v1408_v16  ;;  %v1361_v29 = vadd.f32 %v1360_v19, %v1311_v18  ;;  %1842 = vmatpush.bf16.msra.mxu3 %v3859_v5  ;;  %v3715_v0 = vor.u32 %v4479_v62, %v3714_v61 }
  0xc0   :  { %1793 = vmatpush.bf16.msra.mxu2 %v3731_v63  ;;  %v4572_v63 = vld [vmem:[#allocation5 + $0x364] sm:$0xf] }
  0xc1   :  { %v4095_v5 = vor.u32 %v4572_v63, %v4092_v1  ;;  %v3698_v1 = vld [vmem:[#allocation5 + $0x48] sm:$0xf] }
  0xc3   :  { %1696 = vmatpush.bf16.msra.mxu0 %v4095_v5  ;;  %v4076_v5 = vld [vmem:[#allocation5 + $0x350] sm:$0xf0] }
  0xc4   :  { %v1409_v35 = vpop.f32.mrf.mxu2  ;;  %1794 = vmatpush.bf16.msra.mxu2 %v3715_v0 }
  0xc5   :  { %v1410_v37 = vadd.f32 %v1409_v35, %v1361_v29  ;;  %v1458_v38 = vpop.f32.mrf.mxu3  ;;  %v1314_v39 = vpop.f32.mrf.mxu0  ;;  %v4608_v29 = vld [vmem:[#allocation5 + $0x484] sm:$0xf]  ;;  %v4972_v35 = vor.u32 %v4438_v33, %v3554_v32  ;;  %v4220_v32 = vld [vmem:[#allocation5 + $0x470] sm:$0xf0] }
  0xc6   :  { %v1363_v55 = vpop.f32.mrf.mxu1  ;;  %v4239_v31 = vor.u32 %v4608_v29, %v4236_v30 }
  0xc7   :  { %v4964_v56 = vadd.f32 %v1458_v38, %v1410_v37  ;;  %v1364_v59 = vadd.f32 %v1363_v55, %v1314_v39 }
  0xc8   :  { %1509 = vmatmul.bf16.gmra.mxu0 %v4962_v36  ;;  %1558 = vmatmul.bf16.gmra.mxu1 %v4870_v24 }
  0xc9   :  { %1607 = vmatmul.bf16.gmra.mxu2 %v4872_v25  ;;  %1744 = vmatpush.bf16.msra.mxu1 %v4239_v31  ;;  %v4604_v31 = vld [vmem:[#allocation5 + $0x464] sm:$0xf] }
  0xca   :  { %1656 = vmatmul.bf16.gmra.mxu3 %v4874_v26  ;;  %v4223_v33 = vor.u32 %v4604_v31, %v4220_v32 }
  0xcc   :  { %v1412_v3 = vpop.f32.mrf.mxu2 }
  0xcd   :  { %v1413_v6 = vadd.f32 %v1412_v3, %v1364_v59  ;;  %v1461_v7 = vpop.f32.mrf.mxu3  ;;  %v1316_v16 = vpop.f32.mrf.mxu0  ;;  %v4511_v3 = vld [vmem:[#allocation5 + $0x174] sm:$0xf0]  ;;  %1745 = vmatpush.bf16.msra.mxu1 %v4223_v33 }
  0xce   :  { %v1365_v17 = vpop.f32.mrf.mxu1 }
  0xcf   :  { %v4970_v18 = vadd.f32 %v1461_v7, %v1413_v6  ;;  %v1366_v19 = vadd.f32 %v1365_v17, %v1316_v16  ;;  %v3843_v6 = vor.u32 %v4511_v3, %v3842_v2  ;;  %v4475_v2 = vld [vmem:[#allocation5 + $0x54] sm:$0xf0]  ;;  %v4568_v3 = vld [vmem:[#allocation5 + $0x344] sm:$0xf] }
  0xd1   :  { %1843 = vmatpush.bf16.msra.mxu3 %v3843_v6  ;;  %v3826_v6 = vld [vmem:[#allocation5 + $0x148] sm:$0xf] }
  0xd4   :  { %v1414_v34 = vpop.f32.mrf.mxu2 }
  0xd5   :  { %v1415_v37 = vadd.f32 %v1414_v34, %v1366_v19  ;;  %v1463_v38 = vpop.f32.mrf.mxu3  ;;  %v1319_v39 = vpop.f32.mrf.mxu0  ;;  %v3574_v34 = vld [vmem:[#allocation2 + $0x88] sm:$0xf] }
  0xd6   :  { %v1368_v55 = vpop.f32.mrf.mxu1 }
  0xd7   :  { %v4974_v59 = vadd.f32 %v1463_v38, %v1415_v37  ;;  %v1369_v60 = vadd.f32 %v1368_v55, %v1319_v39  ;;  %v4443_v37 = vld [vmem:[#allocation2 + $0x98] sm:$0xf0] }
  0xd8   :  { %1514 = vmatmul.bf16.gmra.mxu0 %v4972_v35  ;;  %1563 = vmatmul.bf16.gmra.mxu1 %v4882_v49  ;;  %v4982_v39 = vor.u32 %v4443_v37, %v3574_v34 }
  0xd9   :  { %1612 = vmatmul.bf16.gmra.mxu2 %v4884_v50 }
  0xda   :  { %1661 = vmatmul.bf16.gmra.mxu3 %v4886_v51  ;;  %6405 = vst [vmem:[#allocation40_spill] sm:$0xff] %v4982_v39 }
  0xdc   :  { %v1417_v4 = vpop.f32.mrf.mxu2 }
  0xdd   :  { %v1418_v7 = vadd.f32 %v1417_v4, %v1369_v60  ;;  %v1466_v16 = vpop.f32.mrf.mxu3  ;;  %v1321_v17 = vpop.f32.mrf.mxu0  ;;  %v3699_v4 = vor.u32 %v4475_v2, %v3698_v1 }
  0xde   :  { %v1370_v19 = vpop.f32.mrf.mxu1 }
  0xdf   :  { %v4980_v29 = vadd.f32 %v1466_v16, %v1418_v7  ;;  %v1371_v30 = vadd.f32 %v1370_v19, %v1321_v17  ;;  %v4507_v7 = vld [vmem:[#allocation5 + $0x154] sm:$0xf0]  ;;  %v4079_v17 = vor.u32 %v4568_v3, %v4076_v5  ;;  %1795 = vmatpush.bf16.msra.mxu2 %v3699_v4 }
  0xe0   :  { %v3827_v19 = vor.u32 %v4507_v7, %v3826_v6 }
  0xe1   :  { %1697 = vmatpush.bf16.msra.mxu0 %v4079_v17  ;;  %v4471_v17 = vld [vmem:[#allocation5 + $0x34] sm:$0xf0] }
  0xe2   :  { %1844 = vmatpush.bf16.msra.mxu3 %v3827_v19  ;;  %v4564_v19 = vld [vmem:[#allocation5 + $0x324] sm:$0xf] }
  0xe4   :  { %v1419_v38 = vpop.f32.mrf.mxu2 }
  0xe5   :  { %v1420_v55 = vadd.f32 %v1419_v38, %v1371_v30  ;;  %v1468_v60 = vpop.f32.mrf.mxu3  ;;  %v1324_v61 = vpop.f32.mrf.mxu0  ;;  %v4600_v38 = vld [vmem:[#allocation5 + $0x444] sm:$0xf] }
  0xe6   :  { %v1373_v62 = vpop.f32.mrf.mxu1 }
  0xe7   :  { %v4984_v63 = vadd.f32 %v1468_v60, %v1420_v55  ;;  %v1374_v0 = vadd.f32 %v1373_v62, %v1324_v61  ;;  %v4204_v55 = vld [vmem:[#allocation5 + $0x450] sm:$0xf0]  ;;  %v3594_v61 = vld [vmem:[#allocation2 + $0xb0] sm:$0xf]  ;;  %v4448_v62 = vld [vmem:[#allocation2 + $0xc0] sm:$0xf0] }
  0xe8   :  { %1519 = vmatmul.bf16.gmra.mxu0 %v4982_v39  ;;  %1568 = vmatmul.bf16.gmra.mxu1 %v4894_v12  ;;  %v4207_v60 = vor.u32 %v4600_v38, %v4204_v55  ;;  %v4992_v2 = vor.u32 %v4448_v62, %v3594_v61 }
  0xe9   :  { %1617 = vmatmul.bf16.gmra.mxu2 %v4896_v13 }
  0xea   :  { %1666 = vmatmul.bf16.gmra.mxu3 %v4898_v14  ;;  %1746 = vmatpush.bf16.msra.mxu1 %v4207_v60  ;;  %6406 = vst [vmem:[#allocation41_spill] sm:$0xff] %v4992_v2 }
  0xec   :  { %v1422_v16 = vpop.f32.mrf.mxu2 }
  0xed   :  { %v1423_v30 = vadd.f32 %v1422_v16, %v1374_v0  ;;  %v1471_v31 = vpop.f32.mrf.mxu3  ;;  %v1326_v32 = vpop.f32.mrf.mxu0  ;;  %v3682_v16 = vld [vmem:[#allocation5 + $0x28] sm:$0xf] }
  0xee   :  { %v1375_v33 = vpop.f32.mrf.mxu1 }
  0xef   :  { %v4990_v34 = vadd.f32 %v1471_v31, %v1423_v30  ;;  %v1376_v37 = vadd.f32 %v1375_v33, %v1326_v32  ;;  %v3683_v30 = vor.u32 %v4471_v17, %v3682_v16  ;;  %v4060_v31 = vld [vmem:[#allocation5 + $0x330] sm:$0xf0]  ;;  %v3810_v32 = vld [vmem:[#allocation5 + $0x128] sm:$0xf]  ;;  %v4503_v33 = vld [vmem:[#allocation5 + $0x134] sm:$0xf0] }
  0xf0   :  { %v4063_v38 = vor.u32 %v4564_v19, %v4060_v31  ;;  %v3811_v55 = vor.u32 %v4503_v33, %v3810_v32  ;;  %v3614_v16 = vld [vmem:[#allocation2 + $0xd8] sm:$0xf]  ;;  %v4453_v17 = vld [vmem:[#allocation2 + $0xe8] sm:$0xf0] }
  0xf1   :  { %1796 = vmatpush.bf16.msra.mxu2 %v3683_v30  ;;  %v5002_v51 = vor.u32 %v4453_v17, %v3614_v16 }
  0xf2   :  { %1698 = vmatpush.bf16.msra.mxu0 %v4063_v38  ;;  %1845 = vmatpush.bf16.msra.mxu3 %v3811_v55  ;;  %v4560_v38 = vld [vmem:[#allocation5 + $0x304] sm:$0xf] }
  0xf4   :  { %v1424_v1 = vpop.f32.mrf.mxu2 }
  0xf5   :  { %v1425_v3 = vadd.f32 %v1424_v1, %v1376_v37  ;;  %v1473_v0 = vpop.f32.mrf.mxu3  ;;  %v1329_v5 = vpop.f32.mrf.mxu0 }
  0xf6   :  { %v1378_v6 = vpop.f32.mrf.mxu1 }
  0xf7   :  { %v4994_v4 = vadd.f32 %v1473_v0, %v1425_v3  ;;  %v1379_v7 = vadd.f32 %v1378_v6, %v1329_v5  ;;  %v4596_v5 = vld [vmem:[#allocation5 + $0x424] sm:$0xf]  ;;  %v4188_v6 = vld [vmem:[#allocation5 + $0x430] sm:$0xf0] }
  0xf8   :  { %1524 = vmatmul.bf16.gmra.mxu0 %v4992_v2  ;;  %1573 = vmatmul.bf16.gmra.mxu1 %v4906_v40 }
  0xf9   :  { %1622 = vmatmul.bf16.gmra.mxu2 %v4908_v41 }
  0xfa   :  { %1671 = vmatmul.bf16.gmra.mxu3 %v4910_v42  ;;  %v4191_v42 = vor.u32 %v4596_v5, %v4188_v6 }
  0xfc   :  { %v1427_v37 = vpop.f32.mrf.mxu2  ;;  %1747 = vmatpush.bf16.msra.mxu1 %v4191_v42  ;;  %v4467_v42 = vld [vmem:[#allocation5 + $0x14] sm:$0xf0] }
  0xfd   :  { %v1428_v60 = vadd.f32 %v1427_v37, %v1379_v7  ;;  %v1476_v61 = vpop.f32.mrf.mxu3  ;;  %v1331_v62 = vpop.f32.mrf.mxu0  ;;  %v3666_v37 = vld [vmem:[#allocation5 + $0x8] sm:$0xf] }
  0xfe   :  { %v1380_v1 = vpop.f32.mrf.mxu1  ;;  %v3667_v55 = vor.u32 %v4467_v42, %v3666_v37  ;;  %v3634_v37 = vld [vmem:[#allocation2 + $0x100] sm:$0xf]  ;;  %v4458_v42 = vld [vmem:[#allocation2 + $0x110] sm:$0xf0] }
  0xff   :  { %v5000_v3 = vadd.f32 %v1476_v61, %v1428_v60  ;;  %v1381_v0 = vadd.f32 %v1380_v1, %v1331_v62  ;;  %v4044_v60 = vld [vmem:[#allocation5 + $0x310] sm:$0xf0]  ;;  %v4499_v61 = vld [vmem:[#allocation5 + $0x114] sm:$0xf0]  ;;  %v5012_v54 = vor.u32 %v4458_v42, %v3634_v37 }
 0x100   :  { %v4047_v1 = vor.u32 %v4560_v38, %v4044_v60  ;;  %1797 = vmatpush.bf16.msra.mxu2 %v3667_v55 }
 0x101   :  { %6407 = vst [vmem:[#allocation42_spill] sm:$0xff] %v5012_v54 }
 0x102   :  { %1699 = vmatpush.bf16.msra.mxu0 %v4047_v1  ;;  %v4034_v1 = vld [vmem:[#allocation5 + $0x2e8] sm:$0xf] }
 0x104   :  { %v1429_v14 = vpop.f32.mrf.mxu2 }
 0x105   :  { %v1430_v19 = vadd.f32 %v1429_v14, %v1381_v0  ;;  %v1478_v7 = vpop.f32.mrf.mxu3  ;;  %v1334_v31 = vpop.f32.mrf.mxu0  ;;  %v3794_v14 = vld [vmem:[#allocation5 + $0x108] sm:$0xf] }
 0x106   :  { %v1383_v32 = vpop.f32.mrf.mxu1  ;;  %v3795_v0 = vor.u32 %v4499_v61, %v3794_v14 }
 0x107   :  { %v5004_v30 = vadd.f32 %v1478_v7, %v1430_v19  ;;  %v1384_v33 = vadd.f32 %v1383_v32, %v1334_v31  ;;  %v4592_v31 = vld [vmem:[#allocation5 + $0x404] sm:$0xf]  ;;  %v4172_v32 = vld [vmem:[#allocation5 + $0x410] sm:$0xf0] }
 0x108   :  { %1529 = vmatmul.bf16.gmra.mxu0 %v5002_v51  ;;  %1578 = vmatmul.bf16.gmra.mxu1 %v4918_v8 }
 0x109   :  { %1627 = vmatmul.bf16.gmra.mxu2 %v4920_v9  ;;  %1846 = vmatpush.bf16.msra.mxu3 %v3795_v0 }
 0x10a   :  { %1676 = vmatmul.bf16.gmra.mxu3 %v4922_v10  ;;  %v4175_v10 = vor.u32 %v4592_v31, %v4172_v32 }
 0x10c   :  { %v1432_v62 = vpop.f32.mrf.mxu2  ;;  %1748 = vmatpush.bf16.msra.mxu1 %v4175_v10  ;;  %v4623_v10 = vld [vmem:[#allocation5 + $0x4f4] sm:$0xf0] }
 0x10d   :  { %v1433_v5 = vadd.f32 %v1432_v62, %v1384_v33  ;;  %v1481_v6 = vpop.f32.mrf.mxu3  ;;  %v1336_v16 = vpop.f32.mrf.mxu0  ;;  %v4290_v62 = vld [vmem:[#allocation5 + $0x4e8] sm:$0xf] }
 0x10e   :  { %v1385_v17 = vpop.f32.mrf.mxu1  ;;  %v4291_v0 = vor.u32 %v4623_v10, %v4290_v62  ;;  %v3654_v62 = vld [vmem:[#allocation2 + $0x128] sm:$0xf]  ;;  %v4463_v10 = vld [vmem:[#allocation2 + $0x138] sm:$0xf0] }
 0x10f   :  { %v5010_v19 = vadd.f32 %v1481_v6, %v1433_v5  ;;  %v1386_v7 = vadd.f32 %v1385_v17, %v1336_v16  ;;  %v4559_v5 = vld [vmem:[#allocation5 + $0x2f4] sm:$0xf0]  ;;  %v3780_v6 = vld [vmem:[#allocation5 + $0xf8] sm:$0xf0] }
 0x110   :  { %v4035_v17 = vor.u32 %v4559_v5, %v4034_v1  ;;  %1986 = vmatpush.bf16.msrb.mxu2 %v4291_v0 }
 0x112   :  { %1888 = vmatpush.bf16.msrb.mxu0 %v4035_v17  ;;  %v4018_v17 = vld [vmem:[#allocation5 + $0x2c8] sm:$0xf] }
 0x114   :  { %v1434_v26 = vpop.f32.mrf.mxu2 }
 0x115   :  { %v1435_v38 = vadd.f32 %v1434_v26, %v1386_v7  ;;  %v1483_v33 = vpop.f32.mrf.mxu3  ;;  %v1339_v60 = vpop.f32.mrf.mxu0  ;;  %v4493_v26 = vld [vmem:[#allocation5 + $0xec] sm:$0xf] }
 0x116   :  { %v1388_v14 = vpop.f32.mrf.mxu1  ;;  %v3783_v7 = vor.u32 %v4493_v26, %v3780_v6 }
 0x117   :  { %v5014_v55 = vadd.f32 %v1483_v33, %v1435_v38  ;;  %v1389_v61 = vadd.f32 %v1388_v14, %v1339_v60  ;;  %v4162_v60 = vld [vmem:[#allocation5 + $0x3e8] sm:$0xf]  ;;  %v4591_v14 = vld [vmem:[#allocation5 + $0x3f4] sm:$0xf0] }
 0x118   :  { %1534 = vmatmul.bf16.gmra.mxu0 %v5012_v54  ;;  %1583 = vmatmul.bf16.gmra.mxu1 %v4930_v44 }
 0x119   :  { %1632 = vmatmul.bf16.gmra.mxu2 %v4932_v45  ;;  %2035 = vmatpush.bf16.msrb.mxu3 %v3783_v7  ;;  %v5022_v45 = vor.u32 %v4463_v10, %v3654_v62 }
 0x11a   :  { %1681 = vmatmul.bf16.gmra.mxu3 %v4934_v46  ;;  %v4163_v46 = vor.u32 %v4591_v14, %v4162_v60 }
 0x11b   :  { %6408 = vst [vmem:[#allocation43_spill] sm:$0xff] %v5022_v45 }
 0x11c   :  { %v1437_v16 = vpop.f32.mrf.mxu2  ;;  %1937 = vmatpush.bf16.msrb.mxu1 %v4163_v46  ;;  %v4619_v46 = vld [vmem:[#allocation5 + $0x4d4] sm:$0xf0] }
 0x11d   :  { %v1438_v31 = vadd.f32 %v1437_v16, %v1389_v61  ;;  %v1486_v32 = vpop.f32.mrf.mxu3  ;;  %v1341_v37 = vpop.f32.mrf.mxu0  ;;  %v4274_v16 = vld [vmem:[#allocation5 + $0x4c8] sm:$0xf] }
 0x11e   :  { %v1390_v42 = vpop.f32.mrf.mxu1  ;;  %v4275_v7 = vor.u32 %v4619_v46, %v4274_v16 }
 0x11f   :  { %v5020_v38 = vadd.f32 %v1486_v32, %v1438_v31  ;;  %v1391_v33 = vadd.f32 %v1390_v42, %v1341_v37  ;;  %v4555_v31 = vld [vmem:[#allocation5 + $0x2d4] sm:$0xf0]  ;;  %v3764_v32 = vld [vmem:[#allocation5 + $0xd8] sm:$0xf0] }
 0x120   :  { %v4019_v42 = vor.u32 %v4555_v31, %v4018_v17  ;;  %1987 = vmatpush.bf16.msrb.mxu2 %v4275_v7  ;;  %v4258_v7 = vld [vmem:[#allocation5 + $0x4a8] sm:$0xf] }
 0x122   :  { %1889 = vmatpush.bf16.msrb.mxu0 %v4019_v42  ;;  %v4485_v42 = vld [vmem:[#allocation5 + $0xac] sm:$0xf] }
 0x124   :  { %v1439_v23 = vpop.f32.mrf.mxu2 }
 0x125   :  { %v1440_v1 = vadd.f32 %v1439_v23, %v1391_v33  ;;  %v1488_v61 = vpop.f32.mrf.mxu3  ;;  %v1344_v5 = vpop.f32.mrf.mxu0  ;;  %v4489_v23 = vld [vmem:[#allocation5 + $0xcc] sm:$0xf] }
 0x126   :  { %v1393_v26 = vpop.f32.mrf.mxu1  ;;  %v3767_v33 = vor.u32 %v4489_v23, %v3764_v32  ;;  %v4002_v23 = vld [vmem:[#allocation5 + $0x2a8] sm:$0xf] }
 0x127   :  { %v5024_v0 = vadd.f32 %v1488_v61, %v1440_v1  ;;  %v1394_v6 = vadd.f32 %v1393_v26, %v1344_v5  ;;  %v4146_v5 = vld [vmem:[#allocation5 + $0x3c8] sm:$0xf]  ;;  %v4587_v26 = vld [vmem:[#allocation5 + $0x3d4] sm:$0xf0] }
 0x128   :  { %1539 = vmatmul.bf16.gmra.mxu0 %v5022_v45  ;;  %1588 = vmatmul.bf16.gmra.mxu1 %v4942_v20 }
 0x129   :  { %1637 = vmatmul.bf16.gmra.mxu2 %v4944_v21  ;;  %2036 = vmatpush.bf16.msrb.mxu3 %v3767_v33  ;;  %v3748_v33 = vld [vmem:[#allocation5 + $0xb8] sm:$0xf0] }
 0x12a   :  { %1686 = vmatmul.bf16.gmra.mxu3 %v4946_v22  ;;  %v4147_v22 = vor.u32 %v4587_v26, %v4146_v5  ;;  %v4130_v26 = vld [vmem:[#allocation5 + $0x3a8] sm:$0xf] }
 0x12c   :  { %v1442_v37 = vpop.f32.mrf.mxu2  ;;  %1938 = vmatpush.bf16.msrb.mxu1 %v4147_v22  ;;  %v4615_v22 = vld [vmem:[#allocation5 + $0x4b4] sm:$0xf0] }
 0x12d   :  { %v1443_v60 = vadd.f32 %v1442_v37, %v1394_v6  ;;  %v1491_v14 = vpop.f32.mrf.mxu3  ;;  %v1346_v62 = vpop.f32.mrf.mxu0  ;;  %v4259_v32 = vor.u32 %v4615_v22, %v4258_v7  ;;  %v4551_v37 = vld [vmem:[#allocation5 + $0x2b4] sm:$0xf0] }
 0x12e   :  { %v1395_v10 = vpop.f32.mrf.mxu1 }
 0x12f   :  { %v5030_v1 = vadd.f32 %v1491_v14, %v1443_v60  ;;  %v1396_v61 = vadd.f32 %v1395_v10, %v1346_v62  ;;  %v3751_v60 = vor.u32 %v4485_v42, %v3748_v33  ;;  %1988 = vmatpush.bf16.msrb.mxu2 %v4259_v32 }
 0x131   :  { %2037 = vmatpush.bf16.msrb.mxu3 %v3751_v60  ;;  %v3986_v60 = vld [vmem:[#allocation5 + $0x288] sm:$0xf] }
 0x134   :  { %v1444_v16 = vpop.f32.mrf.mxu2 }
 0x135   :  { %v1445_v46 = vadd.f32 %v1444_v16, %v1396_v61  ;;  %v1493_v21 = vpop.f32.mrf.mxu3  ;;  %v1505_v20 = vpop.f32.mrf.mxu0  ;;  %v4583_v16 = vld [vmem:[#allocation5 + $0x3b4] sm:$0xf0] }
 0x136   :  { %v5033_v17 = vadd.f32 %v1505_v20, %v4960_v28  ;;  %v1554_v6 = vpop.f32.mrf.mxu1  ;;  %v4003_v28 = vor.u32 %v4551_v37, %v4002_v23  ;;  %v4131_v7 = vor.u32 %v4583_v16, %v4130_v26 }
 0x137   :  { %v5035_v31 = vadd.f32 %v1493_v21, %v1445_v46 }
 0x138   :  { %1700 = vmatmul.bf16.vlgmr.msra.gmra.mxu0 %v4864_v57  ;;  %1749 = vmatmul.bf16.vlgmr.msra.gmra.mxu1 %v4954_v58 }
 0x139   :  { %1798 = vmatmul.bf16.vlgmr.msra.gmra.mxu2 %v4858_v48  ;;  %1890 = vmatpush.bf16.msrb.mxu0 %v4003_v28  ;;  %v4611_v28 = vld [vmem:[#allocation5 + $0x494] sm:$0xf0] }
 0x13a   :  { %1847 = vmatmul.bf16.vlgmr.msra.gmra.mxu3 %v4860_v53  ;;  %1939 = vmatpush.bf16.msrb.mxu1 %v4131_v7 }
 0x13c   :  { %v1603_v20 = vpop.f32.mrf.mxu2 }
 0x13d   :  { %v1604_v21 = vadd.f32 %v1603_v20, %v1554_v6  ;;  %v1652_v14 = vpop.f32.mrf.mxu3  ;;  %v1507_v62 = vpop.f32.mrf.mxu0  ;;  %v4242_v20 = vld [vmem:[#allocation5 + $0x488] sm:$0xf] }
 0x13e   :  { %v5042_v10 = vadd.f32 %v1507_v62, %v4964_v56  ;;  %v1556_v61 = vpop.f32.mrf.mxu1  ;;  %v3732_v62 = vld [vmem:[#allocation5 + $0x98] sm:$0xf0] }
 0x13f   :  { %v5044_v5 = vadd.f32 %v1652_v14, %v1604_v21  ;;  %v4243_v21 = vor.u32 %v4611_v28, %v4242_v20  ;;  %v4547_v14 = vld [vmem:[#allocation5 + $0x294] sm:$0xf0] }
 0x140   :  { %v2280_v46 = vadd.f32 %v5042_v10, %v5033_v17  ;;  %v3987_v26 = vor.u32 %v4547_v14, %v3986_v60  ;;  %v4579_v20 = vld [vmem:[#allocation5 + $0x394] sm:$0xf0] }
 0x141   :  { %1989 = vmatpush.bf16.msrb.mxu2 %v4243_v21 }
 0x142   :  { %1891 = vmatpush.bf16.msrb.mxu0 %v3987_v26 }
 0x144   :  { %v1605_v22 = vpop.f32.mrf.mxu2 }
 0x145   :  { %v1606_v6 = vadd.f32 %v1605_v22, %v1556_v61  ;;  %v1654_v23 = vpop.f32.mrf.mxu3  ;;  %v1510_v37 = vpop.f32.mrf.mxu0 }
 0x146   :  { %v5049_v32 = vadd.f32 %v1510_v37, %v4970_v18  ;;  %v1559_v56 = vpop.f32.mrf.mxu1  ;;  %v4481_v18 = vld [vmem:[#allocation5 + $0x8c] sm:$0xf] }
 0x147   :  { %v5051_v42 = vadd.f32 %v1654_v23, %v1606_v6  ;;  %v3735_v16 = vor.u32 %v4481_v18, %v3732_v62 }
 0x148   :  { %v2281_v33 = vadd.f32 %v2280_v46, %v5049_v32  ;;  %1705 = vmatmul.bf16.gmra.mxu0 %v4876_v27  ;;  %1754 = vmatmul.bf16.gmra.mxu1 %v4962_v36 }
 0x149   :  { %1803 = vmatmul.bf16.gmra.mxu2 %v4870_v24  ;;  %2038 = vmatpush.bf16.msrb.mxu3 %v3735_v16  ;;  %v4543_v16 = vld [vmem:[#allocation5 + $0x274] sm:$0xf0] }
 0x14a   :  { %1852 = vmatmul.bf16.gmra.mxu3 %v4872_v25  ;;  %v4114_v25 = vld [vmem:[#allocation5 + $0x388] sm:$0xf] }
 0x14b   :  { %v4115_v53 = vor.u32 %v4579_v20, %v4114_v25  ;;  %v4607_v25 = vld [vmem:[#allocation5 + $0x474] sm:$0xf0] }
 0x14c   :  { %v1608_v61 = vpop.f32.mrf.mxu2 }
 0x14d   :  { %v1609_v7 = vadd.f32 %v1608_v61, %v1559_v56  ;;  %v1657_v46 = vpop.f32.mrf.mxu3  ;;  %v1512_v22 = vpop.f32.mrf.mxu0  ;;  %1940 = vmatpush.bf16.msrb.mxu1 %v4115_v53  ;;  %v4226_v53 = vld [vmem:[#allocation5 + $0x468] sm:$0xf] }
 0x14e   :  { %v5059_v6 = vadd.f32 %v1512_v22, %v4974_v59  ;;  %v1561_v23 = vpop.f32.mrf.mxu1  ;;  %v4227_v26 = vor.u32 %v4607_v25, %v4226_v53  ;;  %v4575_v53 = vld [vmem:[#allocation5 + $0x374] sm:$0xf0] }
 0x14f   :  { %v5061_v37 = vadd.f32 %v1657_v46, %v1609_v7  ;;  %v3716_v7 = vld [vmem:[#allocation5 + $0x78] sm:$0xf0] }
 0x150   :  { %v2282_v28 = vadd.f32 %v2281_v33, %v5059_v6  ;;  %v3970_v33 = vld [vmem:[#allocation5 + $0x268] sm:$0xf]  ;;  %1990 = vmatpush.bf16.msrb.mxu2 %v4227_v26 }
 0x151   :  { %v3971_v22 = vor.u32 %v4543_v16, %v3970_v33 }
 0x153   :  { %1892 = vmatpush.bf16.msrb.mxu0 %v3971_v22 }
 0x154   :  { %v1610_v60 = vpop.f32.mrf.mxu2 }
 0x155   :  { %v1611_v14 = vadd.f32 %v1610_v60, %v1561_v23  ;;  %v1659_v56 = vpop.f32.mrf.mxu3  ;;  %v1515_v18 = vpop.f32.mrf.mxu0 }
 0x156   :  { %v5065_v21 = vadd.f32 %v1515_v18, %v4980_v29  ;;  %v1564_v59 = vpop.f32.mrf.mxu1  ;;  %v4477_v29 = vld [vmem:[#allocation5 + $0x6c] sm:$0xf] }
 0x157   :  { %v5067_v62 = vadd.f32 %v1659_v56, %v1611_v14  ;;  %v3719_v23 = vor.u32 %v4477_v29, %v3716_v7 }
 0x158   :  { %v2283_v61 = vadd.f32 %v2282_v28, %v5065_v21  ;;  %1710 = vmatmul.bf16.gmra.mxu0 %v4888_v52  ;;  %1759 = vmatmul.bf16.gmra.mxu1 %v4972_v35 }
 0x159   :  { %1808 = vmatmul.bf16.gmra.mxu2 %v4882_v49  ;;  %2039 = vmatpush.bf16.msrb.mxu3 %v3719_v23  ;;  %v4539_v23 = vld [vmem:[#allocation5 + $0x254] sm:$0xf0] }
 0x15a   :  { %1857 = vmatmul.bf16.gmra.mxu3 %v4884_v50  ;;  %v4098_v50 = vld [vmem:[#allocation5 + $0x368] sm:$0xf] }
 0x15b   :  { %v4099_v49 = vor.u32 %v4575_v53, %v4098_v50  ;;  %v4603_v50 = vld [vmem:[#allocation5 + $0x454] sm:$0xf0] }
 0x15c   :  { %v1613_v46 = vpop.f32.mrf.mxu2 }
 0x15d   :  { %v1614_v20 = vadd.f32 %v1613_v46, %v1564_v59  ;;  %v1662_v28 = vpop.f32.mrf.mxu3  ;;  %v1517_v60 = vpop.f32.mrf.mxu0  ;;  %1941 = vmatpush.bf16.msrb.mxu1 %v4099_v49  ;;  %v4210_v49 = vld [vmem:[#allocation5 + $0x448] sm:$0xf] }
 0x15e   :  { %v5075_v14 = vadd.f32 %v1517_v60, %v4984_v63  ;;  %v1566_v56 = vpop.f32.mrf.mxu1  ;;  %v4211_v22 = vor.u32 %v4603_v50, %v4210_v49  ;;  %v4571_v49 = vld [vmem:[#allocation5 + $0x354] sm:$0xf0] }
 0x15f   :  { %v5077_v18 = vadd.f32 %v1662_v28, %v1614_v20  ;;  %v3700_v20 = vld [vmem:[#allocation5 + $0x58] sm:$0xf0] }
 0x160   :  { %v2284_v25 = vadd.f32 %v2283_v61, %v5075_v14  ;;  %v3954_v61 = vld [vmem:[#allocation5 + $0x248] sm:$0xf]  ;;  %1991 = vmatpush.bf16.msrb.mxu2 %v4211_v22 }
 0x161   :  { %v3955_v60 = vor.u32 %v4539_v23, %v3954_v61 }
 0x163   :  { %1893 = vmatpush.bf16.msrb.mxu0 %v3955_v60 }
 0x164   :  { %v1615_v33 = vpop.f32.mrf.mxu2 }
 0x165   :  { %v1616_v16 = vadd.f32 %v1615_v33, %v1566_v56  ;;  %v1664_v59 = vpop.f32.mrf.mxu3  ;;  %v1520_v29 = vpop.f32.mrf.mxu0 }
 0x166   :  { %v5081_v26 = vadd.f32 %v1520_v29, %v4990_v34  ;;  %v1569_v63 = vpop.f32.mrf.mxu1  ;;  %v4473_v34 = vld [vmem:[#allocation5 + $0x4c] sm:$0xf] }
 0x167   :  { %v5083_v7 = vadd.f32 %v1664_v59, %v1616_v16  ;;  %v3703_v56 = vor.u32 %v4473_v34, %v3700_v20 }
 0x168   :  { %v2285_v46 = vadd.f32 %v2284_v25, %v5081_v26  ;;  %1715 = vmatmul.bf16.gmra.mxu0 %v4900_v15  ;;  %1764 = vmatmul.bf16.gmra.mxu1 %v4982_v39 }
 0x169   :  { %1813 = vmatmul.bf16.gmra.mxu2 %v4894_v12  ;;  %2040 = vmatpush.bf16.msrb.mxu3 %v3703_v56  ;;  %v4535_v56 = vld [vmem:[#allocation5 + $0x234] sm:$0xf0] }
 0x16a   :  { %1862 = vmatmul.bf16.gmra.mxu3 %v4896_v13  ;;  %v4082_v13 = vld [vmem:[#allocation5 + $0x348] sm:$0xf] }
 0x16b   :  { %v4083_v12 = vor.u32 %v4571_v49, %v4082_v13  ;;  %v4599_v13 = vld [vmem:[#allocation5 + $0x434] sm:$0xf0] }
 0x16c   :  { %v1618_v28 = vpop.f32.mrf.mxu2 }
 0x16d   :  { %v1619_v53 = vadd.f32 %v1618_v28, %v1569_v63  ;;  %v1667_v25 = vpop.f32.mrf.mxu3  ;;  %v1522_v33 = vpop.f32.mrf.mxu0  ;;  %1942 = vmatpush.bf16.msrb.mxu1 %v4083_v12  ;;  %v4194_v12 = vld [vmem:[#allocation5 + $0x428] sm:$0xf] }
 0x16e   :  { %v5091_v16 = vadd.f32 %v1522_v33, %v4994_v4  ;;  %v1571_v59 = vpop.f32.mrf.mxu1  ;;  %v4195_v60 = vor.u32 %v4599_v13, %v4194_v12  ;;  %v4567_v12 = vld [vmem:[#allocation5 + $0x334] sm:$0xf0] }
 0x16f   :  { %v5093_v29 = vadd.f32 %v1667_v25, %v1619_v53  ;;  %v3684_v53 = vld [vmem:[#allocation5 + $0x38] sm:$0xf0] }
 0x170   :  { %v2286_v50 = vadd.f32 %v2285_v46, %v5091_v16  ;;  %v3938_v46 = vld [vmem:[#allocation5 + $0x228] sm:$0xf]  ;;  %1992 = vmatpush.bf16.msrb.mxu2 %v4195_v60 }
 0x171   :  { %v3939_v33 = vor.u32 %v4535_v56, %v3938_v46 }
 0x173   :  { %1894 = vmatpush.bf16.msrb.mxu0 %v3939_v33 }
 0x174   :  { %v1620_v61 = vpop.f32.mrf.mxu2 }
 0x175   :  { %v1621_v23 = vadd.f32 %v1620_v61, %v1571_v59  ;;  %v1669_v63 = vpop.f32.mrf.mxu3  ;;  %v1525_v34 = vpop.f32.mrf.mxu0 }
 0x176   :  { %v5097_v22 = vadd.f32 %v1525_v34, %v5000_v3  ;;  %v1574_v4 = vpop.f32.mrf.mxu1  ;;  %v4469_v3 = vld [vmem:[#allocation5 + $0x2c] sm:$0xf] }
 0x177   :  { %v5099_v20 = vadd.f32 %v1669_v63, %v1621_v23  ;;  %v3687_v59 = vor.u32 %v4469_v3, %v3684_v53 }
 0x178   :  { %v2287_v28 = vadd.f32 %v2286_v50, %v5097_v22  ;;  %1720 = vmatmul.bf16.gmra.mxu0 %v4912_v43  ;;  %1769 = vmatmul.bf16.gmra.mxu1 %v4992_v2 }
 0x179   :  { %1818 = vmatmul.bf16.gmra.mxu2 %v4906_v40  ;;  %2041 = vmatpush.bf16.msrb.mxu3 %v3687_v59  ;;  %v4531_v59 = vld [vmem:[#allocation5 + $0x214] sm:$0xf0] }
 0x17a   :  { %1867 = vmatmul.bf16.gmra.mxu3 %v4908_v41  ;;  %v4066_v41 = vld [vmem:[#allocation5 + $0x328] sm:$0xf] }
 0x17b   :  { %v4067_v40 = vor.u32 %v4567_v12, %v4066_v41  ;;  %v4595_v41 = vld [vmem:[#allocation5 + $0x414] sm:$0xf0] }
 0x17c   :  { %v1623_v25 = vpop.f32.mrf.mxu2 }
 0x17d   :  { %v1624_v49 = vadd.f32 %v1623_v25, %v1574_v4  ;;  %v1672_v50 = vpop.f32.mrf.mxu3  ;;  %v1527_v61 = vpop.f32.mrf.mxu0  ;;  %1943 = vmatpush.bf16.msrb.mxu1 %v4067_v40  ;;  %v4178_v40 = vld [vmem:[#allocation5 + $0x408] sm:$0xf] }
 0x17e   :  { %v5107_v23 = vadd.f32 %v1527_v61, %v5004_v30  ;;  %v1576_v63 = vpop.f32.mrf.mxu1  ;;  %v4179_v33 = vor.u32 %v4595_v41, %v4178_v40  ;;  %v4563_v40 = vld [vmem:[#allocation5 + $0x314] sm:$0xf0] }
 0x17f   :  { %v5109_v34 = vadd.f32 %v1672_v50, %v1624_v49  ;;  %v3668_v49 = vld [vmem:[#allocation5 + $0x18] sm:$0xf0] }
 0x180   :  { %v2288_v13 = vadd.f32 %v2287_v28, %v5107_v23  ;;  %v3922_v28 = vld [vmem:[#allocation5 + $0x208] sm:$0xf]  ;;  %1993 = vmatpush.bf16.msrb.mxu2 %v4179_v33 }
 0x181   :  { %v3923_v61 = vor.u32 %v4531_v59, %v3922_v28 }
 0x183   :  { %1895 = vmatpush.bf16.msrb.mxu0 %v3923_v61 }
 0x184   :  { %v1625_v46 = vpop.f32.mrf.mxu2 }
 0x185   :  { %v1626_v56 = vadd.f32 %v1625_v46, %v1576_v63  ;;  %v1674_v4 = vpop.f32.mrf.mxu3  ;;  %v1530_v3 = vpop.f32.mrf.mxu0 }
 0x186   :  { %v5113_v60 = vadd.f32 %v1530_v3, %v5010_v19  ;;  %v1579_v30 = vpop.f32.mrf.mxu1  ;;  %v4465_v19 = vld [vmem:[#allocation5 + $0xc] sm:$0xf] }
 0x187   :  { %v5115_v53 = vadd.f32 %v1674_v4, %v1626_v56  ;;  %v3671_v63 = vor.u32 %v4465_v19, %v3668_v49 }
 0x188   :  { %v2289_v25 = vadd.f32 %v2288_v13, %v5113_v60  ;;  %1725 = vmatmul.bf16.gmra.mxu0 %v4924_v11  ;;  %1774 = vmatmul.bf16.gmra.mxu1 %v5002_v51 }
 0x189   :  { %1823 = vmatmul.bf16.gmra.mxu2 %v4918_v8  ;;  %2042 = vmatpush.bf16.msrb.mxu3 %v3671_v63 }
 0x18a   :  { %1872 = vmatmul.bf16.gmra.mxu3 %v4920_v9  ;;  %v4050_v9 = vld [vmem:[#allocation5 + $0x308] sm:$0xf] }
 0x18b   :  { %v4051_v8 = vor.u32 %v4563_v40, %v4050_v9  ;;  %v6409_v9 = vld [vmem:[#allocation34_spill] sm:$0xff] }
 0x18c   :  { %v1628_v50 = vpop.f32.mrf.mxu2 }
 0x18d   :  { %v1629_v12 = vadd.f32 %v1628_v50, %v1579_v30  ;;  %v1677_v13 = vpop.f32.mrf.mxu3  ;;  %v1532_v46 = vpop.f32.mrf.mxu0  ;;  %1944 = vmatpush.bf16.msrb.mxu1 %v4051_v8 }
 0x18e   :  { %v5123_v56 = vadd.f32 %v1532_v46, %v5014_v55  ;;  %v1581_v4 = vpop.f32.mrf.mxu1 }
 0x18f   :  { %v5125_v3 = vadd.f32 %v1677_v13, %v1629_v12 }
 0x190   :  { %v2290_v41 = vadd.f32 %v2289_v25, %v5123_v56 }
 0x194   :  { %v1630_v28 = vpop.f32.mrf.mxu2 }
 0x195   :  { %v1631_v59 = vadd.f32 %v1630_v28, %v1581_v4  ;;  %v1679_v30 = vpop.f32.mrf.mxu3  ;;  %v1535_v19 = vpop.f32.mrf.mxu0 }
 0x196   :  { %v5129_v33 = vadd.f32 %v1535_v19, %v5020_v38  ;;  %v1584_v55 = vpop.f32.mrf.mxu1 }
 0x197   :  { %v5131_v49 = vadd.f32 %v1679_v30, %v1631_v59 }
 0x198   :  { %v2291_v50 = vadd.f32 %v2290_v41, %v5129_v33  ;;  %1730 = vmatmul.bf16.gmra.mxu0 %v4936_v47  ;;  %1779 = vmatmul.bf16.gmra.mxu1 %v5012_v54 }
 0x199   :  { %1828 = vmatmul.bf16.gmra.mxu2 %v4930_v44  ;;  %v6411_v44 = vld [vmem:[#allocation39_spill] sm:$0xff] }
 0x19a   :  { %1877 = vmatmul.bf16.gmra.mxu3 %v6409_v9 }
 0x19c   :  { %v1633_v8 = vpop.f32.mrf.mxu2 }
 0x19d   :  { %v1634_v25 = vadd.f32 %v1633_v8, %v1584_v55  ;;  %v1682_v61 = vpop.f32.mrf.mxu3  ;;  %v1537_v63 = vpop.f32.mrf.mxu0  ;;  %v6412_v55 = vld [vmem:[#allocation36_spill] sm:$0xff] }
 0x19e   :  { %v1538_v38 = vadd.f32 %v1537_v63, %v5024_v0  ;;  %v1586_v12 = vpop.f32.mrf.mxu1  ;;  %v6413_v0 = vld [vmem:[#allocation37_spill] sm:$0xff] }
 0x19f   :  { %v5139_v13 = vadd.f32 %v1682_v61, %v1634_v25 }
 0x1a0   :  { %v2292_v46 = vadd.f32 %v2291_v50, %v1538_v38 }
 0x1a4   :  { %v1635_v4 = vpop.f32.mrf.mxu2 }
 0x1a5   :  { %v1636_v40 = vadd.f32 %v1635_v4, %v1586_v12  ;;  %v1684_v41 = vpop.f32.mrf.mxu3  ;;  %v1540_v28 = vpop.f32.mrf.mxu0 }
 0x1a6   :  { %v1541_v59 = vadd.f32 %v1540_v28, %v5030_v1  ;;  %v1589_v30 = vpop.f32.mrf.mxu1 }
 0x1a7   :  { %v5142_v19 = vadd.f32 %v1684_v41, %v1636_v40 }
 0x1a8   :  { %v2293_v9 = vadd.f32 %v2292_v46, %v1541_v59  ;;  %1735 = vmatmul.bf16.gmra.mxu0 %v6411_v44  ;;  %1784 = vmatmul.bf16.gmra.mxu1 %v5022_v45 }
 0x1a9   :  { %6410 = vst [vmem:[#allocation44_spill] sm:$0xff] %v5142_v19  ;;  %1833 = vmatmul.bf16.gmra.mxu2 %v6412_v55 }
 0x1aa   :  { %1882 = vmatmul.bf16.gmra.mxu3 %v6413_v0 }
 0x1ac   :  { %v1638_v8 = vpop.f32.mrf.mxu2 }
 0x1ad   :  { %v1639_v50 = vadd.f32 %v1638_v8, %v1589_v30  ;;  %v1687_v25 = vpop.f32.mrf.mxu3  ;;  %v1542_v61 = vpop.f32.mrf.mxu0 }
 0x1ae   :  { %v1543_v63 = vadd.f32 %v1542_v61, %v5035_v31  ;;  %v1591_v12 = vpop.f32.mrf.mxu1  ;;  %v6414_v31 = vld [vmem:[#allocation16_spill] sm:$0xff] }
 0x1af   :  { %v5149_v1 = vadd.f32 %v1687_v25, %v1639_v50 }
 0x1b0   :  { %v2294_v4 = vadd.f32 %v2293_v9, %v1543_v63 }
 0x1b2   :  { %v2295_v40 = vrot.slane %v2294_v4, 4 }
 0x1b4   :  { %v2296_v46 = vadd.f32 %v2295_v40, %v2294_v4  ;;  %v1640_v41 = vpop.f32.mrf.mxu2 }
 0x1b5   :  { %v1641_v28 = vadd.f32 %v1640_v41, %v1591_v12  ;;  %v1689_v44 = vpop.f32.mrf.mxu3  ;;  %v1701_v45 = vpop.f32.mrf.mxu0 }
 0x1b6   :  { %v2297_v19 = vrot.slane %v2296_v46, 2  ;;  %v1702_v55 = vadd.f32 %v1701_v45, %v5044_v5  ;;  %v1750_v0 = vpop.f32.mrf.mxu1 }
 0x1b7   :  { %v5152_v54 = vadd.f32 %v1689_v44, %v1641_v28 }
 0x1b8   :  { %v2298_v30 = vadd.f32 %v2297_v19, %v2296_v46  ;;  %v5154_v8 = vadd.f32 %v1750_v0, %v1702_v55  ;;  %1896 = vmatmul.bf16.vlgmr.msrb.gmra.mxu0 %v6414_v31  ;;  %1945 = vmatmul.bf16.vlgmr.msrb.gmra.mxu1 %v4864_v57 }
 0x1b9   :  { %1994 = vmatmul.bf16.vlgmr.msrb.gmra.mxu2 %v4954_v58 }
 0x1ba   :  { %v2299_v9 = vrot.slane %v2298_v30, 1  ;;  %2043 = vmatmul.bf16.vlgmr.msrb.gmra.mxu3 %v4858_v48 }
 0x1bc   :  { %v2300_v50 = vadd.f32 %v2299_v9, %v2298_v30  ;;  %v1799_v25 = vpop.f32.mrf.mxu2 }
 0x1bd   :  { %v1848_v61 = vpop.f32.mrf.mxu3  ;;  %v1703_v12 = vpop.f32.mrf.mxu0 }
 0x1be   :  { %v2364_v45 = vmul.f32 0.0078125, %v2300_v50  ;;  %v5160_v5 = vadd.f32 %v1848_v61, %v1799_v25  ;;  %v1704_v44 = vadd.f32 %v1703_v12, %v5051_v42  ;;  %v1752_v19 = vpop.f32.mrf.mxu1  ;;  %v6431_v50 = vld [vmem:[#allocation18_spill] sm:$0xff] }
 0x1c0   :  { %v5164_v55 = vsub.f32 %v5033_v17, %v2364_v45  ;;  %v5167_v0 = vsub.f32 %v5042_v10, %v2364_v45  ;;  %v5170_v4 = vsub.f32 %v5049_v32, %v2364_v45  ;;  %v5173_v48 = vsub.f32 %v5059_v6, %v2364_v45 }
 0x1c1   :  { %v5176_v40 = vsub.f32 %v5065_v21, %v2364_v45  ;;  %v5179_v46 = vsub.f32 %v5075_v14, %v2364_v45  ;;  %v5182_v42 = vsub.f32 %v5081_v26, %v2364_v45  ;;  %v5185_v17 = vsub.f32 %v5091_v16, %v2364_v45 }
 0x1c2   :  { %6415 = vst [vmem:[#allocation16_spill] sm:$0xff] %v5164_v55  ;;  %v5188_v10 = vsub.f32 %v5097_v22, %v2364_v45  ;;  %v5191_v32 = vsub.f32 %v5107_v23, %v2364_v45  ;;  %v5194_v6 = vsub.f32 %v5113_v60, %v2364_v45  ;;  %v5197_v21 = vsub.f32 %v5123_v56, %v2364_v45  ;;  %v4513_v55 = vld [vmem:[#allocation5 + $0x18c] sm:$0xf] }
 0x1c3   :  { %6416 = vst [vmem:[#allocation45_spill] sm:$0xff] %v5167_v0  ;;  %v5200_v14 = vsub.f32 %v5129_v33, %v2364_v45  ;;  %v5202_v26 = vsub.f32 %v1538_v38, %v2364_v45  ;;  %v5204_v41 = vsub.f32 %v1541_v59, %v2364_v45  ;;  %v5206_v16 = vsub.f32 %v1543_v63, %v2364_v45  ;;  %v4116_v0 = vld [vmem:[#allocation5 + $0x398] sm:$0xf0] }
 0x1c4   :  { %6417 = vst [vmem:[#allocation46_spill] sm:$0xff] %v5170_v4  ;;  %v1801_v22 = vpop.f32.mrf.mxu2  ;;  %v5208_v9 = vadd.f32 %v1752_v19, %v1704_v44 }
 0x1c5   :  { %6418 = vst [vmem:[#allocation47_spill] sm:$0xff] %v5173_v48  ;;  %v1850_v28 = vpop.f32.mrf.mxu3  ;;  %v1706_v30 = vpop.f32.mrf.mxu0  ;;  %v3876_v48 = vld [vmem:[#allocation5 + $0x1b8] sm:$0xf0] }
 0x1c6   :  { %6419 = vst [vmem:[#allocation48_spill] sm:$0xff] %v5176_v40  ;;  %v1755_v23 = vpop.f32.mrf.mxu1  ;;  %v5210_v60 = vadd.f32 %v1850_v28, %v1801_v22  ;;  %v1707_v56 = vadd.f32 %v1706_v30, %v5061_v37  ;;  %v2301_v33 = vadd.f32 %v5208_v9, %v5154_v8  ;;  %v4517_v40 = vld [vmem:[#allocation5 + $0x1ac] sm:$0xf] }
 0x1c7   :  { %6420 = vst [vmem:[#allocation49_spill] sm:$0xff] %v5179_v46  ;;  %v4581_v46 = vld [vmem:[#allocation5 + $0x3ac] sm:$0xf] }
 0x1c8   :  { %6421 = vst [vmem:[#allocation50_spill] sm:$0xff] %v5182_v42  ;;  %1901 = vmatmul.bf16.gmra.mxu0 %v6431_v50  ;;  %1950 = vmatmul.bf16.gmra.mxu1 %v4876_v27  ;;  %v5218_v38 = vadd.f32 %v1755_v23, %v1707_v56  ;;  %v4020_v42 = vld [vmem:[#allocation5 + $0x2d8] sm:$0xf0] }
 0x1c9   :  { %6422 = vst [vmem:[#allocation51_spill] sm:$0xff] %v5185_v17  ;;  %1999 = vmatmul.bf16.gmra.mxu2 %v4962_v36  ;;  %v4553_v17 = vld [vmem:[#allocation5 + $0x2cc] sm:$0xf] }
 0x1ca   :  { %6423 = vst [vmem:[#allocation52_spill] sm:$0xff] %v5188_v10  ;;  %2048 = vmatmul.bf16.gmra.mxu3 %v4870_v24  ;;  %v2302_v59 = vadd.f32 %v2301_v33, %v5218_v38  ;;  %v4036_v10 = vld [vmem:[#allocation5 + $0x2f8] sm:$0xf0] }
 0x1cb   :  { %6424 = vst [vmem:[#allocation53_spill] sm:$0xff] %v5191_v32  ;;  %v4557_v32 = vld [vmem:[#allocation5 + $0x2ec] sm:$0xf] }
 0x1cc   :  { %6425 = vst [vmem:[#allocation54_spill] sm:$0xff] %v5194_v6  ;;  %v1804_v63 = vpop.f32.mrf.mxu2  ;;  %v4621_v6 = vld [vmem:[#allocation5 + $0x4ec] sm:$0xf] }
 0x1cd   :  { %6426 = vst [vmem:[#allocation55_spill] sm:$0xff] %v5197_v21  ;;  %v1853_v25 = vpop.f32.mrf.mxu3  ;;  %v1708_v61 = vpop.f32.mrf.mxu0  ;;  %v4525_v21 = vld [vmem:[#allocation5 + $0x1ec] sm:$0xf] }
 0x1ce   :  { %6427 = vst [vmem:[#allocation56_spill] sm:$0xff] %v5200_v14  ;;  %v5222_v12 = vadd.f32 %v1853_v25, %v1804_v63  ;;  %v1709_v37 = vadd.f32 %v1708_v61, %v5067_v62  ;;  %v1757_v45 = vpop.f32.mrf.mxu1  ;;  %v6433_v63 = vld [vmem:[#allocation19_spill] sm:$0xff]  ;;  %v4164_v14 = vld [vmem:[#allocation5 + $0x3f8] sm:$0xf0] }
 0x1cf   :  { %6428 = vst [vmem:[#allocation57_spill] sm:$0xff] %v5202_v26  ;;  %v4589_v26 = vld [vmem:[#allocation5 + $0x3ec] sm:$0xf] }
 0x1d0   :  { %6429 = vst [vmem:[#allocation58_spill] sm:$0xff] %v5204_v41  ;;  %v5225_v44 = vadd.f32 %v1757_v45, %v1709_v37 }
 0x1d1   :  { %6430 = vst [vmem:[#allocation59_spill] sm:$0xff] %v5206_v16  ;;  %v6432_v16 = vld [vmem:[#allocation21_spill] sm:$0xff] }
 0x1d2   :  { %v2303_v19 = vadd.f32 %v2302_v59, %v5225_v44 }
 0x1d4   :  { %v1806_v22 = vpop.f32.mrf.mxu2 }
 0x1d5   :  { %v1855_v28 = vpop.f32.mrf.mxu3  ;;  %v1711_v30 = vpop.f32.mrf.mxu0 }
 0x1d6   :  { %v5228_v23 = vadd.f32 %v1855_v28, %v1806_v22  ;;  %v1712_v24 = vadd.f32 %v1711_v30, %v5077_v18  ;;  %v1760_v56 = vpop.f32.mrf.mxu1 }
 0x1d8   :  { %v5231_v33 = vadd.f32 %v1760_v56, %v1712_v24  ;;  %1906 = vmatmul.bf16.gmra.mxu0 %v6432_v16  ;;  %1955 = vmatmul.bf16.gmra.mxu1 %v4888_v52 }
 0x1d9   :  { %2004 = vmatmul.bf16.gmra.mxu2 %v4972_v35 }
 0x1da   :  { %v2304_v62 = vadd.f32 %v2303_v19, %v5231_v33  ;;  %2053 = vmatmul.bf16.gmra.mxu3 %v6433_v63 }
 0x1dc   :  { %v1809_v59 = vpop.f32.mrf.mxu2 }
 0x1dd   :  { %v1858_v25 = vpop.f32.mrf.mxu3  ;;  %v1713_v61 = vpop.f32.mrf.mxu0 }
 0x1de   :  { %v5238_v37 = vadd.f32 %v1858_v25, %v1809_v59  ;;  %v1714_v18 = vadd.f32 %v1713_v61, %v5083_v7  ;;  %v1762_v45 = vpop.f32.mrf.mxu1  ;;  %v4167_v59 = vor.u32 %v4589_v26, %v4164_v14  ;;  %v3908_v25 = vld [vmem:[#allocation5 + $0x1f8] sm:$0xf0]  ;;  %v4521_v14 = vld [vmem:[#allocation5 + $0x1cc] sm:$0xf] }
 0x1df   :  { %v4292_v7 = vld [vmem:[#allocation5 + $0x4f8] sm:$0xf0] }
 0x1e0   :  { %v5241_v22 = vadd.f32 %v1762_v45, %v1714_v18  ;;  %v6434_v18 = vld [vmem:[#allocation24_spill] sm:$0xff]  ;;  %v4295_v45 = vor.u32 %v4621_v6, %v4292_v7  ;;  %2182 = vmatpush.bf16.msra.mxu2 %v4167_v59  ;;  %v4617_v6 = vld [vmem:[#allocation5 + $0x4cc] sm:$0xf] }
 0x1e2   :  { %v2305_v28 = vadd.f32 %v2304_v62, %v5241_v22  ;;  %v3911_v62 = vor.u32 %v4525_v21, %v3908_v25  ;;  %2231 = vmatpush.bf16.msra.mxu3 %v4295_v45  ;;  %v3892_v21 = vld [vmem:[#allocation5 + $0x1d8] sm:$0xf0]  ;;  %v4613_v45 = vld [vmem:[#allocation5 + $0x4ac] sm:$0xf] }
 0x1e3   :  { %v3895_v25 = vor.u32 %v4521_v14, %v3892_v21  ;;  %v4549_v21 = vld [vmem:[#allocation5 + $0x2ac] sm:$0xf] }
 0x1e4   :  { %v1811_v30 = vpop.f32.mrf.mxu2  ;;  %2084 = vmatpush.bf16.msra.mxu0 %v3911_v62 }
 0x1e5   :  { %v1860_v24 = vpop.f32.mrf.mxu3  ;;  %v1716_v56 = vpop.f32.mrf.mxu0 }
 0x1e6   :  { %v5244_v41 = vadd.f32 %v1860_v24, %v1811_v30  ;;  %v1717_v19 = vadd.f32 %v1716_v56, %v5093_v29  ;;  %v1765_v63 = vpop.f32.mrf.mxu1  ;;  %v4585_v30 = vld [vmem:[#allocation5 + $0x3cc] sm:$0xf]  ;;  %v4039_v29 = vor.u32 %v4557_v32, %v4036_v10  ;;  %v4148_v24 = vld [vmem:[#allocation5 + $0x3d8] sm:$0xf0]  ;;  %v4023_v10 = vor.u32 %v4553_v17, %v4020_v42 }
 0x1e7   :  { %v6435_v56 = vld [vmem:[#allocation22_spill] sm:$0xff]  ;;  %v4132_v32 = vld [vmem:[#allocation5 + $0x3b8] sm:$0xf0] }
 0x1e8   :  { %v5247_v61 = vadd.f32 %v1765_v63, %v1717_v19  ;;  %1911 = vmatmul.bf16.gmra.mxu0 %v6434_v18  ;;  %1960 = vmatmul.bf16.gmra.mxu1 %v4900_v15  ;;  %v4151_v19 = vor.u32 %v4585_v30, %v4148_v24  ;;  %v4276_v63 = vld [vmem:[#allocation5 + $0x4d8] sm:$0xf0]  ;;  %v4135_v62 = vor.u32 %v4581_v46, %v4132_v32  ;;  %v4609_v46 = vld [vmem:[#allocation5 + $0x48c] sm:$0xf] }
 0x1e9   :  { %2009 = vmatmul.bf16.gmra.mxu2 %v4982_v39  ;;  %2133 = vmatpush.bf16.msra.mxu1 %v4039_v29  ;;  %v4279_v7 = vor.u32 %v4617_v6, %v4276_v63  ;;  %v4260_v30 = vld [vmem:[#allocation5 + $0x4b8] sm:$0xf0]  ;;  %v3879_v29 = vor.u32 %v4517_v40, %v3876_v48  ;;  %v4577_v63 = vld [vmem:[#allocation5 + $0x38c] sm:$0xf] }
 0x1ea   :  { %v2306_v26 = vadd.f32 %v2305_v28, %v5247_v61  ;;  %2058 = vmatmul.bf16.gmra.mxu3 %v6435_v56  ;;  %2183 = vmatpush.bf16.msra.mxu2 %v4151_v19  ;;  %v4263_v14 = vor.u32 %v4613_v45, %v4260_v30  ;;  %v4004_v6 = vld [vmem:[#allocation5 + $0x2b8] sm:$0xf0]  ;;  %v4545_v39 = vld [vmem:[#allocation5 + $0x28c] sm:$0xf] }
 0x1eb   :  { %2085 = vmatpush.bf16.msra.mxu0 %v3895_v25  ;;  %2232 = vmatpush.bf16.msra.mxu3 %v4279_v7  ;;  %v4007_v17 = vor.u32 %v4549_v21, %v4004_v6  ;;  %v3860_v19 = vld [vmem:[#allocation5 + $0x198] sm:$0xf0]  ;;  %v4119_v25 = vor.u32 %v4577_v63, %v4116_v0  ;;  %v4605_v6 = vld [vmem:[#allocation5 + $0x46c] sm:$0xf] }
 0x1ec   :  { %v1814_v59 = vpop.f32.mrf.mxu2  ;;  %v4244_v32 = vld [vmem:[#allocation5 + $0x498] sm:$0xf0]  ;;  %v3863_v48 = vor.u32 %v4513_v55, %v3860_v19 }
 0x1ed   :  { %v1863_v28 = vpop.f32.mrf.mxu3  ;;  %v1718_v4 = vpop.f32.mrf.mxu0  ;;  %2134 = vmatpush.bf16.msra.mxu1 %v4023_v10  ;;  %v3988_v7 = vld [vmem:[#allocation5 + $0x298] sm:$0xf0]  ;;  %v4247_v40 = vor.u32 %v4609_v46, %v4244_v32  ;;  %v4509_v10 = vld [vmem:[#allocation5 + $0x16c] sm:$0xf] }
 0x1ee   :  { %v5254_v24 = vadd.f32 %v1863_v28, %v1814_v59  ;;  %v1767_v56 = vpop.f32.mrf.mxu1  ;;  %v1719_v42 = vadd.f32 %v1718_v4, %v5099_v20  ;;  %2184 = vmatpush.bf16.msra.mxu2 %v4135_v62  ;;  %v4573_v20 = vld [vmem:[#allocation5 + $0x36c] sm:$0xf]  ;;  %v4100_v4 = vld [vmem:[#allocation5 + $0x378] sm:$0xf0]  ;;  %v3991_v45 = vor.u32 %v4545_v39, %v3988_v7 }
 0x1ef   :  { %2086 = vmatpush.bf16.msra.mxu0 %v3879_v29  ;;  %2233 = vmatpush.bf16.msra.mxu3 %v4263_v14  ;;  %v3844_v21 = vld [vmem:[#allocation5 + $0x178] sm:$0xf0]  ;;  %v4541_v62 = vld [vmem:[#allocation5 + $0x26c] sm:$0xf] }
 0x1f0   :  { %v5257_v59 = vadd.f32 %v1767_v56, %v1719_v42  ;;  %v4228_v15 = vld [vmem:[#allocation5 + $0x478] sm:$0xf0]  ;;  %v3847_v63 = vor.u32 %v4509_v10, %v3844_v21  ;;  %v4569_v39 = vld [vmem:[#allocation5 + $0x34c] sm:$0xf] }
 0x1f1   :  { %2135 = vmatpush.bf16.msra.mxu1 %v4007_v17  ;;  %v3972_v0 = vld [vmem:[#allocation5 + $0x278] sm:$0xf0]  ;;  %v4231_v17 = vor.u32 %v4605_v6, %v4228_v15  ;;  %v4505_v46 = vld [vmem:[#allocation5 + $0x14c] sm:$0xf] }
 0x1f2   :  { %v2307_v28 = vadd.f32 %v2306_v26, %v5257_v59  ;;  %2185 = vmatpush.bf16.msra.mxu2 %v4119_v25  ;;  %v4103_v26 = vor.u32 %v4573_v20, %v4100_v4  ;;  %v4084_v19 = vld [vmem:[#allocation5 + $0x358] sm:$0xf0]  ;;  %v3975_v18 = vor.u32 %v4541_v62, %v3972_v0  ;;  %v4501_v6 = vld [vmem:[#allocation5 + $0x12c] sm:$0xf] }
 0x1f3   :  { %2087 = vmatpush.bf16.msra.mxu0 %v3863_v48  ;;  %2234 = vmatpush.bf16.msra.mxu3 %v4247_v40  ;;  %v6436_v7 = vld [vmem:[#allocation28_spill] sm:$0xff]  ;;  %v6437_v40 = vld [vmem:[#allocation26_spill] sm:$0xff]  ;;  %v4087_v20 = vor.u32 %v4569_v39, %v4084_v19 }
 0x1f4   :  { %v1816_v30 = vpop.f32.mrf.mxu2  ;;  %v3828_v25 = vld [vmem:[#allocation5 + $0x158] sm:$0xf0] }
 0x1f5   :  { %v1865_v56 = vpop.f32.mrf.mxu3  ;;  %v1721_v42 = vpop.f32.mrf.mxu0  ;;  %2136 = vmatpush.bf16.msra.mxu1 %v3991_v45  ;;  %v3956_v48 = vld [vmem:[#allocation5 + $0x258] sm:$0xf0]  ;;  %v3831_v4 = vor.u32 %v4505_v46, %v3828_v25  ;;  %v4565_v45 = vld [vmem:[#allocation5 + $0x32c] sm:$0xf] }
 0x1f6   :  { %v5260_v29 = vadd.f32 %v1865_v56, %v1816_v30  ;;  %v1722_v55 = vadd.f32 %v1721_v42, %v5109_v34  ;;  %v1770_v14 = vpop.f32.mrf.mxu1  ;;  %v4601_v30 = vld [vmem:[#allocation5 + $0x44c] sm:$0xf]  ;;  %v4212_v56 = vld [vmem:[#allocation5 + $0x458] sm:$0xf0]  ;;  %2186 = vmatpush.bf16.msra.mxu2 %v4103_v26 }
 0x1f7   :  { %v4537_v34 = vld [vmem:[#allocation5 + $0x24c] sm:$0xf]  ;;  %2088 = vmatpush.bf16.msra.mxu0 %v3847_v63  ;;  %2235 = vmatpush.bf16.msra.mxu3 %v4231_v17  ;;  %v4215_v10 = vor.u32 %v4601_v30, %v4212_v56  ;;  %v4068_v21 = vld [vmem:[#allocation5 + $0x338] sm:$0xf0] }
 0x1f8   :  { %v5263_v32 = vadd.f32 %v1770_v14, %v1722_v55  ;;  %1916 = vmatmul.bf16.gmra.mxu0 %v6436_v7  ;;  %1965 = vmatmul.bf16.gmra.mxu1 %v4912_v43  ;;  %v3959_v62 = vor.u32 %v4537_v34, %v3956_v48  ;;  %v3812_v0 = vld [vmem:[#allocation5 + $0x138] sm:$0xf0]  ;;  %v4597_v55 = vld [vmem:[#allocation5 + $0x42c] sm:$0xf]  ;;  %v4071_v63 = vor.u32 %v4565_v45, %v4068_v21 }
 0x1f9   :  { %2014 = vmatmul.bf16.gmra.mxu2 %v4992_v2  ;;  %2137 = vmatpush.bf16.msra.mxu1 %v3975_v18  ;;  %v4196_v14 = vld [vmem:[#allocation5 + $0x438] sm:$0xf0]  ;;  %v4533_v17 = vld [vmem:[#allocation5 + $0x22c] sm:$0xf]  ;;  %v3815_v46 = vor.u32 %v4501_v6, %v3812_v0 }
 0x1fa   :  { %v2308_v15 = vadd.f32 %v2307_v28, %v5263_v32  ;;  %2063 = vmatmul.bf16.gmra.mxu3 %v6437_v40  ;;  %2187 = vmatpush.bf16.msra.mxu2 %v4087_v20  ;;  %v3940_v19 = vld [vmem:[#allocation5 + $0x238] sm:$0xf0]  ;;  %v4199_v25 = vor.u32 %v4597_v55, %v4196_v14  ;;  %v4561_v45 = vld [vmem:[#allocation5 + $0x30c] sm:$0xf] }
 0x1fb   :  { %2089 = vmatpush.bf16.msra.mxu0 %v3831_v4  ;;  %2236 = vmatpush.bf16.msra.mxu3 %v4215_v10  ;;  %v3943_v30 = vor.u32 %v4533_v17, %v3940_v19  ;;  %v6438_v4 = vld [vmem:[#allocation32_spill] sm:$0xff]  ;;  %v6439_v10 = vld [vmem:[#allocation30_spill] sm:$0xff] }
 0x1fc   :  { %v1819_v42 = vpop.f32.mrf.mxu2  ;;  %v4052_v21 = vld [vmem:[#allocation5 + $0x318] sm:$0xf0]  ;;  %v4497_v6 = vld [vmem:[#allocation5 + $0x10c] sm:$0xf] }
 0x1fd   :  { %v1868_v2 = vpop.f32.mrf.mxu3  ;;  %v1723_v43 = vpop.f32.mrf.mxu0  ;;  %2138 = vmatpush.bf16.msra.mxu1 %v3959_v62  ;;  %v3796_v62 = vld [vmem:[#allocation5 + $0x118] sm:$0xf0]  ;;  %v4593_v0 = vld [vmem:[#allocation5 + $0x40c] sm:$0xf] }
 0x1fe   :  { %v5270_v28 = vadd.f32 %v1868_v2, %v1819_v42  ;;  %v1724_v26 = vadd.f32 %v1723_v43, %v5115_v53  ;;  %v1772_v39 = vpop.f32.mrf.mxu1  ;;  %2188 = vmatpush.bf16.msra.mxu2 %v4071_v63  ;;  %v4055_v42 = vor.u32 %v4561_v45, %v4052_v21  ;;  %v3799_v14 = vor.u32 %v4497_v6, %v3796_v62  ;;  %v6440_v6 = vld [vmem:[#allocation35_spill] sm:$0xff] }
 0x1ff   :  { %2090 = vmatpush.bf16.msra.mxu0 %v3815_v46  ;;  %2237 = vmatpush.bf16.msra.mxu3 %v4199_v25  ;;  %v4529_v25 = vld [vmem:[#allocation5 + $0x20c] sm:$0xf] }
 0x200   :  { %v5273_v18 = vadd.f32 %v1772_v39, %v1724_v26 }
 0x201   :  { %2139 = vmatpush.bf16.msra.mxu1 %v3943_v30  ;;  %v3924_v30 = vld [vmem:[#allocation5 + $0x218] sm:$0xf0] }
 0x202   :  { %v2309_v56 = vadd.f32 %v2308_v15, %v5273_v18  ;;  %2189 = vmatpush.bf16.msra.mxu2 %v4055_v42  ;;  %v6441_v42 = vld [vmem:[#allocation42_spill] sm:$0xff] }
 0x203   :  { %2091 = vmatpush.bf16.msra.mxu0 %v3799_v14 }
 0x204   :  { %v1821_v2 = vpop.f32.mrf.mxu2 }
 0x205   :  { %v1870_v43 = vpop.f32.mrf.mxu3  ;;  %v1726_v53 = vpop.f32.mrf.mxu0 }
 0x206   :  { %v5276_v34 = vadd.f32 %v1870_v43, %v1821_v2  ;;  %v1727_v48 = vadd.f32 %v1726_v53, %v5125_v3  ;;  %v1775_v40 = vpop.f32.mrf.mxu1  ;;  %v4180_v3 = vld [vmem:[#allocation5 + $0x418] sm:$0xf0] }
 0x207   :  { %v4183_v26 = vor.u32 %v4593_v0, %v4180_v3  ;;  %v6442_v0 = vld [vmem:[#allocation33_spill] sm:$0xff] }
 0x208   :  { %v5279_v20 = vadd.f32 %v1775_v40, %v1727_v48  ;;  %1921 = vmatmul.bf16.gmra.mxu0 %v6438_v4  ;;  %1970 = vmatmul.bf16.gmra.mxu1 %v4924_v11 }
 0x209   :  { %2019 = vmatmul.bf16.gmra.mxu2 %v5002_v51  ;;  %2238 = vmatpush.bf16.msra.mxu3 %v4183_v26  ;;  %v6443_v26 = vld [vmem:[#allocation44_spill] sm:$0xff] }
 0x20a   :  { %v2310_v15 = vadd.f32 %v2309_v56, %v5279_v20  ;;  %2068 = vmatmul.bf16.gmra.mxu3 %v6439_v10  ;;  %v3927_v56 = vor.u32 %v4529_v25, %v3924_v30 }
 0x20c   :  { %v1824_v55 = vpop.f32.mrf.mxu2  ;;  %2140 = vmatpush.bf16.msra.mxu1 %v3927_v56 }
 0x20d   :  { %v1873_v39 = vpop.f32.mrf.mxu3  ;;  %v1728_v63 = vpop.f32.mrf.mxu0 }
 0x20e   :  { %v5286_v17 = vadd.f32 %v1873_v39, %v1824_v55  ;;  %v1729_v19 = vadd.f32 %v1728_v63, %v5131_v49  ;;  %v1777_v46 = vpop.f32.mrf.mxu1 }
 0x210   :  { %v5289_v2 = vadd.f32 %v1777_v46, %v1729_v19 }
 0x212   :  { %v2311_v43 = vadd.f32 %v2310_v15, %v5289_v2 }
 0x214   :  { %v1826_v53 = vpop.f32.mrf.mxu2 }
 0x215   :  { %v1875_v48 = vpop.f32.mrf.mxu3  ;;  %v1731_v40 = vpop.f32.mrf.mxu0 }
 0x216   :  { %v5292_v10 = vadd.f32 %v1875_v48, %v1826_v53  ;;  %v1732_v45 = vadd.f32 %v1731_v40, %v5139_v13  ;;  %v1780_v21 = vpop.f32.mrf.mxu1  ;;  %v6445_v40 = vld [vmem:[#allocation38_spill] sm:$0xff] }
 0x218   :  { %v5295_v49 = vadd.f32 %v1780_v21, %v1732_v45  ;;  %1926 = vmatmul.bf16.gmra.mxu0 %v6440_v6  ;;  %1975 = vmatmul.bf16.gmra.mxu1 %v4936_v47  ;;  %v6446_v45 = vld [vmem:[#allocation39_spill] sm:$0xff] }
 0x219   :  { %2024 = vmatmul.bf16.gmra.mxu2 %v6441_v42  ;;  %v6447_v21 = vld [vmem:[#allocation43_spill] sm:$0xff] }
 0x21a   :  { %v2312_v62 = vadd.f32 %v2311_v43, %v5295_v49  ;;  %2073 = vmatmul.bf16.gmra.mxu3 %v6442_v0  ;;  %v6449_v42 = vld [vmem:[#allocation15_spill] sm:$0xff] }
 0x21c   :  { %v1829_v15 = vpop.f32.mrf.mxu2 }
 0x21d   :  { %v1878_v3 = vpop.f32.mrf.mxu3  ;;  %v1733_v55 = vpop.f32.mrf.mxu0 }
 0x21e   :  { %v5302_v14 = vadd.f32 %v1878_v3, %v1829_v15  ;;  %v1734_v13 = vadd.f32 %v1733_v55, %v6443_v26  ;;  %v1782_v39 = vpop.f32.mrf.mxu1  ;;  %v6448_v15 = vld [vmem:[#allocation36_spill] sm:$0xff] }
 0x220   :  { %v1783_v63 = vadd.f32 %v1782_v39, %v1734_v13 }
 0x222   :  { %v2313_v19 = vadd.f32 %v2312_v62, %v1783_v63 }
 0x224   :  { %v1831_v46 = vpop.f32.mrf.mxu2 }
 0x225   :  { %v1880_v25 = vpop.f32.mrf.mxu3  ;;  %v1736_v30 = vpop.f32.mrf.mxu0 }
 0x226   :  { %v5305_v56 = vadd.f32 %v1880_v25, %v1831_v46  ;;  %v1737_v53 = vadd.f32 %v1736_v30, %v5149_v1  ;;  %v1785_v43 = vpop.f32.mrf.mxu1 }
 0x228   :  { %6444 = vst [vmem:[#allocation18_spill] sm:$0xff] %v5305_v56  ;;  %v1786_v48 = vadd.f32 %v1785_v43, %v1737_v53  ;;  %1931 = vmatmul.bf16.gmra.mxu0 %v6445_v40  ;;  %1980 = vmatmul.bf16.gmra.mxu1 %v6446_v45 }
 0x229   :  { %2029 = vmatmul.bf16.gmra.mxu2 %v6447_v21 }
 0x22a   :  { %v2314_v0 = vadd.f32 %v2313_v19, %v1786_v48  ;;  %2078 = vmatmul.bf16.gmra.mxu3 %v6448_v15 }
 0x22c   :  { %v1834_v3 = vpop.f32.mrf.mxu2 }
 0x22d   :  { %v1883_v62 = vpop.f32.mrf.mxu3  ;;  %v1738_v55 = vpop.f32.mrf.mxu0 }
 0x22e   :  { %v5312_v26 = vadd.f32 %v1883_v62, %v1834_v3  ;;  %v1739_v13 = vadd.f32 %v1738_v55, %v5152_v54  ;;  %v1787_v39 = vpop.f32.mrf.mxu1 }
 0x230   :  { %v1788_v1 = vadd.f32 %v1787_v39, %v1739_v13 }
 0x232   :  { %v2315_v46 = vadd.f32 %v2314_v0, %v1788_v1 }
 0x234   :  { %v2316_v25 = vrot.slane %v2315_v46, 4  ;;  %v1836_v30 = vpop.f32.mrf.mxu2 }
 0x235   :  { %v1885_v53 = vpop.f32.mrf.mxu3  ;;  %v1897_v43 = vpop.f32.mrf.mxu0 }
 0x236   :  { %v2317_v45 = vadd.f32 %v2316_v25, %v2315_v46  ;;  %v5315_v40 = vadd.f32 %v1885_v53, %v1836_v30  ;;  %v1898_v19 = vadd.f32 %v1897_v43, %v5160_v5  ;;  %v1946_v15 = vpop.f32.mrf.mxu1 }
 0x238   :  { %v2318_v21 = vrot.slane %v2317_v45, 2  ;;  %v1947_v56 = vadd.f32 %v1946_v15, %v1898_v19  ;;  %2092 = vmatmul.bf16.vlgmr.msra.gmra.mxu0 %v6449_v42  ;;  %2141 = vmatmul.bf16.vlgmr.msra.gmra.mxu1 %v6414_v31  ;;  %v6461_v19 = vld [vmem:[#allocation17_spill] sm:$0xff] }
 0x239   :  { %2190 = vmatmul.bf16.vlgmr.msra.gmra.mxu2 %v4864_v57 }
 0x23a   :  { %v2319_v54 = vadd.f32 %v2318_v21, %v2317_v45  ;;  %2239 = vmatmul.bf16.vlgmr.msra.gmra.mxu3 %v4954_v58 }
 0x23c   :  { %v2320_v0 = vrot.slane %v2319_v54, 1  ;;  %v1995_v3 = vpop.f32.mrf.mxu2 }
 0x23d   :  { %v5322_v62 = vadd.f32 %v1995_v3, %v1947_v56  ;;  %v5324_v55 = vpop.f32.mrf.mxu3  ;;  %v1899_v13 = vpop.f32.mrf.mxu0 }
 0x23e   :  { %v2321_v5 = vadd.f32 %v2320_v0, %v2319_v54  ;;  %v1900_v39 = vadd.f32 %v1899_v13, %v5210_v60  ;;  %v1948_v46 = vpop.f32.mrf.mxu1 }
 0x240   :  { %v2365_v25 = vmul.f32 0.0078125, %v2321_v5  ;;  %v1949_v42 = vadd.f32 %v1948_v46, %v1900_v39 }
 0x242   :  { %v5328_v31 = vsub.f32 %v5154_v8, %v2365_v25  ;;  %v5331_v57 = vsub.f32 %v5208_v9, %v2365_v25  ;;  %v5334_v58 = vsub.f32 %v5218_v38, %v2365_v25  ;;  %v5337_v56 = vsub.f32 %v5225_v44, %v2365_v25 }
 0x243   :  { %v5340_v45 = vsub.f32 %v5231_v33, %v2365_v25  ;;  %v5343_v60 = vsub.f32 %v5241_v22, %v2365_v25  ;;  %v5346_v21 = vsub.f32 %v5247_v61, %v2365_v25  ;;  %v5349_v8 = vsub.f32 %v5257_v59, %v2365_v25 }
 0x244   :  { %6450 = vst [vmem:[#allocation21_spill] sm:$0xff] %v5328_v31  ;;  %v5352_v9 = vsub.f32 %v5263_v32, %v2365_v25  ;;  %v5355_v38 = vsub.f32 %v5273_v18, %v2365_v25  ;;  %v5358_v44 = vsub.f32 %v5279_v20, %v2365_v25  ;;  %v5361_v33 = vsub.f32 %v5289_v2, %v2365_v25  ;;  %v1997_v22 = vpop.f32.mrf.mxu2 }
 0x245   :  { %6451 = vst [vmem:[#allocation19_spill] sm:$0xff] %v5331_v57  ;;  %v5364_v30 = vsub.f32 %v5295_v49, %v2365_v25  ;;  %v5366_v61 = vsub.f32 %v1783_v63, %v2365_v25  ;;  %v5368_v59 = vsub.f32 %v1786_v48, %v2365_v25  ;;  %v5370_v53 = vsub.f32 %v1788_v1, %v2365_v25  ;;  %v5372_v32 = vpop.f32.mrf.mxu3  ;;  %v1902_v18 = vpop.f32.mrf.mxu0 }
 0x246   :  { %6452 = vst [vmem:[#allocation22_spill] sm:$0xff] %v5334_v58  ;;  %v1951_v43 = vpop.f32.mrf.mxu1  ;;  %v5376_v20 = vadd.f32 %v1997_v22, %v1949_v42  ;;  %v1903_v2 = vadd.f32 %v1902_v18, %v5222_v12  ;;  %v6462_v22 = vld [vmem:[#allocation20_spill] sm:$0xff] }
 0x247   :  { %6453 = vst [vmem:[#allocation28_spill] sm:$0xff] %v5352_v9 }
 0x248   :  { %6454 = vst [vmem:[#allocation26_spill] sm:$0xff] %v5355_v38  ;;  %2097 = vmatmul.bf16.gmra.mxu0 %v6461_v19  ;;  %2146 = vmatmul.bf16.gmra.mxu1 %v6431_v50  ;;  %v2322_v49 = vadd.f32 %v5376_v20, %v5322_v62  ;;  %v1952_v63 = vadd.f32 %v1951_v43, %v1903_v2 }
 0x249   :  { %6455 = vst [vmem:[#allocation32_spill] sm:$0xff] %v5358_v44  ;;  %2195 = vmatmul.bf16.gmra.mxu2 %v4876_v27  ;;  %v4654_v44 = vld [vmem:[#allocation7 + $0xf0] sm:$0xff] }
 0x24a   :  { %6456 = vst [vmem:[#allocation30_spill] sm:$0xff] %v5361_v33  ;;  %2244 = vmatmul.bf16.gmra.mxu3 %v4962_v36 }
 0x24b   :  { %6457 = vst [vmem:[#allocation35_spill] sm:$0xff] %v5364_v30 }
 0x24c   :  { %6458 = vst [vmem:[#allocation33_spill] sm:$0xff] %v5366_v61  ;;  %v2000_v48 = vpop.f32.mrf.mxu2 }
 0x24d   :  { %6459 = vst [vmem:[#allocation44_spill] sm:$0xff] %v5368_v59  ;;  %v5383_v1 = vpop.f32.mrf.mxu3  ;;  %v1904_v15 = vpop.f32.mrf.mxu0  ;;  %v5385_v54 = vadd.f32 %v2000_v48, %v1952_v63 }
 0x24e   :  { %6460 = vst [vmem:[#allocation36_spill] sm:$0xff] %v5370_v53  ;;  %v1905_v50 = vadd.f32 %v1904_v15, %v5228_v23  ;;  %v1953_v0 = vpop.f32.mrf.mxu1 }
 0x24f   :  { %v2323_v3 = vadd.f32 %v2322_v49, %v5385_v54 }
 0x250   :  { %v1954_v12 = vadd.f32 %v1953_v0, %v1905_v50 }
 0x254   :  { %v2002_v13 = vpop.f32.mrf.mxu2 }
 0x255   :  { %v5389_v27 = vadd.f32 %v2002_v13, %v1954_v12  ;;  %v5391_v36 = vpop.f32.mrf.mxu3  ;;  %v1907_v5 = vpop.f32.mrf.mxu0  ;;  %v6463_v12 = vld [vmem:[#allocation23_spill] sm:$0xff]  ;;  %v6464_v13 = vld [vmem:[#allocation24_spill] sm:$0xff] }
 0x256   :  { %v1908_v39 = vadd.f32 %v1907_v5, %v5238_v37  ;;  %v1956_v46 = vpop.f32.mrf.mxu1  ;;  %v6466_v5 = vld [vmem:[#allocation40_spill] sm:$0xff] }
 0x257   :  { %v2324_v25 = vadd.f32 %v2323_v3, %v5389_v27 }
 0x258   :  { %v1957_v42 = vadd.f32 %v1956_v46, %v1908_v39  ;;  %2102 = vmatmul.bf16.gmra.mxu0 %v6462_v22  ;;  %2151 = vmatmul.bf16.gmra.mxu1 %v6432_v16 }
 0x259   :  { %2200 = vmatmul.bf16.gmra.mxu2 %v4888_v52 }
 0x25a   :  { %2249 = vmatmul.bf16.gmra.mxu3 %v4972_v35 }
 0x25c   :  { %v2005_v23 = vpop.f32.mrf.mxu2 }
 0x25d   :  { %v5399_v18 = vadd.f32 %v2005_v23, %v1957_v42  ;;  %v5401_v43 = vpop.f32.mrf.mxu3  ;;  %v1909_v19 = vpop.f32.mrf.mxu0 }
 0x25e   :  { %v1910_v37 = vadd.f32 %v1909_v19, %v5244_v41  ;;  %v1958_v2 = vpop.f32.mrf.mxu1  ;;  %v6465_v41 = vld [vmem:[#allocation25_spill] sm:$0xff] }
 0x25f   :  { %v2325_v49 = vadd.f32 %v2324_v25, %v5399_v18 }
 0x260   :  { %v1959_v63 = vadd.f32 %v1958_v2, %v1910_v37 }
 0x264   :  { %v2007_v48 = vpop.f32.mrf.mxu2 }
 0x265   :  { %v5405_v15 = vadd.f32 %v2007_v48, %v1959_v63  ;;  %v5407_v16 = vpop.f32.mrf.mxu3  ;;  %v1912_v52 = vpop.f32.mrf.mxu0 }
 0x266   :  { %v1913_v35 = vadd.f32 %v1912_v52, %v5254_v24  ;;  %v1961_v50 = vpop.f32.mrf.mxu1 }
 0x267   :  { %v2326_v0 = vadd.f32 %v2325_v49, %v5405_v15 }
 0x268   :  { %v1962_v3 = vadd.f32 %v1961_v50, %v1913_v35  ;;  %2107 = vmatmul.bf16.gmra.mxu0 %v6463_v12  ;;  %2156 = vmatmul.bf16.gmra.mxu1 %v6464_v13 }
 0x269   :  { %2205 = vmatmul.bf16.gmra.mxu2 %v6465_v41 }
 0x26a   :  { %2254 = vmatmul.bf16.gmra.mxu3 %v6466_v5 }
 0x26c   :  { %v2010_v39 = vpop.f32.mrf.mxu2 }
 0x26d   :  { %v5415_v46 = vadd.f32 %v2010_v39, %v1962_v3  ;;  %v5417_v25 = vpop.f32.mrf.mxu3  ;;  %v1914_v42 = vpop.f32.mrf.mxu0  ;;  %v6467_v3 = vld [vmem:[#allocation27_spill] sm:$0xff] }
 0x26e   :  { %v1915_v24 = vadd.f32 %v1914_v42, %v5260_v29  ;;  %v1963_v22 = vpop.f32.mrf.mxu1  ;;  %v6468_v29 = vld [vmem:[#allocation29_spill] sm:$0xff] }
 0x26f   :  { %v2327_v23 = vadd.f32 %v2326_v0, %v5415_v46  ;;  %v6469_v0 = vld [vmem:[#allocation41_spill] sm:$0xff] }
 0x270   :  { %v1964_v19 = vadd.f32 %v1963_v22, %v1915_v24 }
 0x274   :  { %v2012_v37 = vpop.f32.mrf.mxu2 }
 0x275   :  { %v5421_v2 = vadd.f32 %v2012_v37, %v1964_v19  ;;  %v5423_v49 = vpop.f32.mrf.mxu3  ;;  %v1917_v63 = vpop.f32.mrf.mxu0 }
 0x276   :  { %v1918_v48 = vadd.f32 %v1917_v63, %v5270_v28  ;;  %v1966_v52 = vpop.f32.mrf.mxu1 }
 0x277   :  { %v2328_v35 = vadd.f32 %v2327_v23, %v5421_v2 }
 0x278   :  { %v1967_v50 = vadd.f32 %v1966_v52, %v1918_v48  ;;  %2112 = vmatmul.bf16.gmra.mxu0 %v6467_v3  ;;  %2161 = vmatmul.bf16.gmra.mxu1 %v6436_v7 }
 0x279   :  { %2210 = vmatmul.bf16.gmra.mxu2 %v6468_v29 }
 0x27a   :  { %2259 = vmatmul.bf16.gmra.mxu3 %v6469_v0 }
 0x27c   :  { %v2015_v12 = vpop.f32.mrf.mxu2 }
 0x27d   :  { %v5431_v13 = vadd.f32 %v2015_v12, %v1967_v50  ;;  %v5433_v41 = vpop.f32.mrf.mxu3  ;;  %v1919_v5 = vpop.f32.mrf.mxu0  ;;  %v6470_v50 = vld [vmem:[#allocation31_spill] sm:$0xff] }
 0x27e   :  { %v1968_v39 = vpop.f32.mrf.mxu1  ;;  %v1920_v42 = vadd.f32 %v1919_v5, %v5276_v34 }
 0x27f   :  { %v2329_v28 = vadd.f32 %v2328_v35, %v5431_v13 }
 0x280   :  { %v1969_v24 = vadd.f32 %v1968_v39, %v1920_v42 }
 0x284   :  { %v2017_v22 = vpop.f32.mrf.mxu2 }
 0x285   :  { %v5437_v23 = vadd.f32 %v2017_v22, %v1969_v24  ;;  %v5439_v7 = vpop.f32.mrf.mxu3  ;;  %v1922_v19 = vpop.f32.mrf.mxu0 }
 0x286   :  { %v1923_v37 = vadd.f32 %v1922_v19, %v5286_v17  ;;  %v1971_v63 = vpop.f32.mrf.mxu1  ;;  %v6471_v19 = vld [vmem:[#allocation34_spill] sm:$0xff] }
 0x287   :  { %v2330_v48 = vadd.f32 %v2329_v28, %v5437_v23 }
 0x288   :  { %v1972_v52 = vadd.f32 %v1971_v63, %v1923_v37  ;;  %2117 = vmatmul.bf16.gmra.mxu0 %v6470_v50  ;;  %2166 = vmatmul.bf16.gmra.mxu1 %v6438_v4 }
 0x289   :  { %2215 = vmatmul.bf16.gmra.mxu2 %v4924_v11 }
 0x28a   :  { %2264 = vmatmul.bf16.gmra.mxu3 %v5002_v51 }
 0x28c   :  { %v2020_v34 = vpop.f32.mrf.mxu2 }
 0x28d   :  { %v5447_v35 = vadd.f32 %v2020_v34, %v1972_v52  ;;  %v5449_v3 = vpop.f32.mrf.mxu3  ;;  %v1924_v29 = vpop.f32.mrf.mxu0  ;;  %v6473_v34 = vld [vmem:[#allocation18_spill] sm:$0xff] }
 0x28e   :  { %v1973_v0 = vpop.f32.mrf.mxu1  ;;  %v1925_v12 = vadd.f32 %v1924_v29, %v5292_v10  ;;  %v6472_v10 = vld [vmem:[#allocation42_spill] sm:$0xff] }
 0x28f   :  { %v2331_v17 = vadd.f32 %v2330_v48, %v5447_v35 }
 0x290   :  { %v1974_v5 = vadd.f32 %v1973_v0, %v1925_v12 }
 0x294   :  { %v2022_v39 = vpop.f32.mrf.mxu2 }
 0x295   :  { %v5453_v28 = vadd.f32 %v2022_v39, %v1974_v5  ;;  %v5455_v4 = vpop.f32.mrf.mxu3  ;;  %v1927_v11 = vpop.f32.mrf.mxu0 }
 0x296   :  { %v1928_v51 = vadd.f32 %v1927_v11, %v5302_v14  ;;  %v1976_v42 = vpop.f32.mrf.mxu1 }
 0x297   :  { %v2332_v24 = vadd.f32 %v2331_v17, %v5453_v28 }
 0x298   :  { %v1977_v22 = vadd.f32 %v1976_v42, %v1928_v51  ;;  %2122 = vmatmul.bf16.gmra.mxu0 %v6471_v19  ;;  %2171 = vmatmul.bf16.gmra.mxu1 %v6440_v6  ;;  %v6474_v42 = vld [vmem:[#allocation37_spill] sm:$0xff]  ;;  %v6476_v19 = vld [vmem:[#allocation39_spill] sm:$0xff] }
 0x299   :  { %2220 = vmatmul.bf16.gmra.mxu2 %v4936_v47 }
 0x29a   :  { %2269 = vmatmul.bf16.gmra.mxu3 %v6472_v10 }
 0x29c   :  { %v2025_v37 = vpop.f32.mrf.mxu2 }
 0x29d   :  { %v5463_v63 = vadd.f32 %v2025_v37, %v1977_v22  ;;  %v5465_v48 = vpop.f32.mrf.mxu3  ;;  %v1929_v52 = vpop.f32.mrf.mxu0  ;;  %v6475_v22 = vld [vmem:[#allocation38_spill] sm:$0xff] }
 0x29e   :  { %v1978_v50 = vpop.f32.mrf.mxu1  ;;  %v1930_v29 = vadd.f32 %v1929_v52, %v6473_v34 }
 0x29f   :  { %v2333_v14 = vadd.f32 %v2332_v24, %v5463_v63  ;;  %v6477_v24 = vld [vmem:[#allocation43_spill] sm:$0xff] }
 0x2a0   :  { %v1979_v0 = vadd.f32 %v1978_v50, %v1930_v29 }
 0x2a4   :  { %v2027_v17 = vpop.f32.mrf.mxu2 }
 0x2a5   :  { %v2028_v12 = vadd.f32 %v2027_v17, %v1979_v0  ;;  %v5469_v5 = vpop.f32.mrf.mxu3  ;;  %v1932_v6 = vpop.f32.mrf.mxu0 }
 0x2a6   :  { %v1933_v47 = vadd.f32 %v1932_v6, %v5312_v26  ;;  %v1981_v39 = vpop.f32.mrf.mxu1 }
 0x2a7   :  { %v2334_v11 = vadd.f32 %v2333_v14, %v2028_v12 }
 0x2a8   :  { %v1982_v51 = vadd.f32 %v1981_v39, %v1933_v47  ;;  %2127 = vmatmul.bf16.gmra.mxu0 %v6474_v42  ;;  %2176 = vmatmul.bf16.gmra.mxu1 %v6475_v22 }
 0x2a9   :  { %2225 = vmatmul.bf16.gmra.mxu2 %v6476_v19 }
 0x2aa   :  { %2274 = vmatmul.bf16.gmra.mxu3 %v6477_v24 }
 0x2ac   :  { %v2030_v10 = vpop.f32.mrf.mxu2 }
 0x2ad   :  { %v2031_v37 = vadd.f32 %v2030_v10, %v1982_v51  ;;  %v5476_v52 = vpop.f32.mrf.mxu3  ;;  %v1934_v50 = vpop.f32.mrf.mxu0 }
 0x2ae   :  { %6478 = vst [vmem:[#allocation15_spill] sm:$0xff] %v5476_v52  ;;  %v1983_v34 = vpop.f32.mrf.mxu1  ;;  %v1935_v26 = vadd.f32 %v1934_v50, %v5315_v40 }
 0x2af   :  { %v2335_v29 = vadd.f32 %v2334_v11, %v2031_v37 }
 0x2b0   :  { %v1984_v0 = vadd.f32 %v1983_v34, %v1935_v26 }
 0x2b4   :  { %v2032_v14 = vpop.f32.mrf.mxu2 }
 0x2b5   :  { %v2033_v17 = vadd.f32 %v2032_v14, %v1984_v0  ;;  %v5479_v6 = vpop.f32.mrf.mxu3  ;;  %v2093_v47 = vpop.f32.mrf.mxu0 }
 0x2b6   :  { %6479 = vst [vmem:[#allocation17_spill] sm:$0xff] %v5479_v6  ;;  %v2094_v39 = vadd.f32 %v2093_v47, %v5324_v55  ;;  %v2142_v42 = vpop.f32.mrf.mxu1  ;;  %v4638_v6 = vld [vmem:[#allocation7 + $0x70] sm:$0xff] }
 0x2b7   :  { %v2336_v22 = vadd.f32 %v2335_v29, %v2033_v17 }
 0x2b8   :  { %v2143_v19 = vadd.f32 %v2142_v42, %v2094_v39 }
 0x2b9   :  { %v2337_v24 = vrot.slane %v2336_v22, 4 }
 0x2bb   :  { %v2338_v51 = vadd.f32 %v2337_v24, %v2336_v22 }
 0x2bc   :  { %v2191_v10 = vpop.f32.mrf.mxu2 }
 0x2bd   :  { %v2339_v53 = vrot.slane %v2338_v51, 2  ;;  %v2192_v59 = vadd.f32 %v2191_v10, %v2143_v19  ;;  %v2240_v61 = vpop.f32.mrf.mxu3  ;;  %v2095_v11 = vpop.f32.mrf.mxu0 }
 0x2be   :  { %v2144_v30 = vpop.f32.mrf.mxu1  ;;  %v2096_v26 = vadd.f32 %v2095_v11, %v5372_v32 }
 0x2bf   :  { %v2340_v40 = vadd.f32 %v2339_v53, %v2338_v51  ;;  %v5482_v50 = vadd.f32 %v2240_v61, %v2192_v59 }
 0x2c0   :  { %v2145_v39 = vadd.f32 %v2144_v30, %v2096_v26 }
 0x2c1   :  { %6480 = vst [vmem:[#allocation20_spill] sm:$0xff] %v5482_v50  ;;  %v2341_v34 = vrot.slane %v2340_v40, 1 }
 0x2c3   :  { %v2342_v0 = vadd.f32 %v2341_v34, %v2340_v40 }
 0x2c4   :  { %v2193_v14 = vpop.f32.mrf.mxu2 }
 0x2c5   :  { %v2366_v55 = vmul.f32 0.0078125, %v2342_v0  ;;  %v2242_v47 = vpop.f32.mrf.mxu3  ;;  %v2098_v29 = vpop.f32.mrf.mxu0 }
 0x2c6   :  { %v2147_v42 = vpop.f32.mrf.mxu1  ;;  %v2099_v51 = vadd.f32 %v2098_v29, %v5383_v1 }
 0x2c7   :  { %v5486_v22 = vsub.f32 %v5322_v62, %v2366_v55  ;;  %v5489_v19 = vsub.f32 %v5376_v20, %v2366_v55  ;;  %v5492_v53 = vsub.f32 %v5385_v54, %v2366_v55  ;;  %v5495_v61 = vsub.f32 %v5389_v27, %v2366_v55 }
 0x2c8   :  { %v5498_v59 = vsub.f32 %v5399_v18, %v2366_v55  ;;  %v5501_v32 = vsub.f32 %v5405_v15, %v2366_v55  ;;  %v5504_v30 = vsub.f32 %v5415_v46, %v2366_v55  ;;  %v5507_v62 = vsub.f32 %v5421_v2, %v2366_v55 }
 0x2c9   :  { %6481 = vst [vmem:[#allocation23_spill] sm:$0xff] %v5486_v22  ;;  %v5510_v20 = vsub.f32 %v5431_v13, %v2366_v55  ;;  %v5513_v54 = vsub.f32 %v5437_v23, %v2366_v55  ;;  %v5516_v27 = vsub.f32 %v5447_v35, %v2366_v55  ;;  %v5519_v18 = vsub.f32 %v5453_v28, %v2366_v55 }
 0x2ca   :  { %6482 = vst [vmem:[#allocation24_spill] sm:$0xff] %v5489_v19  ;;  %v5522_v15 = vsub.f32 %v5463_v63, %v2366_v55  ;;  %v5524_v46 = vsub.f32 %v2028_v12, %v2366_v55  ;;  %v5526_v24 = vsub.f32 %v2031_v37, %v2366_v55  ;;  %v5528_v2 = vsub.f32 %v2033_v17, %v2366_v55 }
 0x2cb   :  { %6483 = vst [vmem:[#allocation25_spill] sm:$0xff] %v5492_v53  ;;  %v2194_v13 = vadd.f32 %v2193_v14, %v2145_v39  ;;  %v2148_v28 = vadd.f32 %v2147_v42, %v2099_v51 }
 0x2cc   :  { %6484 = vst [vmem:[#allocation40_spill] sm:$0xff] %v5507_v62  ;;  %v2196_v23 = vpop.f32.mrf.mxu2 }
 0x2cd   :  { %6485 = vst [vmem:[#allocation27_spill] sm:$0xff] %v5510_v20  ;;  %v2245_v10 = vpop.f32.mrf.mxu3  ;;  %v2100_v11 = vpop.f32.mrf.mxu0  ;;  %v5531_v40 = vadd.f32 %v2242_v47, %v2194_v13  ;;  %v2197_v34 = vadd.f32 %v2196_v23, %v2148_v28  ;;  %v6498_v20 = vld [vmem:[#allocation16_spill] sm:$0xff] }
 0x2ce   :  { %6486 = vst [vmem:[#allocation29_spill] sm:$0xff] %v5513_v54  ;;  %v2149_v35 = vpop.f32.mrf.mxu1  ;;  %v2101_v63 = vadd.f32 %v2100_v11, %v5391_v36  ;;  %v4630_v54 = vld [vmem:[#allocation7 + $0x30] sm:$0xff]  ;;  %v2432_v9 = vmul.f32 %v6498_v20, %v6498_v20  ;;  %v2442_v20 = vmul.f32 %v5492_v53, %v5492_v53 }
 0x2cf   :  { %6487 = vst [vmem:[#allocation41_spill] sm:$0xff] %v5516_v27  ;;  %v2343_v12 = vadd.f32 %v5531_v40, %v5482_v50  ;;  %v5536_v37 = vadd.f32 %v2245_v10, %v2197_v34  ;;  %v4646_v27 = vld [vmem:[#allocation7 + $0xb0] sm:$0xff] }
 0x2d0   :  { %6488 = vst [vmem:[#allocation31_spill] sm:$0xff] %v5519_v18  ;;  %v2150_v1 = vadd.f32 %v2149_v35, %v2101_v63 }
 0x2d1   :  { %6489 = vst [vmem:[#allocation34_spill] sm:$0xff] %v5522_v15  ;;  %v2344_v17 = vadd.f32 %v2343_v12, %v5536_v37 }
 0x2d2   :  { %6490 = vst [vmem:[#allocation42_spill] sm:$0xff] %v5524_v46 }
 0x2d3   :  { %6491 = vst [vmem:[#allocation18_spill] sm:$0xff] %v5526_v24 }
 0x2d4   :  { %6492 = vst [vmem:[#allocation37_spill] sm:$0xff] %v5528_v2  ;;  %v2198_v26 = vpop.f32.mrf.mxu2  ;;  %v4631_v2 = vld [vmem:[#allocation7 + $0x38] sm:$0xff] }
 0x2d5   :  { %6493 = vst [vmem:[#allocation38_spill] sm:$0xff] %v5531_v40  ;;  %v2247_v0 = vpop.f32.mrf.mxu3  ;;  %v2103_v14 = vpop.f32.mrf.mxu0  ;;  %v2199_v47 = vadd.f32 %v2198_v26, %v2150_v1  ;;  %3141 = vmatpush.bf16.msrb.mxu0 %v4631_v2  ;;  %v2434_v2 = vmul.f32 %v5486_v22, %v5486_v22 }
 0x2d6   :  { %6494 = vst [vmem:[#allocation39_spill] sm:$0xff] %v5536_v37  ;;  %v2152_v55 = vpop.f32.mrf.mxu1  ;;  %v2104_v29 = vadd.f32 %v2103_v14, %v5401_v43 }
 0x2d7   :  { %v5540_v42 = vadd.f32 %v2247_v0, %v2199_v47 }
 0x2d8   :  { %v2153_v39 = vadd.f32 %v2152_v55, %v2104_v29 }
 0x2d9   :  { %6495 = vst [vmem:[#allocation43_spill] sm:$0xff] %v5540_v42  ;;  %v2345_v10 = vadd.f32 %v2344_v17, %v5540_v42  ;;  %v4655_v42 = vld [vmem:[#allocation7 + $0xf8] sm:$0xff]  ;;  %3142 = vmatpush.bf16.msrb.mxu0 %v4630_v54 }
 0x2da   :  { %3288 = vmatpush.bf16.msrb.mxu3 %v4655_v42  ;;  %v2433_v42 = vmul.f32 %v5328_v31, %v5328_v31 }
 0x2dc   :  { %v2201_v13 = vpop.f32.mrf.mxu2 }
 0x2dd   :  { %v2250_v36 = vpop.f32.mrf.mxu3  ;;  %v2202_v51 = vadd.f32 %v2201_v13, %v2153_v39  ;;  %v2105_v23 = vpop.f32.mrf.mxu0 }
 0x2de   :  { %v5542_v11 = vpop.f32.mrf.mxu1  ;;  %3289 = vmatpush.bf16.msrb.mxu3 %v4654_v44 }
 0x2df   :  { %v5545_v28 = vadd.f32 %v2250_v36, %v2202_v51 }
 0x2e1   :  { %6496 = vst [vmem:[#allocation60_spill] sm:$0xff] %v5545_v28  ;;  %v5548_v35 = vadd.f32 %v2345_v10, %v5545_v28  ;;  %v4647_v10 = vld [vmem:[#allocation7 + $0xb8] sm:$0xff] }
 0x2e2   :  { %v4639_v28 = vld [vmem:[#allocation7 + $0x78] sm:$0xff]  ;;  %3239 = vmatpush.bf16.msrb.mxu2 %v4647_v10  ;;  %v2437_v10 = vmul.f32 %v5331_v57, %v5331_v57  ;;  %v2441_v57 = vmul.f32 %v5334_v58, %v5334_v58  ;;  %v2445_v58 = vmul.f32 %v5337_v56, %v5337_v56 }
 0x2e3   :  { %3190 = vmatpush.bf16.msrb.mxu1 %v4639_v28  ;;  %v2438_v28 = vmul.f32 %v5489_v19, %v5489_v19 }
 0x2e4   :  { %v5550_v34 = vpop.f32.mrf.mxu2  ;;  %v2517_v38 = vadd.f32 %v2437_v10, %v2433_v42 }
 0x2e5   :  { %v5552_v43 = vpop.f32.mrf.mxu3  ;;  %v2108_v63 = vpop.f32.mrf.mxu0  ;;  %v2538_v22 = vadd.f32 %v2438_v28, %v2434_v2 }
 0x2e6   :  { %v5554_v12 = vpop.f32.mrf.mxu1  ;;  %3240 = vmatpush.bf16.msrb.mxu2 %v4646_v27  ;;  %v2518_v52 = vadd.f32 %v2517_v38, %v2441_v57  ;;  %v2106_v27 = vadd.f32 %v2105_v23, %v5407_v16  ;;  %v2109_v28 = vadd.f32 %v2108_v63, %v5417_v25  ;;  %v2450_v63 = vmul.f32 %v5498_v59, %v5498_v59 }
 0x2e7   :  { %3191 = vmatpush.bf16.msrb.mxu1 %v4638_v6  ;;  %v2539_v2 = vadd.f32 %v2538_v22, %v2442_v20 }
 0x2e8   :  { %v2519_v6 = vadd.f32 %v2518_v52, %v2445_v58  ;;  %v2155_v57 = vadd.f32 %v5542_v11, %v2106_v27  ;;  %v2158_v25 = vadd.f32 %v5554_v12, %v2109_v28  ;;  %v6502_v58 = vld [vmem:[#allocation47_spill] sm:$0xff]  ;;  %v6503_v28 = vld [vmem:[#allocation48_spill] sm:$0xff] }
 0x2e9   :  { %v2444_v52 = vmul.f32 %v6502_v58, %v6502_v58 }
 0x2ea   :  { %v2204_v16 = vadd.f32 %v5550_v34, %v2155_v57 }
 0x2ec   :  { %v5556_v26 = vpop.f32.mrf.mxu2 }
 0x2ed   :  { %v5558_v0 = vpop.f32.mrf.mxu3  ;;  %v2110_v1 = vpop.f32.mrf.mxu0 }
 0x2ee   :  { %v5560_v14 = vpop.f32.mrf.mxu1  ;;  %v2111_v38 = vadd.f32 %v2110_v1, %v5423_v49 }
 0x2f0   :  { %v2160_v34 = vadd.f32 %v5560_v14, %v2111_v38 }
 0x2f4   :  { %v5562_v17 = vpop.f32.mrf.mxu2 }
 0x2f5   :  { %v5564_v55 = vpop.f32.mrf.mxu3  ;;  %v5566_v29 = vpop.f32.mrf.mxu0 }
 0x2f6   :  { %v5568_v47 = vpop.f32.mrf.mxu1  ;;  %v2114_v23 = vadd.f32 %v5566_v29, %v5433_v41  ;;  %v5643_v41 = vadd.f32 %v5552_v43, %v2204_v16  ;;  %v2209_v29 = vadd.f32 %v5562_v17, %v2160_v34 }
 0x2fc   :  { %v5570_v39 = vpop.f32.mrf.mxu2 }
 0x2fd   :  { %v5572_v13 = vpop.f32.mrf.mxu3  ;;  %v5574_v36 = vpop.f32.mrf.mxu0 }
 0x2fe   :  { %v5576_v51 = vpop.f32.mrf.mxu1  ;;  %v2116_v27 = vadd.f32 %v5574_v36, %v5439_v7  ;;  %v2454_v7 = vmul.f32 %v5501_v32, %v5501_v32 }
 0x300   :  { %v2165_v57 = vadd.f32 %v5576_v51, %v2116_v27 }
 0x304   :  { %v5578_v37 = vpop.f32.mrf.mxu2 }
 0x305   :  { %v5580_v40 = vpop.f32.mrf.mxu3  ;;  %v2118_v50 = vpop.f32.mrf.mxu0 }
 0x306   :  { %v5582_v24 = vpop.f32.mrf.mxu1  ;;  %v2119_v14 = vadd.f32 %v2118_v50, %v5449_v3  ;;  %v2347_v3 = vadd.f32 %v5548_v35, %v5643_v41  ;;  %v5664_v50 = vadd.f32 %v5564_v55, %v2209_v29 }
 0x30c   :  { %v5584_v46 = vpop.f32.mrf.mxu2 }
 0x30d   :  { %v5586_v15 = vpop.f32.mrf.mxu3  ;;  %v5588_v18 = vpop.f32.mrf.mxu0 }
 0x30e   :  { %6497 = vst [vmem:[#allocation61_spill] sm:$0xff] %v5586_v15  ;;  %v5590_v33 = vpop.f32.mrf.mxu1  ;;  %v6499_v15 = vld [vmem:[#allocation45_spill] sm:$0xff]  ;;  %v2121_v17 = vadd.f32 %v5588_v18, %v5455_v4 }
 0x30f   :  { %v2436_v31 = vmul.f32 %v6499_v15, %v6499_v15  ;;  %v6501_v15 = vld [vmem:[#allocation46_spill] sm:$0xff]  ;;  %v6504_v4 = vld [vmem:[#allocation49_spill] sm:$0xff] }
 0x310   :  { %v2440_v54 = vmul.f32 %v6501_v15, %v6501_v15  ;;  %v2452_v18 = vmul.f32 %v6504_v4, %v6504_v4 }
 0x311   :  { %v2496_v44 = vadd.f32 %v2436_v31, %v2432_v9  ;;  %v2449_v31 = vmul.f32 %v5340_v45, %v5340_v45 }
 0x313   :  { %v2497_v53 = vadd.f32 %v2496_v44, %v2440_v54  ;;  %v2520_v49 = vadd.f32 %v2519_v6, %v2449_v31  ;;  %v2453_v44 = vmul.f32 %v5343_v60, %v5343_v60  ;;  %v2448_v54 = vmul.f32 %v6503_v28, %v6503_v28 }
 0x314   :  { %v5606_v62 = vpop.f32.mrf.mxu2 }
 0x315   :  { %v5608_v19 = vpop.f32.mrf.mxu3  ;;  %v2123_v42 = vpop.f32.mrf.mxu0  ;;  %v2498_v12 = vadd.f32 %v2497_v53, %v2444_v52  ;;  %v2521_v53 = vadd.f32 %v2520_v49, %v2453_v44  ;;  %v2458_v52 = vmul.f32 %v5504_v30, %v5504_v30  ;;  %v6507_v44 = vld [vmem:[#allocation40_spill] sm:$0xff] }
 0x316   :  { %6500 = vst [vmem:[#allocation62_spill] sm:$0xff] %v5608_v19  ;;  %v5610_v10 = vpop.f32.mrf.mxu1  ;;  %v2446_v19 = vmul.f32 %v5495_v61, %v5495_v61  ;;  %v2124_v51 = vadd.f32 %v2123_v42, %v5465_v48  ;;  %v2461_v42 = vmul.f32 %v5349_v8, %v5349_v8 }
 0x317   :  { %v2499_v6 = vadd.f32 %v2498_v12, %v2448_v54  ;;  %v6508_v54 = vld [vmem:[#allocation61_spill] sm:$0xff] }
 0x318   :  { %v2540_v9 = vadd.f32 %v2539_v2, %v2446_v19  ;;  %v2207_v19 = vadd.f32 %v5556_v26, %v2158_v25  ;;  %v2163_v26 = vadd.f32 %v5568_v47, %v2114_v23  ;;  %v2457_v47 = vmul.f32 %v5346_v21, %v5346_v21 }
 0x319   :  { %v2500_v48 = vadd.f32 %v2499_v6, %v2452_v18  ;;  %v2173_v12 = vadd.f32 %v5610_v10, %v2124_v51 }
 0x31a   :  { %v2541_v2 = vadd.f32 %v2540_v9, %v2450_v63  ;;  %v5653_v36 = vadd.f32 %v5558_v0, %v2207_v19  ;;  %v2212_v43 = vadd.f32 %v5570_v39, %v2163_v26  ;;  %v2214_v9 = vadd.f32 %v5578_v37, %v2165_v57 }
 0x31b   :  { %v2168_v39 = vadd.f32 %v5582_v24, %v2119_v14  ;;  %v2522_v25 = vadd.f32 %v2521_v53, %v2457_v47  ;;  %v2170_v37 = vadd.f32 %v5590_v33, %v2121_v17  ;;  %v6506_v33 = vld [vmem:[#allocation50_spill] sm:$0xff] }
 0x31c   :  { %v2221_v22 = vpop.f32.mrf.mxu2  ;;  %v2542_v38 = vadd.f32 %v2541_v2, %v2454_v7  ;;  %v2348_v35 = vadd.f32 %v2347_v3, %v5653_v36  ;;  %v5675_v55 = vadd.f32 %v5572_v13, %v2212_v43  ;;  %v5684_v34 = vadd.f32 %v5580_v40, %v2214_v9 }
 0x31d   :  { %v5628_v20 = vpop.f32.mrf.mxu3  ;;  %v2125_v11 = vpop.f32.mrf.mxu0  ;;  %v2217_v23 = vadd.f32 %v5584_v46, %v2168_v39  ;;  %v2219_v13 = vadd.f32 %v5606_v62, %v2170_v37  ;;  %v6505_v46 = vld [vmem:[#allocation15_spill] sm:$0xff]  ;;  %v2462_v2 = vmul.f32 %v6507_v44, %v6507_v44  ;;  %v2222_v40 = vadd.f32 %v2221_v22, %v2173_v12  ;;  %v6509_v62 = vld [vmem:[#allocation28_spill] sm:$0xff]  ;;  %v6510_v17 = vld [vmem:[#allocation62_spill] sm:$0xff] }
 0x31e   :  { %v2174_v1 = vpop.f32.mrf.mxu1  ;;  %v2126_v24 = vadd.f32 %v2125_v11, %v5469_v5  ;;  %v2543_v49 = vadd.f32 %v2542_v38, %v2458_v52  ;;  %v2349_v63 = vadd.f32 %v2348_v35, %v5664_v50  ;;  %v2456_v5 = vmul.f32 %v6506_v33, %v6506_v33  ;;  %v6511_v39 = vld [vmem:[#allocation51_spill] sm:$0xff]  ;;  %v6513_v35 = vld [vmem:[#allocation17_spill] sm:$0xff] }
 0x31f   :  { %v2523_v11 = vadd.f32 %v2522_v25, %v2461_v42  ;;  %v5695_v26 = vadd.f32 %v6508_v54, %v2217_v23  ;;  %v2465_v10 = vmul.f32 %v6509_v62, %v6509_v62  ;;  %v5701_v47 = vadd.f32 %v6510_v17, %v2219_v13  ;;  %v6517_v54 = vld [vmem:[#allocation32_spill] sm:$0xff]  ;;  %v6519_v17 = vld [vmem:[#allocation41_spill] sm:$0xff] }
 0x320   :  { %v2350_v29 = vadd.f32 %v2349_v63, %v5675_v55  ;;  %v2175_v14 = vadd.f32 %v2174_v1, %v2126_v24  ;;  %v2501_v53 = vadd.f32 %v2500_v48, %v2456_v5  ;;  %v2544_v7 = vadd.f32 %v2543_v49, %v2462_v2  ;;  %v6512_v1 = vld [vmem:[#allocation27_spill] sm:$0xff]  ;;  %v6514_v24 = vld [vmem:[#allocation26_spill] sm:$0xff]  ;;  %v6515_v63 = vld [vmem:[#allocation52_spill] sm:$0xff] }
 0x321   :  { %v2460_v51 = vmul.f32 %v6511_v39, %v6511_v39  ;;  %v2524_v22 = vadd.f32 %v2523_v11, %v2465_v10  ;;  %v5709_v25 = vadd.f32 %v5628_v20, %v2222_v40  ;;  %v2473_v40 = vmul.f32 %v6517_v54, %v6517_v54  ;;  %v6518_v10 = vld [vmem:[#allocation53_spill] sm:$0xff] }
 0x322   :  { %v2351_v57 = vadd.f32 %v2350_v29, %v5684_v34 }
 0x323   :  { %v2502_v37 = vadd.f32 %v2501_v53, %v2460_v51  ;;  %v6520_v51 = vld [vmem:[#allocation30_spill] sm:$0xff] }
 0x324   :  { %v2223_v0 = vpop.f32.mrf.mxu2  ;;  %v2352_v18 = vadd.f32 %v2351_v57, %v5695_v26 }
 0x325   :  { %v2272_v31 = vpop.f32.mrf.mxu3  ;;  %v2128_v16 = vpop.f32.mrf.mxu0  ;;  %v2224_v38 = vadd.f32 %v2223_v0, %v2175_v14  ;;  %v2469_v0 = vmul.f32 %v6514_v24, %v6514_v24 }
 0x326   :  { %v2177_v19 = vpop.f32.mrf.mxu1  ;;  %v2129_v27 = vadd.f32 %v2128_v16, %v6505_v46  ;;  %v2466_v16 = vmul.f32 %v6512_v1, %v6512_v1  ;;  %v2353_v42 = vadd.f32 %v2352_v18, %v5701_v47  ;;  %v6516_v46 = vld [vmem:[#allocation29_spill] sm:$0xff] }
 0x327   :  { %v5715_v49 = vadd.f32 %v2272_v31, %v2224_v38  ;;  %v2525_v13 = vadd.f32 %v2524_v22, %v2469_v0  ;;  %v2470_v20 = vmul.f32 %v6516_v46, %v6516_v46  ;;  %v2474_v38 = vmul.f32 %v6519_v17, %v6519_v17 }
 0x328   :  { %v2178_v3 = vadd.f32 %v2177_v19, %v2129_v27  ;;  %v2545_v48 = vadd.f32 %v2544_v7, %v2466_v16  ;;  %v2464_v19 = vmul.f32 %v6515_v63, %v6515_v63  ;;  %v2354_v27 = vadd.f32 %v2353_v42, %v5709_v25 }
 0x329   :  { %v2468_v7 = vmul.f32 %v6518_v10, %v6518_v10  ;;  %v2526_v57 = vadd.f32 %v2525_v13, %v2473_v40  ;;  %v2477_v22 = vmul.f32 %v6520_v51, %v6520_v51 }
 0x32a   :  { %v2503_v2 = vadd.f32 %v2502_v37, %v2464_v19  ;;  %v2546_v31 = vadd.f32 %v2545_v48, %v2470_v20  ;;  %v2355_v14 = vadd.f32 %v2354_v27, %v5715_v49  ;;  %v6522_v37 = vld [vmem:[#allocation31_spill] sm:$0xff] }
 0x32b   :  { %v2478_v0 = vmul.f32 %v6522_v37, %v6522_v37  ;;  %v6523_v19 = vld [vmem:[#allocation35_spill] sm:$0xff] }
 0x32c   :  { %v2226_v6 = vpop.f32.mrf.mxu2  ;;  %v2547_v16 = vadd.f32 %v2546_v31, %v2474_v38  ;;  %v2481_v13 = vmul.f32 %v6523_v19, %v6523_v19  ;;  %v6524_v27 = vld [vmem:[#allocation55_spill] sm:$0xff]  ;;  %v6527_v38 = vld [vmem:[#allocation56_spill] sm:$0xff] }
 0x32d   :  { %v2275_v43 = vpop.f32.mrf.mxu3  ;;  %v2130_v9 = vpop.f32.mrf.mxu0  ;;  %v2227_v52 = vadd.f32 %v2226_v6, %v2178_v3 }
 0x32e   :  { %v2131_v23 = vadd.f32 %v2130_v9, %v6513_v35  ;;  %v2179_v12 = vpop.f32.mrf.mxu1  ;;  %v2504_v9 = vadd.f32 %v2503_v2, %v2468_v7 }
 0x32f   :  { %v5722_v5 = vadd.f32 %v2275_v43, %v2227_v52  ;;  %v6521_v52 = vld [vmem:[#allocation54_spill] sm:$0xff] }
 0x330   :  { %v2180_v11 = vadd.f32 %v2179_v12, %v2131_v23  ;;  %v2472_v35 = vmul.f32 %v6521_v52, %v6521_v52  ;;  %v2527_v23 = vadd.f32 %v2526_v57, %v2477_v22  ;;  %v2548_v12 = vadd.f32 %v2547_v16, %v2478_v0  ;;  %v6528_v22 = vld [vmem:[#allocation42_spill] sm:$0xff] }
 0x331   :  { %v2356_v43 = vadd.f32 %v2355_v14, %v5722_v5  ;;  %v2486_v16 = vmul.f32 %v6528_v22, %v6528_v22 }
 0x332   :  { %v2505_v42 = vadd.f32 %v2504_v9, %v2472_v35  ;;  %v2528_v2 = vadd.f32 %v2527_v23, %v2481_v13  ;;  %v6529_v23 = vld [vmem:[#allocation44_spill] sm:$0xff] }
 0x333   :  { %v2489_v0 = vmul.f32 %v6529_v23, %v6529_v23 }
 0x334   :  { %v2228_v29 = vpop.f32.mrf.mxu2 }
 0x335   :  { %v2229_v53 = vadd.f32 %v2228_v29, %v2180_v11  ;;  %v2277_v6 = vpop.f32.mrf.mxu3  ;;  %v2476_v11 = vmul.f32 %v6524_v27, %v6524_v27  ;;  %v6525_v29 = vld [vmem:[#allocation34_spill] sm:$0xff] }
 0x336   :  { %v2482_v40 = vmul.f32 %v6525_v29, %v6525_v29 }
 0x337   :  { %v5732_v3 = vadd.f32 %v2277_v6, %v2229_v53  ;;  %v2506_v14 = vadd.f32 %v2505_v42, %v2476_v11  ;;  %v6526_v53 = vld [vmem:[#allocation33_spill] sm:$0xff] }
 0x338   :  { %v2485_v7 = vmul.f32 %v6526_v53, %v6526_v53  ;;  %v2549_v6 = vadd.f32 %v2548_v12, %v2482_v40  ;;  %v6530_v42 = vld [vmem:[#allocation57_spill] sm:$0xff]  ;;  %v6531_v12 = vld [vmem:[#allocation18_spill] sm:$0xff]  ;;  %v6540_v53 = vld [vmem:[#allocation43_spill] sm:$0xff] }
 0x339   :  { %v2357_v18 = vadd.f32 %v2356_v43, %v5732_v3  ;;  %v2480_v43 = vmul.f32 %v6527_v38, %v6527_v38  ;;  %v2484_v11 = vmul.f32 %v6530_v42, %v6530_v42 }
 0x33a   :  { %v2529_v9 = vadd.f32 %v2528_v2, %v2485_v7 }
 0x33b   :  { %v2358_v48 = vrot.slane %v2357_v18, 4  ;;  %v2507_v35 = vadd.f32 %v2506_v14, %v2480_v43  ;;  %v6533_v14 = vld [vmem:[#allocation20_spill] sm:$0xff] }
 0x33c   :  { %v2530_v29 = vadd.f32 %v2529_v9, %v2489_v0  ;;  %v6535_v9 = vld [vmem:[#allocation39_spill] sm:$0xff] }
 0x33d   :  { %v2359_v20 = vadd.f32 %v2358_v48, %v2357_v18  ;;  %v2550_v48 = vadd.f32 %v2549_v6, %v2486_v16  ;;  %v2508_v2 = vadd.f32 %v2507_v35, %v2484_v11  ;;  %v6534_v6 = vld [vmem:[#allocation38_spill] sm:$0xff]  ;;  %v6537_v35 = vld [vmem:[#allocation60_spill] sm:$0xff]  ;;  %v6538_v11 = vld [vmem:[#allocation37_spill] sm:$0xff] }
 0x33f   :  { %v2360_v31 = vrot.slane %v2359_v20, 2 }
 0x341   :  { %v2361_v57 = vadd.f32 %v2360_v31, %v2359_v20  ;;  %v2490_v20 = vmul.f32 %v6531_v12, %v6531_v12  ;;  %v6532_v31 = vld [vmem:[#allocation36_spill] sm:$0xff] }
 0x342   :  { %v2493_v7 = vmul.f32 %v6532_v31, %v6532_v31  ;;  %v6539_v31 = vld [vmem:[#allocation59_spill] sm:$0xff] }
 0x343   :  { %v2362_v18 = vrot.slane %v2361_v57, 1  ;;  %v2551_v22 = vadd.f32 %v2550_v48, %v2490_v20  ;;  %v2494_v20 = vmul.f32 %v6538_v11, %v6538_v11  ;;  %v2492_v23 = vmul.f32 %v6539_v31, %v6539_v31 }
 0x344   :  { %v2531_v48 = vadd.f32 %v2530_v29, %v2493_v7 }
 0x345   :  { %v2363_v13 = vadd.f32 %v2362_v18, %v2361_v57  ;;  %v6536_v18 = vld [vmem:[#allocation58_spill] sm:$0xff]  ;;  %v2552_v12 = vadd.f32 %v2551_v22, %v2494_v20 }
 0x346   :  { %v2488_v0 = vmul.f32 %v6536_v18, %v6536_v18  ;;  %v2532_v18 = vrot.slane %v2531_v48, 4 }
 0x347   :  { %v5759_v40 = vmul.f32 0.0078125, %v2363_v13  ;;  %v2553_v7 = vrot.slane %v2552_v12, 4 }
 0x349   :  { %v5765_v43 = vsub.f32 %v6533_v14, %v5759_v40  ;;  %v5769_v57 = vsub.f32 %v6534_v6, %v5759_v40  ;;  %v5773_v16 = vsub.f32 %v6535_v9, %v5759_v40  ;;  %v5779_v13 = vsub.f32 %v6537_v35, %v5759_v40 }
 0x34a   :  { %v2509_v14 = vadd.f32 %v2508_v2, %v2488_v0  ;;  %v5791_v35 = vsub.f32 %v6540_v53, %v5759_v40  ;;  %v2533_v0 = vadd.f32 %v2532_v18, %v2531_v48  ;;  %v5797_v20 = vsub.f32 %v5643_v41, %v5759_v40 }
 0x34b   :  { %v2435_v6 = vmul.f32 %v5765_v43, %v5765_v43  ;;  %v2439_v9 = vmul.f32 %v5769_v57, %v5769_v57  ;;  %v2443_v2 = vmul.f32 %v5773_v16, %v5773_v16  ;;  %v2554_v42 = vadd.f32 %v2553_v7, %v2552_v12 }
 0x34c   :  { %v2510_v29 = vadd.f32 %v2509_v14, %v2492_v23  ;;  %v2447_v11 = vmul.f32 %v5791_v35, %v5791_v35  ;;  %v5803_v53 = vsub.f32 %v5653_v36, %v5759_v40  ;;  %v2451_v23 = vmul.f32 %v5779_v13, %v5779_v13 }
 0x34d   :  { %v2559_v22 = vadd.f32 %v2439_v9, %v2435_v6  ;;  %v2534_v6 = vrot.slane %v2533_v0, 2  ;;  %v5809_v18 = vsub.f32 %v5664_v50, %v5759_v40  ;;  %v2455_v41 = vmul.f32 %v5797_v20, %v5797_v20 }
 0x34e   :  { %v2511_v19 = vrot.slane %v2510_v29, 4  ;;  %v5815_v12 = vsub.f32 %v5675_v55, %v5759_v40  ;;  %v2459_v36 = vmul.f32 %v5803_v53, %v5803_v53 }
 0x34f   :  { %v2560_v31 = vadd.f32 %v2559_v22, %v2443_v2  ;;  %v2555_v2 = vrot.slane %v2554_v42, 2  ;;  %v2463_v50 = vmul.f32 %v5809_v18, %v5809_v18 }
 0x350   :  { %v2512_v9 = vadd.f32 %v2511_v19, %v2510_v29  ;;  %v5827_v29 = vsub.f32 %v5695_v26, %v5759_v40  ;;  %v2467_v55 = vmul.f32 %v5815_v12, %v5815_v12 }
 0x351   :  { %v2561_v14 = vadd.f32 %v2560_v31, %v2447_v11  ;;  %v2535_v31 = vadd.f32 %v2534_v6, %v2533_v0  ;;  %v5821_v11 = vsub.f32 %v5684_v34, %v5759_v40  ;;  %v2556_v19 = vadd.f32 %v2555_v2, %v2554_v42 }
 0x352   :  { %6541 = vst [vmem:[#allocation46_spill] sm:$0xff] %v5827_v29  ;;  %v5833_v0 = vsub.f32 %v5701_v47, %v5759_v40  ;;  %v5839_v42 = vsub.f32 %v5709_v25, %v5759_v40  ;;  %v2475_v26 = vmul.f32 %v5827_v29, %v5827_v29 }
 0x353   :  { %v2562_v48 = vadd.f32 %v2561_v14, %v2451_v23  ;;  %v2513_v23 = vrot.slane %v2512_v9, 2  ;;  %v2471_v34 = vmul.f32 %v5821_v11, %v5821_v11 }
 0x354   :  { %6542 = vst [vmem:[#allocation47_spill] sm:$0xff] %v5833_v0  ;;  %v2479_v47 = vmul.f32 %v5833_v0, %v5833_v0  ;;  %v2483_v25 = vmul.f32 %v5839_v42, %v5839_v42 }
 0x355   :  { %v2563_v7 = vadd.f32 %v2562_v48, %v2455_v41  ;;  %v2536_v41 = vrot.slane %v2535_v31, 1  ;;  %v2514_v48 = vadd.f32 %v2513_v23, %v2512_v9  ;;  %6543 = vst [vmem:[#allocation48_spill] sm:$0xff] %v5839_v42  ;;  %v5851_v23 = vsub.f32 %v5722_v5, %v5759_v40  ;;  %v4637_v42 = vld [vmem:[#allocation7 + $0x68] sm:$0xff] }
 0x356   :  { %3192 = vmatpush.bf16.msrb.mxu1 %v4637_v42  ;;  %v4627_v42 = vld [vmem:[#allocation7 + $0x18] sm:$0xff] }
 0x357   :  { %v2564_v22 = vadd.f32 %v2563_v7, %v2459_v36  ;;  %v2557_v36 = vrot.slane %v2556_v19, 1  ;;  %v2537_v7 = vadd.f32 %v2536_v41, %v2535_v31  ;;  %6545 = vst [vmem:[#allocation15_spill] sm:$0xff] %v5851_v23  ;;  %v5857_v31 = vsub.f32 %v5732_v3, %v5759_v40  ;;  %v4629_v3 = vld [vmem:[#allocation7 + $0x28] sm:$0xff] }
 0x358   :  { %3143 = vmatpush.bf16.msrb.mxu0 %v4629_v3  ;;  %v4642_v3 = vld [vmem:[#allocation7 + $0x90] sm:$0xff] }
 0x359   :  { %v2565_v14 = vadd.f32 %v2564_v22, %v2463_v50  ;;  %v5845_v50 = vsub.f32 %v5715_v49, %v5759_v40  ;;  %v2558_v9 = vadd.f32 %v2557_v36, %v2556_v19  ;;  %v2491_v19 = vmul.f32 %v5851_v23, %v5851_v23 }
 0x35b   :  { %v2566_v6 = vadd.f32 %v2565_v14, %v2467_v55  ;;  %6544 = vst [vmem:[#allocation49_spill] sm:$0xff] %v5845_v50  ;;  %v2515_v55 = vrot.slane %v2514_v48, 1  ;;  %v2487_v49 = vmul.f32 %v5845_v50, %v5845_v50  ;;  %v4624_v50 = vld [vmem:[#allocation7] sm:$0xff] }
 0x35d   :  { %v2567_v2 = vadd.f32 %v2566_v6, %v2471_v34  ;;  %v2581_v34 = vmul.f32 0.0078125, %v2537_v7  ;;  %v2516_v6 = vadd.f32 %v2515_v55, %v2514_v48  ;;  %v4644_v55 = vld [vmem:[#allocation7 + $0xa0] sm:$0xff] }
 0x35f   :  { %v2568_v22 = vadd.f32 %v2567_v2, %v2475_v26  ;;  %v2582_v26 = vmul.f32 0.0078125, %v2558_v9  ;;  %v5863_v36 = vadd.f32 1e-05, %v2581_v34  ;;  %v2495_v2 = vmul.f32 %v5857_v31, %v5857_v31  ;;  %v4652_v9 = vld [vmem:[#allocation7 + $0xe0] sm:$0xff] }
 0x360   :  { %v2580_v40 = vmul.f32 0.0078125, %v2516_v6 }
 0x361   :  { %v2569_v14 = vadd.f32 %v2568_v22, %v2479_v47  ;;  %v4645_v47 = vld [vmem:[#allocation7 + $0xa8] sm:$0xff]  ;;  %v5867_v38 = vadd.f32 1e-05, %v2582_v26  ;;  %4670 = vrsqrt.f32 %v5863_v36  ;;  %v4643_v26 = vld [vmem:[#allocation7 + $0x98] sm:$0xff]  ;;  %vm2604_vm1 = vweird.f32 %v5863_v36 }
 0x362   :  { %v4653_v22 = vld [vmem:[#allocation7 + $0xe8] sm:$0xff]  ;;  %3241 = vmatpush.bf16.msrb.mxu2 %v4645_v47  ;;  %v5870_v34 = vadd.f32 1e-05, %v2580_v40  ;;  %v4650_v40 = vld [vmem:[#allocation7 + $0xd0] sm:$0xff] }
 0x363   :  { %v2570_v41 = vadd.f32 %v2569_v14, %v2483_v25  ;;  %3290 = vmatpush.bf16.msrb.mxu3 %v4653_v22  ;;  %v4628_v14 = vld [vmem:[#allocation7 + $0x20] sm:$0xff]  ;;  %4672 = vrsqrt.f32 %v5867_v38  ;;  %vm2614_vm4 = vweird.f32 %v5867_v38 }
 0x364   :  { %3144 = vmatpush.bf16.msrb.mxu0 %v4628_v14  ;;  %4674 = vrsqrt.f32 %v5870_v34  ;;  %v4641_v14 = vld [vmem:[#allocation7 + $0x88] sm:$0xff]  ;;  %vm2594_vm10 = vweird.f32 %v5870_v34 }
 0x365   :  { %v2571_v5 = vadd.f32 %v2570_v41, %v2487_v49  ;;  %v4636_v49 = vld [vmem:[#allocation7 + $0x60] sm:$0xff] }
 0x366   :  { %3242 = vmatpush.bf16.msrb.mxu2 %v4644_v55  ;;  %3193 = vmatpush.bf16.msrb.mxu1 %v4636_v49  ;;  %v4634_v55 = vld [vmem:[#allocation7 + $0x50] sm:$0xff]  ;;  %v4649_v49 = vld [vmem:[#allocation7 + $0xc8] sm:$0xff] }
 0x367   :  { %v2572_v7 = vadd.f32 %v2571_v5, %v2491_v19  ;;  %3291 = vmatpush.bf16.msrb.mxu3 %v4652_v9  ;;  %v4651_v19 = vld [vmem:[#allocation7 + $0xd8] sm:$0xff] }
 0x368   :  { %v4635_v5 = vld [vmem:[#allocation7 + $0x58] sm:$0xff]  ;;  %3145 = vmatpush.bf16.msrb.mxu0 %v4627_v42 }
 0x369   :  { %v2573_v25 = vadd.f32 %v2572_v7, %v2495_v2  ;;  %v5874_v2 = vpop.eup %4670 }
 0x36a   :  { %3243 = vmatpush.bf16.msrb.mxu2 %v4643_v26  ;;  %3194 = vmatpush.bf16.msrb.mxu1 %v4635_v5  ;;  %v5876_v47 = vpop.eup %4672  ;;  %v4625_v26 = vld [vmem:[#allocation7 + $0x8] sm:$0xff]  ;;  %vm2605_vm0 = vweird.f32 %v5874_v2 }
 0x36b   :  { %v2574_v48 = vrot.slane %v2573_v25, 4  ;;  %3292 = vmatpush.bf16.msrb.mxu3 %v4651_v19  ;;  %v4633_v19 = vld [vmem:[#allocation7 + $0x48] sm:$0xff]  ;;  %vm2615_vm2 = vweird.f32 %v5876_v47  ;;  %vm2606_vm3 = vmor %vm2604_vm1, %vm2605_vm0 }
 0x36c   :  { %vm2616_vm7 = vmor %vm2614_vm4, %vm2615_vm2 }
 0x36d   :  { %v2575_v41 = vadd.f32 %v2574_v48, %v2573_v25  ;;  %v4626_v25 = vld [vmem:[#allocation7 + $0x10] sm:$0xff]  ;;  %v2599_v48 = vmul.f32 %v5874_v2, %v5863_v36 }
 0x36e   :  { %3244 = vmatpush.bf16.msrb.mxu2 %v4642_v3  ;;  %3146 = vmatpush.bf16.msrb.mxu0 %v4626_v25  ;;  %v4648_v3 = vld [vmem:[#allocation7 + $0xc0] sm:$0xff] }
 0x36f   :  { %v2576_v6 = vrot.slane %v2575_v41, 2  ;;  %3293 = vmatpush.bf16.msrb.mxu3 %v4650_v40  ;;  %3195 = vmatpush.bf16.msrb.mxu1 %v4634_v55  ;;  %v2600_v5 = vmul.f32 %v5874_v2, %v2599_v48  ;;  %v4632_v25 = vld [vmem:[#allocation7 + $0x40] sm:$0xff] }
 0x371   :  { %v2577_v7 = vadd.f32 %v2576_v6, %v2575_v41  ;;  %v5880_v41 = vpop.eup %4674  ;;  %v2609_v6 = vmul.f32 %v5876_v47, %v5867_v38  ;;  %v2601_v55 = vmul.f32 0.5, %v2600_v5 }
 0x372   :  { %v2589_v23 = vmul.f32 %v5880_v41, %v5870_v34  ;;  %3245 = vmatpush.bf16.msrb.mxu2 %v4641_v14  ;;  %3147 = vmatpush.bf16.msrb.mxu0 %v4625_v26  ;;  %vm2595_vm6 = vweird.f32 %v5880_v41 }
 0x373   :  { %v2578_v22 = vrot.slane %v2577_v7, 1  ;;  %3294 = vmatpush.bf16.msrb.mxu3 %v4649_v49  ;;  %v2610_v40 = vmul.f32 %v5876_v47, %v2609_v6  ;;  %3196 = vmatpush.bf16.msrb.mxu1 %v4633_v19  ;;  %vm2596_vm13 = vmor %vm2594_vm10, %vm2595_vm6 }
 0x375   :  { %v2579_v9 = vadd.f32 %v2578_v22, %v2577_v7  ;;  %v4640_v22 = vld [vmem:[#allocation7 + $0x80] sm:$0xff]  ;;  %v2611_v48 = vmul.f32 0.5, %v2610_v40 }
 0x376   :  { %3246 = vmatpush.bf16.msrb.mxu2 %v4640_v22  ;;  %3148 = vmatpush.bf16.msrb.mxu0 %v4624_v50 }
 0x377   :  { %v2583_v42 = vmul.f32 0.0078125, %v2579_v9  ;;  %v2590_v9 = vmul.f32 %v5880_v41, %v2589_v23  ;;  %3295 = vmatpush.bf16.msrb.mxu3 %v4648_v3  ;;  %3197 = vmatpush.bf16.msrb.mxu1 %v4632_v25  ;;  %v2612_v0 = vsub.f32 1.5, %v2611_v48 }
 0x379   :  { %v2587_v7 = vadd.f32 1e-05, %v2583_v42  ;;  %v2602_v42 = vsub.f32 1.5, %v2601_v55  ;;  %v2591_v49 = vmul.f32 0.5, %v2590_v9  ;;  %v2613_v23 = vmul.f32 %v5876_v47, %v2612_v0 }
 0x37a   :  { %v79_v55 = vld [vmem:[#allocation8] ss:$4 sm:$0xf] }
 0x37b   :  { %4676 = vrsqrt.f32 %v2587_v7  ;;  %v2603_v6 = vmul.f32 %v5874_v2, %v2602_v42  ;;  %v2592_v19 = vsub.f32 1.5, %v2591_v49  ;;  %v2617_v3 = vsel %vm2616_vm7, %v5876_v47, %v2613_v23  ;;  %v81_v42 = vld [vmem:[#allocation8 + $0x1] ss:$4 sm:$0xf] }
 0x37c   :  { %vm2624_vm8 = vweird.f32 %v2587_v7  ;;  %v2633_v38 = vrot.slane %v2617_v3, 6  ;;  %v5913_v23 = vperm.slane %v81_v42, 2  ;;  %v6548_v3 = vld [vmem:[#allocation21_spill] sm:$0xff] }
 0x37d   :  { %v2607_v50 = vsel %vm2606_vm3, %v5874_v2, %v2603_v6  ;;  %v5903_v6 = vperm.slane %v81_v42, 1 }
 0x37e   :  { %v2632_v0 = vrot.slane %v2607_v50, 7 }
 0x381   :  { %v4677_v14 = vpop.eup %4676 }
 0x382   :  { %v2619_v29 = vmul.f32 %v4677_v14, %v2587_v7  ;;  %vm2625_vm5 = vweird.f32 %v4677_v14  ;;  %v5901_v7 = vperm.slane %v81_v42, 0 }
 0x383   :  { %vm2626_vm9 = vmor %vm2624_vm8, %vm2625_vm5 }
 0x384   :  { %v2620_v26 = vmul.f32 %v4677_v14, %v2619_v29  ;;  %v2593_v29 = vmul.f32 %v5880_v41, %v2592_v19 }
 0x386   :  { %v2621_v5 = vmul.f32 0.5, %v2620_v26  ;;  %v2597_v25 = vsel %vm2596_vm13, %v5880_v41, %v2593_v29  ;;  %v5915_v41 = vperm.slane %v81_v42, 3 }
 0x387   :  { %v2636_v9 = vsel %vm2635_vm11, %v2597_v25, %v2632_v0  ;;  %v6549_v0 = vld [vmem:[#allocation19_spill] sm:$0xff]  ;;  %v6551_v25 = vld [vmem:[#allocation24_spill] sm:$0xff] }
 0x388   :  { %v2622_v22 = vsub.f32 1.5, %v2621_v5  ;;  %v6546_v5 = vld [vmem:[#allocation16_spill] sm:$0xff] }
 0x38a   :  { %v2623_v36 = vmul.f32 %v4677_v14, %v2622_v22  ;;  %v6547_v22 = vld [vmem:[#allocation45_spill] sm:$0xff] }
 0x38c   :  { %v2627_v40 = vsel %vm2626_vm9, %v4677_v14, %v2623_v36 }
 0x38d   :  { %v2634_v2 = vrot.slane %v2627_v40, 5 }
 0x38f   :  { %v2638_v48 = vsel %vm2637_vm12, %v2633_v38, %v2634_v2  ;;  %v6550_v38 = vld [vmem:[#allocation23_spill] sm:$0xff] }
 0x390   :  { %v2640_v47 = vsel %vm2639_vm14, %v2636_v9, %v2638_v48 }
 0x391   :  { %v2642_v49 = vmul.f32 %v2640_v47, %v79_v55 }
 0x393   :  { %v5905_v34 = vperm.slane %v2642_v49, 0  ;;  %v5907_v14 = vperm.slane %v2642_v49, 1  ;;  %v5909_v26 = vperm.slane %v2642_v49, 2  ;;  %v5911_v19 = vperm.slane %v2642_v49, 3 }
 0x395   :  { %v2652_v50 = vmul.f32 %v5905_v34, %v6546_v5  ;;  %v2656_v29 = vmul.f32 %v5905_v34, %v6547_v22  ;;  %v2653_v36 = vmul.f32 %v5907_v14, %v6548_v3  ;;  %v2657_v40 = vmul.f32 %v5907_v14, %v6549_v0 }
 0x396   :  { %v2654_v2 = vmul.f32 %v5909_v26, %v6550_v38  ;;  %v2658_v55 = vmul.f32 %v5909_v26, %v6551_v25  ;;  %v2655_v9 = vmul.f32 %v5911_v19, %v5765_v43  ;;  %v2659_v49 = vmul.f32 %v5911_v19, %v5769_v57 }
 0x397   :  { %v2725_v48 = vadd.f32 %v5901_v7, %v2652_v50  ;;  %v2729_v42 = vadd.f32 %v5901_v7, %v2656_v29  ;;  %v2726_v47 = vadd.f32 %v5903_v6, %v2653_v36  ;;  %v2730_v5 = vadd.f32 %v5903_v6, %v2657_v40 }
 0x398   :  { %v2727_v22 = vadd.f32 %v5913_v23, %v2654_v2  ;;  %v2731_v3 = vadd.f32 %v5913_v23, %v2658_v55  ;;  %v2728_v0 = vadd.f32 %v5915_v41, %v2655_v9  ;;  %v2732_v50 = vadd.f32 %v5915_v41, %v2659_v49  ;;  %v6552_v9 = vld [vmem:[#allocation22_spill] sm:$0xff] }
 0x399   :  { %v2789_v38 = vmax.f32 %v2725_v48, 0.0  ;;  %v2793_v25 = vmax.f32 %v2729_v42, 0.0  ;;  %v2790_v43 = vmax.f32 %v2726_v47, 0.0  ;;  %v2794_v37 = vmax.f32 %v2730_v5, 0.0 }
 0x39a   :  { %v2791_v29 = vmax.f32 %v2727_v22, 0.0  ;;  %v2795_v17 = vmax.f32 %v2731_v3, 0.0  ;;  %v2792_v36 = vmax.f32 %v2728_v0, 0.0  ;;  %v2796_v54 = vmax.f32 %v2732_v50, 0.0  ;;  %v6553_v22 = vld [vmem:[#allocation25_spill] sm:$0xff] }
 0x39b   :  { %v2853_v51 = vpack.c.bf16 %v2793_v25, %v2789_v38  ;;  %v2660_v57 = vmul.f32 %v5905_v34, %v6501_v15  ;;  %v2664_v40 = vmul.f32 %v5905_v34, %v6502_v58  ;;  %v2854_v2 = vpack.c.bf16 %v2794_v37, %v2790_v43 }
 0x39c   :  { %v2855_v55 = vpack.c.bf16 %v2795_v17, %v2791_v29  ;;  %v2661_v48 = vmul.f32 %v5907_v14, %v6552_v9  ;;  %v2665_v42 = vmul.f32 %v5907_v14, %v5337_v56  ;;  %v2856_v47 = vpack.c.bf16 %v2796_v54, %v2792_v36 }
 0x39d   :  { %3149 = vmatmul.bf16.vlgmr.msrb.gmra.mxu0 %v2853_v51  ;;  %v2733_v49 = vadd.f32 %v5901_v7, %v2660_v57  ;;  %v2737_v5 = vadd.f32 %v5901_v7, %v2664_v40  ;;  %v2662_v15 = vmul.f32 %v5909_v26, %v6553_v22  ;;  %3198 = vmatmul.bf16.vlgmr.msrb.gmra.mxu1 %v2854_v2 }
 0x39e   :  { %3247 = vmatmul.bf16.vlgmr.msrb.gmra.mxu2 %v2855_v55  ;;  %v2734_v58 = vadd.f32 %v5903_v6, %v2661_v48  ;;  %v2738_v17 = vadd.f32 %v5903_v6, %v2665_v42  ;;  %v2666_v37 = vmul.f32 %v5909_v26, %v5495_v61  ;;  %v5959_v56 = vmul.f32 %v5911_v19, %v5857_v31 }
 0x39f   :  { %3296 = vmatmul.bf16.vlgmr.msrb.gmra.mxu3 %v2856_v47  ;;  %v2735_v54 = vadd.f32 %v5913_v23, %v2662_v15  ;;  %v2663_v51 = vmul.f32 %v5911_v19, %v5773_v16  ;;  %v2797_v3 = vmax.f32 %v2733_v49, 0.0  ;;  %v2801_v0 = vmax.f32 %v2737_v5, 0.0 }
 0x3a0   :  { %v2739_v38 = vadd.f32 %v5913_v23, %v2666_v37  ;;  %v2667_v25 = vmul.f32 %v5911_v19, %v5791_v35  ;;  %v2798_v43 = vmax.f32 %v2734_v58, 0.0  ;;  %v2802_v50 = vmax.f32 %v2738_v17, 0.0 }
 0x3a1   :  { %v2736_v61 = vadd.f32 %v5915_v41, %v2663_v51  ;;  %v2668_v31 = vmul.f32 %v5905_v34, %v6503_v28  ;;  %v2799_v29 = vmax.f32 %v2735_v54, 0.0  ;;  %v2672_v16 = vmul.f32 %v5905_v34, %v6504_v4 }
 0x3a2   :  { %v2803_v36 = vmax.f32 %v2739_v38, 0.0  ;;  %v2740_v57 = vadd.f32 %v5915_v41, %v2667_v25  ;;  %v2669_v35 = vmul.f32 %v5907_v14, %v5340_v45  ;;  %v2673_v55 = vmul.f32 %v5907_v14, %v5343_v60 }
 0x3a3   :  { %v2800_v40 = vmax.f32 %v2736_v61, 0.0  ;;  %v2741_v2 = vadd.f32 %v5901_v7, %v2668_v31  ;;  %v2857_v9 = vpack.c.bf16 %v2801_v0, %v2797_v3  ;;  %v2745_v28 = vadd.f32 %v5901_v7, %v2672_v16 }
 0x3a4   :  { %v2804_v48 = vmax.f32 %v2740_v57, 0.0  ;;  %v2670_v42 = vmul.f32 %v5909_v26, %v5498_v59  ;;  %v2742_v49 = vadd.f32 %v5903_v6, %v2669_v35  ;;  %v2746_v4 = vadd.f32 %v5903_v6, %v2673_v55 }
 0x3a5   :  { %v2805_v47 = vmax.f32 %v2741_v2, 0.0  ;;  %v2674_v5 = vmul.f32 %v5909_v26, %v5501_v32  ;;  %v2858_v22 = vpack.c.bf16 %v2802_v50, %v2798_v43  ;;  %v2809_v45 = vmax.f32 %v2745_v28, 0.0 }
 0x3a6   :  { %v2743_v15 = vadd.f32 %v5913_v23, %v2670_v42  ;;  %v2671_v60 = vmul.f32 %v5911_v19, %v5779_v13  ;;  %v2859_v58 = vpack.c.bf16 %v2803_v36, %v2799_v29  ;;  %v2860_v17 = vpack.c.bf16 %v2804_v48, %v2800_v40 }
 0x3a7   :  { %v2747_v37 = vadd.f32 %v5913_v23, %v2674_v5  ;;  %v2675_v59 = vmul.f32 %v5911_v19, %v5797_v20  ;;  %v2806_v54 = vmax.f32 %v2742_v49, 0.0  ;;  %v2810_v51 = vmax.f32 %v2746_v4, 0.0 }
 0x3a8   :  { %v2744_v3 = vadd.f32 %v5915_v41, %v2671_v60  ;;  %v2676_v32 = vmul.f32 %v5905_v34, %v6506_v33  ;;  %v5994_v0 = vpack.c.bf16 %v2809_v45, %v2805_v47  ;;  %v2807_v38 = vmax.f32 %v2743_v15, 0.0 }
 0x3a9   :  { %v2748_v25 = vadd.f32 %v5915_v41, %v2675_v59  ;;  %v2680_v13 = vmul.f32 %v5905_v34, %v6511_v39  ;;  %v2811_v43 = vmax.f32 %v2747_v37, 0.0  ;;  %v2677_v20 = vmul.f32 %v5907_v14, %v5346_v21 }
 0x3aa   :  { %v2749_v50 = vadd.f32 %v5901_v7, %v2676_v32  ;;  %v2681_v61 = vmul.f32 %v5907_v14, %v5349_v8  ;;  %v2808_v31 = vmax.f32 %v2744_v3, 0.0  ;;  %v2678_v36 = vmul.f32 %v5909_v26, %v5504_v30 }
 0x3ab   :  { %v2812_v29 = vmax.f32 %v2748_v25, 0.0  ;;  %v2753_v33 = vadd.f32 %v5901_v7, %v2680_v13  ;;  %v6008_v16 = vadd.f32 %v5903_v6, %v2677_v20  ;;  %v2682_v21 = vmul.f32 %v5909_v26, %v6507_v44 }
 0x3ac   :  { %v2813_v57 = vmax.f32 %v2749_v50, 0.0  ;;  %v6011_v39 = vadd.f32 %v5903_v6, %v2681_v61  ;;  %v6015_v40 = vpack.c.bf16 %v2810_v51, %v2806_v54  ;;  %v6018_v2 = vadd.f32 %v5913_v23, %v2678_v36  ;;  %v6555_v36 = vld [vmem:[#allocation30_spill] sm:$0xff] }
 0x3ad   :  { %3154 = vmatmul.bf16.gmra.mxu0 %v2857_v9  ;;  %v2817_v8 = vmax.f32 %v2753_v33, 0.0  ;;  %v2679_v30 = vmul.f32 %v5911_v19, %v5803_v53  ;;  %3203 = vmatmul.bf16.gmra.mxu1 %v2858_v22  ;;  %v6022_v35 = vpack.c.bf16 %v2811_v43, %v2807_v38  ;;  %v6025_v55 = vadd.f32 %v5913_v23, %v2682_v21 }
 0x3ae   :  { %3252 = vmatmul.bf16.gmra.mxu2 %v2859_v58  ;;  %v2683_v44 = vmul.f32 %v5911_v19, %v5809_v18  ;;  %v6029_v9 = vpack.c.bf16 %v2812_v29, %v2808_v31  ;;  %v2814_v48 = vmax.f32 %v6008_v16, 0.0  ;;  %v2684_v53 = vmul.f32 %v5905_v34, %v6515_v63 }
 0x3af   :  { %3301 = vmatmul.bf16.gmra.mxu3 %v2860_v17  ;;  %v6033_v28 = vadd.f32 %v5915_v41, %v2679_v30  ;;  %v6037_v42 = vpack.c.bf16 %v2817_v8, %v2813_v57  ;;  %v2818_v47 = vmax.f32 %v6011_v39, 0.0  ;;  %v2688_v18 = vmul.f32 %v5905_v34, %v6518_v10  ;;  %v6556_v30 = vld [vmem:[#allocation41_spill] sm:$0xff] }
 0x3b0   :  { %v6041_v49 = vadd.f32 %v5915_v41, %v2683_v44  ;;  %v2815_v4 = vmax.f32 %v6018_v2, 0.0  ;;  %v2757_v5 = vadd.f32 %v5901_v7, %v2684_v53  ;;  %v2685_v22 = vmul.f32 %v5907_v14, %v6509_v62 }
 0x3b1   :  { %v2689_v63 = vmul.f32 %v5907_v14, %v6514_v24  ;;  %v2819_v45 = vmax.f32 %v6025_v55, 0.0  ;;  %v2816_v15 = vmax.f32 %v6033_v28, 0.0  ;;  %v2761_v60 = vadd.f32 %v5901_v7, %v2688_v18 }
 0x3b2   :  { %v2686_v58 = vmul.f32 %v5909_v26, %v6512_v1  ;;  %v2821_v10 = vmax.f32 %v2757_v5, 0.0  ;;  %v2758_v17 = vadd.f32 %v5903_v6, %v2685_v22  ;;  %v2690_v62 = vmul.f32 %v5909_v26, %v6516_v46  ;;  %v6557_v5 = vld [vmem:[#allocation31_spill] sm:$0xff] }
 0x3b3   :  { %v2762_v37 = vadd.f32 %v5903_v6, %v2689_v63  ;;  %v2820_v59 = vmax.f32 %v6041_v49, 0.0  ;;  %v2825_v24 = vmax.f32 %v2761_v60, 0.0  ;;  %v2687_v51 = vmul.f32 %v5911_v19, %v5815_v12 }
 0x3b4   :  { %v2759_v54 = vadd.f32 %v5913_v23, %v2686_v58  ;;  %v2822_v3 = vmax.f32 %v2758_v17, 0.0  ;;  %v2763_v1 = vadd.f32 %v5913_v23, %v2690_v62  ;;  %v2691_v38 = vmul.f32 %v5911_v19, %v5821_v11  ;;  %v6554_v11 = vld [vmem:[#allocation32_spill] sm:$0xff] }
 0x3b5   :  { %v2826_v32 = vmax.f32 %v2762_v37, 0.0  ;;  %v6067_v25 = vpack.c.bf16 %v2825_v24, %v2821_v10  ;;  %v2760_v46 = vadd.f32 %v5915_v41, %v2687_v51  ;;  %v2692_v43 = vmul.f32 %v5905_v34, %v6521_v52  ;;  %v6558_v10 = vld [vmem:[#allocation46_spill] sm:$0xff] }
 0x3b6   :  { %v2823_v13 = vmax.f32 %v2759_v54, 0.0  ;;  %v2827_v20 = vmax.f32 %v2763_v1, 0.0  ;;  %v2764_v12 = vadd.f32 %v5915_v41, %v2691_v38  ;;  %v2696_v61 = vmul.f32 %v5905_v34, %v6524_v27  ;;  %v6559_v54 = vld [vmem:[#allocation47_spill] sm:$0xff]  ;;  %v6560_v38 = vld [vmem:[#allocation56_spill] sm:$0xff] }
 0x3b7   :  { %v6072_v50 = vpack.c.bf16 %v2826_v32, %v2822_v3  ;;  %v2824_v31 = vmax.f32 %v2760_v46, 0.0  ;;  %v2765_v29 = vadd.f32 %v5901_v7, %v2692_v43  ;;  %v2693_v33 = vmul.f32 %v5907_v14, %v6554_v11 }
 0x3b8   :  { %v2697_v57 = vmul.f32 %v5907_v14, %v6555_v36  ;;  %v6082_v21 = vpack.c.bf16 %v2827_v20, %v2823_v13  ;;  %v2828_v52 = vmax.f32 %v2764_v12, 0.0  ;;  %v2769_v8 = vadd.f32 %v5901_v7, %v2696_v61  ;;  %v6561_v12 = vld [vmem:[#allocation57_spill] sm:$0xff] }
 0x3b9   :  { %v2694_v44 = vmul.f32 %v5909_v26, %v6556_v30  ;;  %v2829_v53 = vmax.f32 %v2765_v29, 0.0  ;;  %v2766_v27 = vadd.f32 %v5903_v6, %v2693_v33  ;;  %v2698_v22 = vmul.f32 %v5909_v26, %v6557_v5  ;;  %v6562_v29 = vld [vmem:[#allocation35_spill] sm:$0xff]  ;;  %v6563_v33 = vld [vmem:[#allocation33_spill] sm:$0xff] }
 0x3ba   :  { %v2770_v18 = vadd.f32 %v5903_v6, %v2697_v57  ;;  %v6091_v63 = vpack.c.bf16 %v2828_v52, %v2824_v31  ;;  %v2833_v60 = vmax.f32 %v2769_v8, 0.0  ;;  %v2695_v17 = vmul.f32 %v5911_v19, %v6558_v10  ;;  %v6564_v52 = vld [vmem:[#allocation34_spill] sm:$0xff] }
 0x3bb   :  { %v2767_v58 = vadd.f32 %v5913_v23, %v2694_v44  ;;  %v2830_v37 = vmax.f32 %v2766_v27, 0.0  ;;  %v2771_v24 = vadd.f32 %v5913_v23, %v2698_v22  ;;  %v2699_v51 = vmul.f32 %v5911_v19, %v6559_v54 }
 0x3bc   :  { %v2834_v62 = vmax.f32 %v2770_v18, 0.0  ;;  %v6100_v3 = vpack.c.bf16 %v2833_v60, %v2829_v53  ;;  %v2768_v1 = vadd.f32 %v5915_v41, %v2695_v17  ;;  %v2700_v13 = vmul.f32 %v5905_v34, %v6560_v38  ;;  %v6565_v53 = vld [vmem:[#allocation42_spill] sm:$0xff]  ;;  %v6566_v60 = vld [vmem:[#allocation48_spill] sm:$0xff] }
 0x3bd   :  { %3159 = vmatmul.bf16.gmra.mxu0 %v5994_v0  ;;  %v2831_v32 = vmax.f32 %v2767_v58, 0.0  ;;  %3208 = vmatmul.bf16.gmra.mxu1 %v6015_v40  ;;  %v2835_v43 = vmax.f32 %v2771_v24, 0.0  ;;  %v2772_v20 = vadd.f32 %v5915_v41, %v2699_v51  ;;  %v2704_v0 = vmul.f32 %v5905_v34, %v6561_v12  ;;  %v6569_v12 = vld [vmem:[#allocation59_spill] sm:$0xff] }
 0x3be   :  { %3257 = vmatmul.bf16.gmra.mxu2 %v6022_v35  ;;  %v6107_v46 = vpack.c.bf16 %v2834_v62, %v2830_v37  ;;  %v2832_v61 = vmax.f32 %v2768_v1, 0.0  ;;  %v2773_v31 = vadd.f32 %v5901_v7, %v2700_v13  ;;  %v2701_v11 = vmul.f32 %v5907_v14, %v6562_v29  ;;  %v6567_v62 = vld [vmem:[#allocation49_spill] sm:$0xff]  ;;  %v6568_v1 = vld [vmem:[#allocation58_spill] sm:$0xff]  ;;  %v6570_v29 = vld [vmem:[#allocation44_spill] sm:$0xff] }
 0x3bf   :  { %3306 = vmatmul.bf16.gmra.mxu3 %v6029_v9  ;;  %v2705_v40 = vmul.f32 %v5907_v14, %v6563_v33  ;;  %v6118_v35 = vpack.c.bf16 %v2835_v43, %v2831_v32  ;;  %v2836_v36 = vmax.f32 %v2772_v20, 0.0  ;;  %v2777_v57 = vadd.f32 %v5901_v7, %v2704_v0  ;;  %v6571_v33 = vld [vmem:[#allocation36_spill] sm:$0xff] }
 0x3c0   :  { %v2702_v8 = vmul.f32 %v5909_v26, %v6564_v52  ;;  %v2837_v30 = vmax.f32 %v2773_v31, 0.0  ;;  %v2774_v9 = vadd.f32 %v5903_v6, %v2701_v11  ;;  %v2706_v27 = vmul.f32 %v5909_v26, %v6565_v53  ;;  %v6573_v53 = vld [vmem:[#allocation37_spill] sm:$0xff] }
 0x3c1   :  { %v2778_v44 = vadd.f32 %v5903_v6, %v2705_v40  ;;  %v2876_v18 = vpack.c.bf16 %v2836_v36, %v2832_v61  ;;  %v2841_v5 = vmax.f32 %v2777_v57, 0.0  ;;  %v2703_v58 = vmul.f32 %v5911_v19, %v6566_v60 }
 0x3c2   :  { %v2775_v22 = vadd.f32 %v5913_v23, %v2702_v8  ;;  %v2838_v10 = vmax.f32 %v2774_v9, 0.0  ;;  %v2779_v37 = vadd.f32 %v5913_v23, %v2706_v27  ;;  %v2707_v24 = vmul.f32 %v5911_v19, %v6567_v62  ;;  %v6572_v8 = vld [vmem:[#allocation18_spill] sm:$0xff] }
 0x3c3   :  { %v2842_v17 = vmax.f32 %v2778_v44, 0.0  ;;  %v2877_v54 = vpack.c.bf16 %v2841_v5, %v2837_v30  ;;  %v2776_v32 = vadd.f32 %v5915_v41, %v2703_v58  ;;  %v2708_v38 = vmul.f32 %v5905_v34, %v6568_v1 }
 0x3c4   :  { %v2839_v51 = vmax.f32 %v2775_v22, 0.0  ;;  %v2843_v43 = vmax.f32 %v2779_v37, 0.0  ;;  %v2780_v20 = vadd.f32 %v5915_v41, %v2707_v24  ;;  %v2712_v0 = vmul.f32 %v5905_v34, %v6569_v12 }
 0x3c5   :  { %v2878_v13 = vpack.c.bf16 %v2842_v17, %v2838_v10  ;;  %v2840_v61 = vmax.f32 %v2776_v32, 0.0  ;;  %v2781_v31 = vadd.f32 %v5901_v7, %v2708_v38  ;;  %v2709_v11 = vmul.f32 %v5907_v14, %v6570_v29 }
 0x3c6   :  { %v2713_v40 = vmul.f32 %v5907_v14, %v6571_v33  ;;  %v2879_v36 = vpack.c.bf16 %v2843_v43, %v2839_v51  ;;  %v2844_v57 = vmax.f32 %v2780_v20, 0.0  ;;  %v2785_v52 = vadd.f32 %v5901_v7, %v2712_v0  ;;  %v6574_v14 = vld [vmem:[#allocation15_spill] sm:$0xff] }
 0x3c7   :  { %v2710_v30 = vmul.f32 %v5909_v26, %v6572_v8  ;;  %v2845_v9 = vmax.f32 %v2781_v31, 0.0  ;;  %v2782_v44 = vadd.f32 %v5903_v6, %v2709_v11  ;;  %v2714_v27 = vmul.f32 %v5909_v26, %v6573_v53 }
 0x3c8   :  { %v2786_v34 = vadd.f32 %v5903_v6, %v2713_v40  ;;  %v2880_v5 = vpack.c.bf16 %v2844_v57, %v2840_v61  ;;  %v2849_v22 = vmax.f32 %v2785_v52, 0.0  ;;  %v2711_v58 = vmul.f32 %v5911_v19, %v6574_v14 }
 0x3c9   :  { %v2783_v60 = vadd.f32 %v5913_v23, %v2710_v30  ;;  %v2846_v10 = vmax.f32 %v2782_v44, 0.0  ;;  %v2787_v17 = vadd.f32 %v5913_v23, %v2714_v27  ;;  %v2788_v37 = vadd.f32 %v5915_v41, %v5959_v56 }
 0x3ca   :  { %v2850_v7 = vmax.f32 %v2786_v34, 0.0  ;;  %v2866_v6 = vpack.c.bf16 %v2818_v47, %v2814_v48  ;;  %v2881_v26 = vpack.c.bf16 %v2849_v22, %v2845_v9  ;;  %v2784_v24 = vadd.f32 %v5915_v41, %v2711_v58 }
 0x3cb   :  { %v2847_v62 = vmax.f32 %v2783_v60, 0.0  ;;  %v2867_v19 = vpack.c.bf16 %v2819_v45, %v2815_v4  ;;  %v2851_v32 = vmax.f32 %v2787_v17, 0.0  ;;  %v2852_v23 = vmax.f32 %v2788_v37, 0.0 }
 0x3cc   :  { %v2882_v51 = vpack.c.bf16 %v2850_v7, %v2846_v10  ;;  %v2868_v56 = vpack.c.bf16 %v2820_v59, %v2816_v15  ;;  %v2848_v16 = vmax.f32 %v2784_v24, 0.0 }
 0x3cd   :  { %3164 = vmatmul.bf16.gmra.mxu0 %v6037_v42  ;;  %3213 = vmatmul.bf16.gmra.mxu1 %v2866_v6  ;;  %v2883_v39 = vpack.c.bf16 %v2851_v32, %v2847_v62 }
 0x3ce   :  { %3262 = vmatmul.bf16.gmra.mxu2 %v2867_v19  ;;  %v2884_v41 = vpack.c.bf16 %v2852_v23, %v2848_v16 }
 0x3cf   :  { %3311 = vmatmul.bf16.gmra.mxu3 %v2868_v56 }
 0x3dd   :  { %3169 = vmatmul.bf16.gmra.mxu0 %v6067_v25  ;;  %3218 = vmatmul.bf16.gmra.mxu1 %v6072_v50 }
 0x3de   :  { %3267 = vmatmul.bf16.gmra.mxu2 %v6082_v21 }
 0x3df   :  { %3316 = vmatmul.bf16.gmra.mxu3 %v6091_v63 }
 0x3ed   :  { %3174 = vmatmul.bf16.gmra.mxu0 %v6100_v3  ;;  %3223 = vmatmul.bf16.gmra.mxu1 %v6107_v46 }
 0x3ee   :  { %3272 = vmatmul.bf16.gmra.mxu2 %v6118_v35 }
 0x3ef   :  { %3321 = vmatmul.bf16.gmra.mxu3 %v2876_v18 }
 0x3fd   :  { %3179 = vmatmul.bf16.gmra.mxu0 %v2877_v54  ;;  %3228 = vmatmul.bf16.gmra.mxu1 %v2878_v13 }
 0x3fe   :  { %3277 = vmatmul.bf16.gmra.mxu2 %v2879_v36 }
 0x3ff   :  { %3326 = vmatmul.bf16.gmra.mxu3 %v2880_v5 }
 0x40d   :  { %3184 = vmatmul.bf16.gmra.mxu0 %v2881_v26  ;;  %3233 = vmatmul.bf16.gmra.mxu1 %v2882_v51 }
 0x40e   :  { %3282 = vmatmul.bf16.gmra.mxu2 %v2883_v39 }
 0x40f   :  { %3331 = vmatmul.bf16.gmra.mxu3 %v2884_v41 }
 0x41a   :  { %v3150_v2 = vpop.f32.mrf.mxu0  ;;  %v3199_v55 = vpop.f32.mrf.mxu1 }
 0x41b   :  { %v3200_v48 = vadd.f32 %v3199_v55, %v3150_v2 }
 0x421   :  { %v3248_v28 = vpop.f32.mrf.mxu2 }
 0x422   :  { %v3249_v42 = vadd.f32 %v3248_v28, %v3200_v48  ;;  %v3297_v47 = vpop.f32.mrf.mxu3  ;;  %v3152_v49 = vpop.f32.mrf.mxu0 }
 0x423   :  { %v3201_v4 = vpop.f32.mrf.mxu1 }
 0x424   :  { %v6178_v45 = vadd.f32 %v3297_v47, %v3249_v42  ;;  %v3202_v15 = vadd.f32 %v3201_v4, %v3152_v49 }
 0x429   :  { %v3250_v59 = vpop.f32.mrf.mxu2 }
 0x42a   :  { %v3251_v25 = vadd.f32 %v3250_v59, %v3202_v15  ;;  %v3299_v50 = vpop.f32.mrf.mxu3  ;;  %v3155_v21 = vpop.f32.mrf.mxu0 }
 0x42b   :  { %v3204_v63 = vpop.f32.mrf.mxu1 }
 0x42c   :  { %v6180_v3 = vadd.f32 %v3299_v50, %v3251_v25  ;;  %v3205_v46 = vadd.f32 %v3204_v63, %v3155_v21 }
 0x42e   :  { %v3337_v35 = vadd.f32 %v6180_v3, %v6178_v45 }
 0x431   :  { %v3253_v18 = vpop.f32.mrf.mxu2 }
 0x432   :  { %v3254_v54 = vadd.f32 %v3253_v18, %v3205_v46  ;;  %v3302_v1 = vpop.f32.mrf.mxu3  ;;  %v3157_v38 = vpop.f32.mrf.mxu0 }
 0x433   :  { %v3206_v13 = vpop.f32.mrf.mxu1 }
 0x434   :  { %v6184_v43 = vadd.f32 %v3302_v1, %v3254_v54  ;;  %v3207_v20 = vadd.f32 %v3206_v13, %v3157_v38 }
 0x436   :  { %v3338_v12 = vadd.f32 %v3337_v35, %v6184_v43 }
 0x439   :  { %v3255_v0 = vpop.f32.mrf.mxu2 }
 0x43a   :  { %v3256_v61 = vadd.f32 %v3255_v0, %v3207_v20  ;;  %v3304_v31 = vpop.f32.mrf.mxu3  ;;  %v3160_v29 = vpop.f32.mrf.mxu0 }
 0x43b   :  { %v3209_v11 = vpop.f32.mrf.mxu1 }
 0x43c   :  { %v6187_v33 = vadd.f32 %v3304_v31, %v3256_v61  ;;  %v3210_v40 = vadd.f32 %v3209_v11, %v3160_v29 }
 0x43e   :  { %v3339_v36 = vadd.f32 %v3338_v12, %v6187_v33 }
 0x441   :  { %v3258_v57 = vpop.f32.mrf.mxu2 }
 0x442   :  { %v3259_v52 = vadd.f32 %v3258_v57, %v3210_v40  ;;  %v3307_v8 = vpop.f32.mrf.mxu3  ;;  %v3162_v30 = vpop.f32.mrf.mxu0 }
 0x443   :  { %v3211_v9 = vpop.f32.mrf.mxu1 }
 0x444   :  { %v6190_v44 = vadd.f32 %v3307_v8, %v3259_v52  ;;  %v3212_v47 = vadd.f32 %v3211_v9, %v3162_v30 }
 0x446   :  { %v3340_v34 = vadd.f32 %v3339_v36, %v6190_v44 }
 0x449   :  { %v3260_v53 = vpop.f32.mrf.mxu2 }
 0x44a   :  { %v3309_v27 = vpop.f32.mrf.mxu3  ;;  %v3165_v5 = vpop.f32.mrf.mxu0  ;;  %v3261_v4 = vadd.f32 %v3260_v53, %v3212_v47 }
 0x44b   :  { %v3214_v22 = vpop.f32.mrf.mxu1 }
 0x44c   :  { %v3215_v15 = vadd.f32 %v3214_v22, %v3165_v5  ;;  %v6193_v46 = vadd.f32 %v3309_v27, %v3261_v4 }
 0x44e   :  { %v3341_v20 = vadd.f32 %v3340_v34, %v6193_v46 }
 0x451   :  { %v3263_v60 = vpop.f32.mrf.mxu2 }
 0x452   :  { %v3312_v14 = vpop.f32.mrf.mxu3  ;;  %v3167_v58 = vpop.f32.mrf.mxu0  ;;  %v3264_v21 = vadd.f32 %v3263_v60, %v3215_v15 }
 0x453   :  { %v3216_v10 = vpop.f32.mrf.mxu1 }
 0x454   :  { %v3217_v63 = vadd.f32 %v3216_v10, %v3167_v58  ;;  %v6195_v54 = vadd.f32 %v3312_v14, %v3264_v21 }
 0x456   :  { %v3342_v40 = vadd.f32 %v3341_v20, %v6195_v54 }
 0x459   :  { %v3265_v7 = vpop.f32.mrf.mxu2 }
 0x45a   :  { %v3314_v17 = vpop.f32.mrf.mxu3  ;;  %v3170_v37 = vpop.f32.mrf.mxu0  ;;  %v3266_v35 = vadd.f32 %v3265_v7, %v3217_v63 }
 0x45b   :  { %v3219_v6 = vpop.f32.mrf.mxu1 }
 0x45c   :  { %v3220_v18 = vadd.f32 %v3219_v6, %v3170_v37  ;;  %v6198_v12 = vadd.f32 %v3314_v17, %v3266_v35 }
 0x45e   :  { %v3343_v8 = vadd.f32 %v3342_v40, %v6198_v12 }
 0x461   :  { %v3268_v26 = vpop.f32.mrf.mxu2 }
 0x462   :  { %v3317_v62 = vpop.f32.mrf.mxu3  ;;  %v3172_v24 = vpop.f32.mrf.mxu0  ;;  %v3269_v1 = vadd.f32 %v3268_v26, %v3220_v18 }
 0x463   :  { %v3221_v19 = vpop.f32.mrf.mxu1 }
 0x464   :  { %v3222_v38 = vadd.f32 %v3221_v19, %v3172_v24  ;;  %v3318_v36 = vadd.f32 %v3317_v62, %v3269_v1 }
 0x466   :  { %v3344_v27 = vadd.f32 %v3343_v8, %v3318_v36 }
 0x469   :  { %v3270_v51 = vpop.f32.mrf.mxu2 }
 0x46a   :  { %v3319_v32 = vpop.f32.mrf.mxu3  ;;  %v3175_v23 = vpop.f32.mrf.mxu0  ;;  %v3271_v0 = vadd.f32 %v3270_v51, %v3222_v38 }
 0x46b   :  { %v3224_v56 = vpop.f32.mrf.mxu1 }
 0x46c   :  { %v3225_v61 = vadd.f32 %v3224_v56, %v3175_v23  ;;  %v3320_v30 = vadd.f32 %v3319_v32, %v3271_v0 }
 0x46e   :  { %v3345_v14 = vadd.f32 %v3344_v27, %v3320_v30 }
 0x471   :  { %v3273_v16 = vpop.f32.mrf.mxu2 }
 0x472   :  { %v3322_v39 = vpop.f32.mrf.mxu3  ;;  %v3177_v41 = vpop.f32.mrf.mxu0  ;;  %v3274_v57 = vadd.f32 %v3273_v16, %v3225_v61 }
 0x473   :  { %v3226_v2 = vpop.f32.mrf.mxu1 }
 0x474   :  { %v3227_v52 = vadd.f32 %v3226_v2, %v3177_v41  ;;  %v3323_v5 = vadd.f32 %v3322_v39, %v3274_v57 }
 0x476   :  { %v3346_v37 = vadd.f32 %v3345_v14, %v3323_v5 }
 0x479   :  { %v3275_v55 = vpop.f32.mrf.mxu2 }
 0x47a   :  { %v3324_v48 = vpop.f32.mrf.mxu3  ;;  %v3180_v28 = vpop.f32.mrf.mxu0  ;;  %v3276_v9 = vadd.f32 %v3275_v55, %v3227_v52 }
 0x47b   :  { %v3229_v42 = vpop.f32.mrf.mxu1 }
 0x47c   :  { %v3230_v53 = vadd.f32 %v3229_v42, %v3180_v28  ;;  %v3325_v58 = vadd.f32 %v3324_v48, %v3276_v9 }
 0x47e   :  { %v3347_v19 = vadd.f32 %v3346_v37, %v3325_v58 }
 0x481   :  { %v3278_v49 = vpop.f32.mrf.mxu2 }
 0x482   :  { %v3327_v59 = vpop.f32.mrf.mxu3  ;;  %v3182_v25 = vpop.f32.mrf.mxu0  ;;  %v3279_v34 = vadd.f32 %v3278_v49, %v3230_v53 }
 0x483   :  { %v3231_v50 = vpop.f32.mrf.mxu1 }
 0x484   :  { %v3232_v22 = vadd.f32 %v3231_v50, %v3182_v25  ;;  %v3328_v6 = vadd.f32 %v3327_v59, %v3279_v34 }
 0x486   :  { %v3348_v32 = vadd.f32 %v3347_v19, %v3328_v6 }
 0x489   :  { %v3280_v13 = vpop.f32.mrf.mxu2 }
 0x48a   :  { %v3329_v31 = vpop.f32.mrf.mxu3  ;;  %v3185_v29 = vpop.f32.mrf.mxu0  ;;  %v3281_v10 = vadd.f32 %v3280_v13, %v3232_v22 }
 0x48b   :  { %v3234_v11 = vpop.f32.mrf.mxu1 }
 0x48c   :  { %v3235_v7 = vadd.f32 %v3234_v11, %v3185_v29  ;;  %v3330_v51 = vadd.f32 %v3329_v31, %v3281_v10 }
 0x48e   :  { %v3349_v39 = vadd.f32 %v3348_v32, %v3330_v51 }
 0x491   :  { %v3283_v60 = vpop.f32.mrf.mxu2 }
 0x492   :  { %v3332_v17 = vpop.f32.mrf.mxu3  ;;  %v3284_v26 = vadd.f32 %v3283_v60, %v3235_v7  ;;  %v3187_v62 = vpop.f32.mrf.mxu0 }
 0x493   :  { %v3236_v24 = vpop.f32.mrf.mxu1 }
 0x494   :  { %v3333_v23 = vadd.f32 %v3332_v17, %v3284_v26  ;;  %v3237_v56 = vadd.f32 %v3236_v24, %v3187_v62 }
 0x496   :  { %v3350_v55 = vadd.f32 %v3349_v39, %v3333_v23 }
 0x499   :  { %v3285_v16 = vpop.f32.mrf.mxu2 }
 0x49a   :  { %v3286_v41 = vadd.f32 %v3285_v16, %v3237_v56  ;;  %v3334_v2 = vpop.f32.mrf.mxu3 }
 0x49c   :  { %v3335_v28 = vadd.f32 %v3334_v2, %v3286_v41 }
 0x49e   :  { %v3351_v48 = vadd.f32 %v3350_v55, %v3335_v28 }
 0x4a0   :  { %v3352_v42 = vrot.slane %v3351_v48, 4 }
 0x4a2   :  { %v3353_v47 = vadd.f32 %v3352_v42, %v3351_v48 }
 0x4a4   :  { %v3354_v49 = vrot.slane %v3353_v47, 2 }
 0x4a6   :  { %v3355_v4 = vadd.f32 %v3354_v49, %v3353_v47 }
 0x4a8   :  { %v3356_v15 = vrot.slane %v3355_v4, 1 }
 0x4aa   :  { %v3357_v59 = vadd.f32 %v3356_v15, %v3355_v4  ;;  %v82_v4 = vld [vmem:[#allocation8 + $0x2] sm:$0x1] }
 0x4ac   :  { %v3358_v25 = vmul.f32 0.0078125, %v3357_v59 }
 0x4ae   :  { %v6203_v50 = vsub.f32 %v6178_v45, %v3358_v25  ;;  %v6206_v21 = vsub.f32 %v6180_v3, %v3358_v25  ;;  %v6209_v63 = vsub.f32 %v6184_v43, %v3358_v25  ;;  %v6212_v35 = vsub.f32 %v6187_v33, %v3358_v25 }
 0x4af   :  { %v6215_v18 = vsub.f32 %v6190_v44, %v3358_v25  ;;  %v6224_v13 = vsub.f32 %v6193_v46, %v3358_v25  ;;  %v6229_v44 = vsub.f32 %v6195_v54, %v3358_v25  ;;  %v6234_v61 = vsub.f32 %v6198_v12, %v3358_v25 }
 0x4b0   :  { %v3375_v1 = vmul.f32 %v6203_v50, %v6203_v50  ;;  %v3376_v38 = vmul.f32 %v6206_v21, %v6206_v21  ;;  %v3377_v45 = vmul.f32 %v6209_v63, %v6209_v63  ;;  %v3378_v43 = vmul.f32 %v6212_v35, %v6212_v35 }
 0x4b1   :  { %v3379_v20 = vmul.f32 %v6215_v18, %v6215_v18  ;;  %v3380_v31 = vmul.f32 %v6224_v13, %v6224_v13  ;;  %v3367_v46 = vsub.f32 %v3318_v36, %v3358_v25  ;;  %v3381_v11 = vmul.f32 %v6229_v44, %v6229_v44 }
 0x4b2   :  { %v3391_v3 = vadd.f32 %v3376_v38, %v3375_v1  ;;  %v3368_v57 = vsub.f32 %v3320_v30, %v3358_v25  ;;  %v3382_v54 = vmul.f32 %v6234_v61, %v6234_v61  ;;  %v6242_v8 = vsub.f32 %v3323_v5, %v3358_v25 }
 0x4b3   :  { %v3383_v9 = vmul.f32 %v3367_v46, %v3367_v46  ;;  %v6244_v12 = vsub.f32 %v3325_v58, %v3358_v25  ;;  %v6246_v22 = vsub.f32 %v3328_v6, %v3358_v25  ;;  %v6250_v14 = vsub.f32 %v3330_v51, %v3358_v25 }
 0x4b4   :  { %v3392_v33 = vadd.f32 %v3391_v3, %v3377_v45  ;;  %v3384_v27 = vmul.f32 %v3368_v57, %v3368_v57  ;;  %v3385_v36 = vmul.f32 %v6242_v8, %v6242_v8  ;;  %v6254_v5 = vsub.f32 %v3333_v23, %v3358_v25 }
 0x4b5   :  { %v3386_v30 = vmul.f32 %v6244_v12, %v6244_v12  ;;  %v3387_v58 = vmul.f32 %v6246_v22, %v6246_v22  ;;  %v6258_v17 = vsub.f32 %v3335_v28, %v3358_v25  ;;  %v3388_v37 = vmul.f32 %v6250_v14, %v6250_v14 }
 0x4b6   :  { %v3393_v0 = vadd.f32 %v3392_v33, %v3378_v43  ;;  %v3389_v26 = vmul.f32 %v6254_v5, %v6254_v5  ;;  %v4669_v43 = vld [vmem:[#allocation8 + $0x3] ss:$0 sm:$0xff] }
 0x4b7   :  { %v3390_v24 = vmul.f32 %v6258_v17, %v6258_v17 }
 0x4b8   :  { %v3394_v29 = vadd.f32 %v3393_v0, %v3379_v20 }
 0x4ba   :  { %v3395_v40 = vadd.f32 %v3394_v29, %v3380_v31 }
 0x4bc   :  { %v3396_v52 = vadd.f32 %v3395_v40, %v3381_v11 }
 0x4be   :  { %v3397_v53 = vadd.f32 %v3396_v52, %v3382_v54 }
 0x4c0   :  { %v3398_v34 = vadd.f32 %v3397_v53, %v3383_v9 }
 0x4c2   :  { %v3399_v60 = vadd.f32 %v3398_v34, %v3384_v27 }
 0x4c4   :  { %v3400_v10 = vadd.f32 %v3399_v60, %v3385_v36 }
 0x4c6   :  { %v3401_v7 = vadd.f32 %v3400_v10, %v3386_v30 }
 0x4c8   :  { %v3402_v6 = vadd.f32 %v3401_v7, %v3387_v58 }
 0x4ca   :  { %v3403_v62 = vadd.f32 %v3402_v6, %v3388_v37 }
 0x4cc   :  { %v3404_v19 = vadd.f32 %v3403_v62, %v3389_v26 }
 0x4ce   :  { %v3405_v51 = vadd.f32 %v3404_v19, %v3390_v24 }
 0x4d0   :  { %v3406_v32 = vrot.slane %v3405_v51, 4 }
 0x4d2   :  { %v3407_v23 = vadd.f32 %v3406_v32, %v3405_v51 }
 0x4d4   :  { %v3408_v56 = vrot.slane %v3407_v23, 2 }
 0x4d6   :  { %v3409_v16 = vadd.f32 %v3408_v56, %v3407_v23 }
 0x4d8   :  { %v3410_v39 = vrot.slane %v3409_v16, 1 }
 0x4da   :  { %v3411_v41 = vadd.f32 %v3410_v39, %v3409_v16 }
 0x4dc   :  { %v3412_v2 = vmul.f32 0.0078125, %v3411_v41 }
 0x4de   :  { %v3413_v55 = vadd.f32 1e-05, %v3412_v2 }
 0x4e0   :  { %4678 = vrsqrt.f32 %v3413_v55  ;;  %vm3420_vm0 = vweird.f32 %v3413_v55 }
 0x4e6   :  { %v4679_v28 = vpop.eup %4678 }
 0x4e7   :  { %v3415_v48 = vmul.f32 %v4679_v28, %v3413_v55  ;;  %vm3421_vm15 = vweird.f32 %v4679_v28 }
 0x4e8   :  { %vm3422_vm1 = vmor %vm3420_vm0, %vm3421_vm15 }
 0x4e9   :  { %v3416_v42 = vmul.f32 %v4679_v28, %v3415_v48 }
 0x4eb   :  { %v3417_v47 = vmul.f32 0.5, %v3416_v42 }
 0x4ed   :  { %v3418_v49 = vsub.f32 1.5, %v3417_v47 }
 0x4ef   :  { %v3419_v15 = vmul.f32 %v4679_v28, %v3418_v49 }
 0x4f1   :  { %v3423_v59 = vsel %vm3422_vm1, %v4679_v28, %v3419_v15 }
 0x4f2   :  { %v3424_v25 = vmul.f32 %v3423_v59, %v82_v4 }
 0x4f4   :  { %v3425_v1 = vperm.slane %v3424_v25, 0 }
 0x4f6   :  { %v3426_v38 = vmul.f32 %v3425_v1, %v6203_v50  ;;  %v3427_v45 = vmul.f32 %v3425_v1, %v6206_v21  ;;  %v3428_v3 = vmul.f32 %v3425_v1, %v6209_v63  ;;  %v3429_v33 = vmul.f32 %v3425_v1, %v6212_v35 }
 0x4f7   :  { %v3430_v20 = vmul.f32 %v3425_v1, %v6215_v18  ;;  %v3434_v0 = vmul.f32 %v3425_v1, %v3367_v46  ;;  %v3435_v31 = vmul.f32 %v3425_v1, %v3368_v57  ;;  %v3431_v29 = vmul.f32 %v3425_v1, %v6224_v13 }
 0x4f8   :  { %v3432_v11 = vmul.f32 %v3425_v1, %v6229_v44  ;;  %v3443_v40 = vadd.f32 %v4669_v43, %v3426_v38  ;;  %v3444_v54 = vadd.f32 %v4669_v43, %v3427_v45  ;;  %v3445_v52 = vadd.f32 %v4669_v43, %v3428_v3 }
 0x4f9   :  { %v3433_v50 = vmul.f32 %v3425_v1, %v6234_v61  ;;  %v3446_v9 = vadd.f32 %v4669_v43, %v3429_v33  ;;  %v3447_v21 = vadd.f32 %v4669_v43, %v3430_v20  ;;  %v3448_v63 = vadd.f32 %v4669_v43, %v3431_v29 }
 0x4fa   :  { %3459 = vst [vmem:[#allocation10] sm:$0xff] %v3443_v40  ;;  %v3436_v35 = vmul.f32 %v3425_v1, %v6242_v8  ;;  %v3449_v53 = vadd.f32 %v4669_v43, %v3432_v11  ;;  %v3437_v18 = vmul.f32 %v3425_v1, %v6244_v12  ;;  %v3438_v13 = vmul.f32 %v3425_v1, %v6246_v22 }
 0x4fb   :  { %3460 = vst [vmem:[#allocation10 + $0x8] sm:$0xff] %v3444_v54  ;;  %v3450_v46 = vadd.f32 %v4669_v43, %v3433_v50  ;;  %v3451_v44 = vadd.f32 %v4669_v43, %v3434_v0  ;;  %v3439_v57 = vmul.f32 %v3425_v1, %v6250_v14  ;;  %v3452_v61 = vadd.f32 %v4669_v43, %v3435_v31 }
 0x4fc   :  { %3461 = vst [vmem:[#allocation10 + $0x10] sm:$0xff] %v3445_v52  ;;  %v3440_v27 = vmul.f32 %v3425_v1, %v6254_v5  ;;  %v3453_v34 = vadd.f32 %v4669_v43, %v3436_v35  ;;  %v3441_v8 = vmul.f32 %v3425_v1, %v6258_v17  ;;  %v3454_v36 = vadd.f32 %v4669_v43, %v3437_v18 }
 0x4fd   :  { %3462 = vst [vmem:[#allocation10 + $0x18] sm:$0xff] %v3446_v9  ;;  %v3455_v60 = vadd.f32 %v4669_v43, %v3438_v13  ;;  %v3456_v12 = vadd.f32 %v4669_v43, %v3439_v57 }
 0x4fe   :  { %3463 = vst [vmem:[#allocation10 + $0x20] sm:$0xff] %v3447_v21  ;;  %v3457_v22 = vadd.f32 %v4669_v43, %v3440_v27  ;;  %v3458_v14 = vadd.f32 %v4669_v43, %v3441_v8 }
 0x4ff   :  { %3464 = vst [vmem:[#allocation10 + $0x28] sm:$0xff] %v3448_v63 }
 0x500   :  { %3465 = vst [vmem:[#allocation10 + $0x30] sm:$0xff] %v3449_v53 }
 0x501   :  { %3466 = vst [vmem:[#allocation10 + $0x38] sm:$0xff] %v3450_v46 }
 0x502   :  { %3467 = vst [vmem:[#allocation10 + $0x40] sm:$0xff] %v3451_v44 }
 0x503   :  { %3468 = vst [vmem:[#allocation10 + $0x48] sm:$0xff] %v3452_v61 }
 0x504   :  { %3469 = vst [vmem:[#allocation10 + $0x50] sm:$0xff] %v3453_v34 }
 0x505   :  { %3470 = vst [vmem:[#allocation10 + $0x58] sm:$0xff] %v3454_v36 }
 0x506   :  { %3471 = vst [vmem:[#allocation10 + $0x60] sm:$0xff] %v3455_v60 }
 0x507   :  { %3472 = vst [vmem:[#allocation10 + $0x68] sm:$0xff] %v3456_v12 }
 0x508   :  { %3473 = vst [vmem:[#allocation10 + $0x70] sm:$0xff] %v3457_v22 }
 0x509   :  { %3474 = vst [vmem:[#allocation10 + $0x78] sm:$0xff] %v3458_v14 }
 0x50a   :  { %3487 = dma.vmem_to_hbm [thread:$0]  %s3480_s3, 2048, %s3482_s15, [#allocation4], %s4819_s16, %s4819_s16, %s4820_s17  }
 0x50b   :  { %4806 = dma.done.wait [#allocation4], 2048  }
 0x50c   :  { %4807 = vsyncadd [#allocation4], 4294965248 }
 0x50d   :  { %3492 = vsyncpa [#allocation3], 1 }
 0x50e   :  { %3493 = vsyncpa [#allocation6], 1 }
 0x50f   :  { %3494 = vsyncpa [#allocation9], 1 }
 0x510   :  { %3495 = vsyncpa [#allocation4], 1 }

</bundles_post_ra>
